<compile_context>
chip_gen: v6e
topology: v6e:2x2x1
jax: 0.10.0
libtpu: 0.0.40
codegen_flags: <defaults>
</compile_context>

<pallas_src>
import functools

import jax
import jax.numpy as jnp
import numpy as np
from jax import lax
from jax.experimental import pallas as pl
from jax.experimental.pallas import tpu as pltpu


def _round_up(x: int, m: int) -> int:
    return ((x + m - 1) // m) * m


# --------------------------------------------------------------------------
# Kernel
# --------------------------------------------------------------------------
def bilstm_kernel(x_f_ref, x_b_ref, lens_ref,
                  wih_f_ref, whh_f_ref, b_f_ref,
                  wih_b_ref, whh_b_ref, b_b_ref,
                  out_f_ref, out_b_ref,
                  hf_ref, cf_ref, hb_ref, cb_ref,
                  gx_f_s, gx_b_s,
                  *, hidden_pad: int, chunk: int, unroll: int):
    """One time-chunk of a bidirectional LSTM.

    x_f_ref / x_b_ref : [TC*Bp, D]  bf16  forward chunk / time-reversed chunk
    lens_ref          : [Bp, 1]     int32 sequence lengths (resident)
    wih_* : [D, 4Hp] bf16   whh_* : [Hp, 4Hp] bf16   b_* : [1, 4Hp] f32
    out_f_ref / out_b_ref : [TC*Bp, Hp] bf16  per-direction outputs
    hf/cf/hb/cb_ref       : [Bp, Hp]    f32   final states; constant block
                                              index -> carried across chunks
    gx_f_s / gx_b_s       : [TC*Bp, 4Hp] f32  VMEM scratch (hoisted projection)
    Gate order inside the 4Hp axis is (i, f, o, g).
    """
    Hp = hidden_pad
    TC = chunk
    Bp = hf_ref.shape[0]

    step_i = pl.program_id(0)
    n_chunks = pl.num_programs(0)

    @pl.when(step_i == 0)
    def _init():
        hf_ref[...] = jnp.zeros_like(hf_ref)
        cf_ref[...] = jnp.zeros_like(cf_ref)
        hb_ref[...] = jnp.zeros_like(hb_ref)
        cb_ref[...] = jnp.zeros_like(cb_ref)

    # ---- hoisted input projection: one big MXU matmul per direction/chunk,
    #      landed in VMEM scratch (biases folded in) ----
    gx_f_s[...] = (jnp.dot(x_f_ref[...], wih_f_ref[...],
                           preferred_element_type=jnp.float32) + b_f_ref[...])
    gx_b_s[...] = (jnp.dot(x_b_ref[...], wih_b_ref[...],
                           preferred_element_type=jnp.float32) + b_b_ref[...])

    whh_f = whh_f_ref[...]
    whh_b = whh_b_ref[...]
    lens_v = lens_ref[...]                       # [Bp, 1] int32, resident
    t0_f = step_i * TC                           # global time of local step 0
    t0_b = (n_chunks - 1 - step_i) * TC          # global time base of bwd chunk

    def lstm_step(gx_row, t_glob, h_prev, c_prev, whh):
        # gx_row already contains x @ W_ih + (b_ih + b_hh).
        # NOTE: h_prev / W_hh are bf16 MXU operands; keep W_hh f32 if drift is
        # observed on very long sequences.
        gates = gx_row + jnp.dot(h_prev.astype(jnp.bfloat16), whh,
                                 preferred_element_type=jnp.float32)
        # One contiguous sigmoid slab (i, f, o) via tanh: 1 EUP op per gate.
        sig = 0.5 * jnp.tanh(0.5 * gates[:, 0:3 * Hp]) + 0.5
        i_g = sig[:, 0 * Hp:1 * Hp]
        f_g = sig[:, 1 * Hp:2 * Hp]
        o_g = sig[:, 2 * Hp:3 * Hp]
        g_g = jnp.tanh(gates[:, 3 * Hp:4 * Hp])
        c_new = f_g * c_prev + i_g * g_g
        h_new = o_g * jnp.tanh(c_new)
        m = t_glob < lens_v                      # [Bp, 1] bool packed-seq mask
        c_out = jnp.where(m, c_new, c_prev)      # keep prev state on pad steps
        h_out = jnp.where(m, h_new, h_prev)
        y = jnp.where(m, h_new, 0.0)             # zero padded outputs
        return h_out, c_out, y

    def body(s, carry):
        h_f, c_f, h_b, c_b = carry
        # ---- forward direction: local step s ----
        row_f = pl.multiple_of(s * Bp, Bp)
        h_f, c_f, y_f = lstm_step(gx_f_s[pl.ds(row_f, Bp), :], t0_f + s,
                                  h_f, c_f, whh_f)
        out_f_ref[pl.ds(row_f, Bp), :] = y_f.astype(out_f_ref.dtype)

        # ---- backward direction: local step TC-1-s of its reversed chunk ----
        sb = TC - 1 - s
        row_b = pl.multiple_of(sb * Bp, Bp)
        h_b, c_b, y_b = lstm_step(gx_b_s[pl.ds(row_b, Bp), :], t0_b + sb,
                                  h_b, c_b, whh_b)
        out_b_ref[pl.ds(row_b, Bp), :] = y_b.astype(out_b_ref.dtype)
        return (h_f, c_f, h_b, c_b)

    carry0 = (hf_ref[...], cf_ref[...], hb_ref[...], cb_ref[...])
    h_f, c_f, h_b, c_b = lax.fori_loop(0, TC, body, carry0, unroll=unroll)

    # Commit carried state to the resident output buffers once per chunk.
    hf_ref[...] = h_f
    cf_ref[...] = c_f
    hb_ref[...] = h_b
    cb_ref[...] = c_b


# --------------------------------------------------------------------------
# Parameter init (mirrors nn.LSTM / nn.Linear shapes)
# --------------------------------------------------------------------------
def init_params(key, input_emb_dim: int, hidden_size: int):
    D, H = input_emb_dim, hidden_size
    k_lstm = 1.0 / np.sqrt(H)
    k_lin = 1.0 / np.sqrt(2 * H)
    keys = jax.random.split(key, 12)

    def u(k, shape, bound):
        return jax.random.uniform(k, shape, jnp.float32, -bound, bound)

    return {
        "hidden_size": H,
        "w_ih_f": u(keys[0], (4 * H, D), k_lstm),
        "w_hh_f": u(keys[1], (4 * H, H), k_lstm),
        "b_ih_f": u(keys[2], (4 * H,), k_lstm),
        "b_hh_f": u(keys[3], (4 * H,), k_lstm),
        "w_ih_b": u(keys[4], (4 * H, D), k_lstm),
        "w_hh_b": u(keys[5], (4 * H, H), k_lstm),
        "b_ih_b": u(keys[6], (4 * H,), k_lstm),
        "b_hh_b": u(keys[7], (4 * H,), k_lstm),
        "w_red_h": u(keys[8], (H, 2 * H), k_lin),
        "b_red_h": u(keys[9], (H,), k_lin),
        "w_red_c": u(keys[10], (H, 2 * H), k_lin),
        "b_red_c": u(keys[11], (H,), k_lin),
    }


# --------------------------------------------------------------------------
# Weight packing / padding.  PyTorch gate order (i,f,g,o) -> kernel (i,f,o,g),
# each gate block padded to Hp lanes.  Padding is mathematically inert.
# --------------------------------------------------------------------------
def _pack_lstm_weights(w_ih, w_hh, b_ih, b_hh, H, Hp):
    D = w_ih.shape[1]
    w_ih_t = w_ih.T            # [D, 4H]
    w_hh_t = w_hh.T            # [H, 4H]
    b = b_ih + b_hh            # [4H]
    wih_p = jnp.zeros((D, 4 * Hp), jnp.float32)
    whh_p = jnp.zeros((Hp, 4 * Hp), jnp.float32)
    b_p = jnp.zeros((1, 4 * Hp), jnp.float32)
    order = (0, 1, 3, 2)       # kernel slot -> torch gate index (i, f, o, g)
    for slot, g in enumerate(order):
        wih_p = wih_p.at[:, slot * Hp:slot * Hp + H].set(
            w_ih_t[:, g * H:(g + 1) * H])
        whh_p = whh_p.at[:H, slot * Hp:slot * Hp + H].set(
            w_hh_t[:, g * H:(g + 1) * H])
        b_p = b_p.at[0, slot * Hp:slot * Hp + H].set(b[g * H:(g + 1) * H])
    return wih_p.astype(jnp.bfloat16), whh_p.astype(jnp.bfloat16), b_p


# --------------------------------------------------------------------------
# Forward wrapper (matches the PyTorch module's forward signature)
# --------------------------------------------------------------------------
def rnn_encoder_forward(embedded_words, input_lens, params, *,
                        time_chunk: int = 16, unroll: int = 4):
    """
    embedded_words: [B, T, D] float32 (batch-first, like the PyTorch module)
    input_lens:     host numpy int array of shape [B]
    returns: (output [max_len, B, 2H] time-major, context_mask [B, max_len],
              (new_h [B, H], new_c [B, H]))
    """
    B, T, D = embedded_words.shape
    H = params["hidden_size"]
    input_lens = np.asarray(input_lens)
    max_len = int(input_lens.max())

    Hp = _round_up(H, 128)          # lane-dense hidden
    Bp = _round_up(B, 16)           # bf16 sublane-tile-aligned batch
    TC = int(time_chunk)
    Tp = _round_up(T, TC)
    nc = Tp // TC
    unroll = max(1, min(int(unroll), TC))

    # time-major padded input, flattened to [Tp*Bp, D] bf16 (no in-kernel reshape)
    x_tm = jnp.transpose(embedded_words, (1, 0, 2)).astype(jnp.float32)
    x_tm = jnp.pad(x_tm, ((0, Tp - T), (0, Bp - B), (0, 0)))
    x_flat = x_tm.reshape(Tp * Bp, D).astype(jnp.bfloat16)

    lens_arr = jnp.zeros((Bp, 1), jnp.int32).at[:B, 0].set(
        jnp.asarray(input_lens, jnp.int32))

    wih_f, whh_f, b_f = _pack_lstm_weights(params["w_ih_f"], params["w_hh_f"],
                                           params["b_ih_f"], params["b_hh_f"],
                                           H, Hp)
    wih_b, whh_b, b_b = _pack_lstm_weights(params["w_ih_b"], params["w_hh_b"],
                                           params["b_ih_b"], params["b_hh_b"],
                                           H, Hp)

    kernel = functools.partial(bilstm_kernel, hidden_pad=Hp, chunk=TC,
                               unroll=unroll)

    def _const_spec(shape):
        zeros = (0,) * len(shape)
        return pl.BlockSpec(shape, lambda i, _z=zeros: _z)

    grid_spec = pltpu.PrefetchScalarGridSpec(
        num_scalar_prefetch=0,
        grid=(nc,),
        in_specs=[
            pl.BlockSpec((TC * Bp, D), lambda i: (i, 0)),            # x fwd
            pl.BlockSpec((TC * Bp, D), lambda i: (nc - 1 - i, 0)),   # x bwd
            _const_spec(lens_arr.shape),                             # lens
            _const_spec(wih_f.shape), _const_spec(whh_f.shape), _const_spec(b_f.shape),
            _const_spec(wih_b.shape), _const_spec(whh_b.shape), _const_spec(b_b.shape),
        ],
        out_specs=(
            pl.BlockSpec((TC * Bp, Hp), lambda i: (i, 0)),           # out fwd
            pl.BlockSpec((TC * Bp, Hp), lambda i: (nc - 1 - i, 0)),  # out bwd
            pl.BlockSpec((Bp, Hp), lambda i: (0, 0)),                # h_f final
            pl.BlockSpec((Bp, Hp), lambda i: (0, 0)),                # c_f final
            pl.BlockSpec((Bp, Hp), lambda i: (0, 0)),                # h_b final
            pl.BlockSpec((Bp, Hp), lambda i: (0, 0)),                # c_b final
        ),
        scratch_shapes=[
            pltpu.VMEM((TC * Bp, 4 * Hp), jnp.float32),              # gx fwd
            pltpu.VMEM((TC * Bp, 4 * Hp), jnp.float32),              # gx bwd
        ],
    )

    # ---- generation-aware VMEM budget ----
    need = (
        2 * 2 * TC * Bp * D * 2            # x, double-buffered, 2 dirs (bf16)
        + 2 * 2 * TC * Bp * Hp * 2         # out, double-buffered, 2 dirs (bf16)
        + 2 * (D * 4 * Hp + Hp * 4 * Hp) * 2   # wih + whh, 2 dirs (bf16)
        + 2 * 4 * Hp * 4                   # biases (f32)
        + 4 * Bp * Hp * 4                  # final-state buffers (f32)
        + 2 * TC * Bp * 4 * Hp * 4         # gx scratch (f32)
        + Bp * 4                           # lens
    )
    try:
        vmem_cap = int(pltpu.get_tpu_info().vmem_capacity_bytes)
    except Exception:
        vmem_cap = 64 * 1024 * 1024
    vmem_limit = int(min(max(2 * need, 32 * 1024 * 1024),
                         max(int(0.75 * vmem_cap), 32 * 1024 * 1024)))

    out_f, out_b, h_f_p, c_f_p, h_b_p, c_b_p = pl.pallas_call(
        kernel,
        out_shape=(
            jax.ShapeDtypeStruct((Tp * Bp, Hp), jnp.bfloat16),
            jax.ShapeDtypeStruct((Tp * Bp, Hp), jnp.bfloat16),
            jax.ShapeDtypeStruct((Bp, Hp), jnp.float32),
            jax.ShapeDtypeStruct((Bp, Hp), jnp.float32),
            jax.ShapeDtypeStruct((Bp, Hp), jnp.float32),
            jax.ShapeDtypeStruct((Bp, Hp), jnp.float32),
        ),
        grid_spec=grid_spec,
        compiler_params=pltpu.CompilerParams(
            dimension_semantics=("arbitrary",),       # carried (h, c) over time
            vmem_limit_bytes=vmem_limit,
        ),
    )(x_flat, x_flat, lens_arr,
      wih_f, whh_f, b_f, wih_b, whh_b, b_b)

    # pad_packed_sequence trims to max(sent_lens) and is time-major by default
    out_f3 = out_f.reshape(Tp, Bp, Hp)
    out_b3 = out_b.reshape(Tp, Bp, Hp)
    output = jnp.concatenate([out_f3[:max_len, :B, :H],
                              out_b3[:max_len, :B, :H]],
                             axis=-1).astype(jnp.float32)           # [L, B, 2H]
    context_mask = (jnp.arange(max_len, dtype=jnp.int32)[None, :]
                    < jnp.asarray(input_lens, jnp.int32)[:, None]).astype(jnp.int32)

    # reduce_h_W / reduce_c_W on cat([h_fwd, h_bwd]) — tiny, done in plain XLA
    h_cat = jnp.concatenate([h_f_p[:B, :H], h_b_p[:B, :H]], axis=1)  # [B, 2H]
    c_cat = jnp.concatenate([c_f_p[:B, :H], c_b_p[:B, :H]], axis=1)  # [B, 2H]
    new_h = h_cat @ params["w_red_h"].T + params["b_red_h"]
    new_c = c_cat @ params["w_red_c"].T + params["b_red_c"]
    return output, context_mask, (new_h, new_c)


# --------------------------------------------------------------------------
# Pure-JAX f32 reference (same math as the PyTorch module) for a sanity check
# --------------------------------------------------------------------------
def _reference_forward(embedded_words, input_lens, params):
    B, T, D = embedded_words.shape
    H = params["hidden_size"]
    lens = jnp.asarray(np.asarray(input_lens), jnp.int32)
    x = embedded_words.astype(jnp.float32)
    mask = jnp.arange(T)[None, :] < lens[:, None]          # [B, T]

    def cell(x_t, m, h, c, w_ih, w_hh, b_ih, b_hh):
        gates = x_t @ w_ih.T + h @ w_hh.T + b_ih + b_hh
        i = jax.nn.sigmoid(gates[:, 0:H])
        f = jax.nn.sigmoid(gates[:, H:2 * H])
        g = jnp.tanh(gates[:, 2 * H:3 * H])
        o = jax.nn.sigmoid(gates[:, 3 * H:4 * H])
        c_new = f * c + i * g
        h_new = o * jnp.tanh(c_new)
        m = m[:, None]
        return (jnp.where(m, h_new, h), jnp.where(m, c_new, c),
                jnp.where(m, h_new, 0.0))

    hf = jnp.zeros((B, H)); cf = jnp.zeros((B, H))
    hb = jnp.zeros((B, H)); cb = jnp.zeros((B, H))
    out_f, out_b = [], [None] * T
    for t in range(T):
        hf, cf, y = cell(x[:, t], mask[:, t], hf, cf, params["w_ih_f"],
                         params["w_hh_f"], params["b_ih_f"], params["b_hh_f"])
        out_f.append(y)
    for t in range(T - 1, -1, -1):
        hb, cb, y = cell(x[:, t], mask[:, t], hb, cb, params["w_ih_b"],
                         params["w_hh_b"], params["b_ih_b"], params["b_hh_b"])
        out_b[t] = y
    max_len = int(np.asarray(input_lens).max())
    out = jnp.stack([jnp.concatenate([out_f[t], out_b[t]], axis=1)
                     for t in range(max_len)], axis=0)
    new_h = jnp.concatenate([hf, hb], 1) @ params["w_red_h"].T + params["b_red_h"]
    new_c = jnp.concatenate([cf, cb], 1) @ params["w_red_c"].T + params["b_red_c"]
    return out, (new_h, new_c)


if __name__ == "__main__":
    B, T, D, H = 2, 8, 16, 32
    key = jax.random.PRNGKey(0)
    k_param, k_x = jax.random.split(key)

    params = init_params(k_param, input_emb_dim=D, hidden_size=H)
    embedded_words = jax.random.normal(k_x, (B, T, D), jnp.float32)
    input_lens = np.array([8, 5], dtype=np.int32)   # variable-length batch

    # time_chunk=4 here so the test exercises multi-chunk state carry
    output, context_mask, (new_h, new_c) = rnn_encoder_forward(
        embedded_words, input_lens, params, time_chunk=4, unroll=4)
    jax.block_until_ready((output, context_mask, new_h, new_c))

    # shape checks (pad_packed_sequence default is time-major)
    assert output.shape == (int(input_lens.max()), B, 2 * H)
    assert context_mask.shape == (B, int(input_lens.max()))
    assert new_h.shape == (B, H) and new_c.shape == (B, H)

    # numerical sanity check vs. f32 pure-JAX reference (kernel uses bf16 MXU
    # operands and bf16 output writeback)
    ref_out, (ref_h, ref_c) = _reference_forward(embedded_words, input_lens, params)
    np.testing.assert_allclose(np.asarray(output), np.asarray(ref_out),
                               atol=5e-2, rtol=5e-2)
    np.testing.assert_allclose(np.asarray(new_h), np.asarray(ref_h),
                               atol=5e-2, rtol=5e-2)
    np.testing.assert_allclose(np.asarray(new_c), np.asarray(ref_c),
                               atol=5e-2, rtol=5e-2)

    print("KERNEL_OK")
</pallas_src>

<mosaic_0001>
module attributes {stable_mosaic.version = 11 : i64} {
  func.func @bilstm_kernel(%arg0: i32, %arg1: memref<64x16xbf16, #tpu.memory_space<vmem>>, %arg2: memref<64x16xbf16, #tpu.memory_space<vmem>>, %arg3: memref<16x1xi32, #tpu.memory_space<vmem>>, %arg4: memref<16x512xbf16, #tpu.memory_space<vmem>>, %arg5: memref<128x512xbf16, #tpu.memory_space<vmem>>, %arg6: memref<1x512xf32, #tpu.memory_space<vmem>>, %arg7: memref<16x512xbf16, #tpu.memory_space<vmem>>, %arg8: memref<128x512xbf16, #tpu.memory_space<vmem>>, %arg9: memref<1x512xf32, #tpu.memory_space<vmem>>, %arg10: memref<64x128xbf16, #tpu.memory_space<vmem>>, %arg11: memref<64x128xbf16, #tpu.memory_space<vmem>>, %arg12: memref<16x128xf32, #tpu.memory_space<vmem>>, %arg13: memref<16x128xf32, #tpu.memory_space<vmem>>, %arg14: memref<16x128xf32, #tpu.memory_space<vmem>>, %arg15: memref<16x128xf32, #tpu.memory_space<vmem>>, %arg16: memref<64x512xf32, #tpu.memory_space<vmem>>, %arg17: memref<64x512xf32, #tpu.memory_space<vmem>>) attributes {dimension_semantics = [#tpu.dimension_semantics<arbitrary>], iteration_bounds = array<i64: 2>, scalar_prefetch = 0 : i64, scratch_operands = 2 : i64, tpu.core_type = #tpu.core_type<tc>, window_params = [{transform_indices = @transform_0, window_bounds = array<i64: 64, 16>}, {transform_indices = @transform_1, window_bounds = array<i64: 64, 16>}, {pipeline_mode = #tpu.pipeline_mode<synchronous>, transform_indices = @transform_2, window_bounds = array<i64: 16, 1>}, {pipeline_mode = #tpu.pipeline_mode<synchronous>, transform_indices = @transform_3, window_bounds = array<i64: 16, 512>}, {pipeline_mode = #tpu.pipeline_mode<synchronous>, transform_indices = @transform_4, window_bounds = array<i64: 128, 512>}, {pipeline_mode = #tpu.pipeline_mode<synchronous>, transform_indices = @transform_5, window_bounds = array<i64: 1, 512>}, {pipeline_mode = #tpu.pipeline_mode<synchronous>, transform_indices = @transform_6, window_bounds = array<i64: 16, 512>}, {pipeline_mode = #tpu.pipeline_mode<synchronous>, transform_indices = @transform_7, window_bounds = array<i64: 128, 512>}, {pipeline_mode = #tpu.pipeline_mode<synchronous>, transform_indices = @transform_8, window_bounds = array<i64: 1, 512>}, {transform_indices = @transform_9, window_bounds = array<i64: 64, 128>}, {transform_indices = @transform_10, window_bounds = array<i64: 64, 128>}, {pipeline_mode = #tpu.pipeline_mode<synchronous>, transform_indices = @transform_11, window_bounds = array<i64: 16, 128>}, {pipeline_mode = #tpu.pipeline_mode<synchronous>, transform_indices = @transform_12, window_bounds = array<i64: 16, 128>}, {pipeline_mode = #tpu.pipeline_mode<synchronous>, transform_indices = @transform_13, window_bounds = array<i64: 16, 128>}, {pipeline_mode = #tpu.pipeline_mode<synchronous>, transform_indices = @transform_14, window_bounds = array<i64: 16, 128>}]} {
    %c0_i32 = arith.constant 0 : i32
    %0 = arith.cmpi eq, %arg0, %c0_i32 : i32
    %1 = arith.extui %0 : i1 to i32
    %c0_i32_0 = arith.constant 0 : i32
    %2 = arith.cmpi ne, %1, %c0_i32_0 : i32
    scf.if %2 {
      %cst_110 = arith.constant 0.000000e+00 : f32
      %363 = vector.broadcast %cst_110 : f32 to vector<16x128xf32>
      %c0_111 = arith.constant 0 : index
      %c0_112 = arith.constant 0 : index
      %364 = vector.load %arg12[%c0_111, %c0_112] : memref<16x128xf32, #tpu.memory_space<vmem>>, vector<16x128xf32>
      tpu.vector_store %arg12[%c0_111, %c0_112], %363 {strides = array<i32>} : memref<16x128xf32, #tpu.memory_space<vmem>>, vector<16x128xf32>,
      %cst_113 = arith.constant 0.000000e+00 : f32
      %365 = vector.broadcast %cst_113 : f32 to vector<16x128xf32>
      %c0_114 = arith.constant 0 : index
      %c0_115 = arith.constant 0 : index
      %366 = vector.load %arg13[%c0_114, %c0_115] : memref<16x128xf32, #tpu.memory_space<vmem>>, vector<16x128xf32>
      tpu.vector_store %arg13[%c0_114, %c0_115], %365 {strides = array<i32>} : memref<16x128xf32, #tpu.memory_space<vmem>>, vector<16x128xf32>,
      %cst_116 = arith.constant 0.000000e+00 : f32
      %367 = vector.broadcast %cst_116 : f32 to vector<16x128xf32>
      %c0_117 = arith.constant 0 : index
      %c0_118 = arith.constant 0 : index
      %368 = vector.load %arg14[%c0_117, %c0_118] : memref<16x128xf32, #tpu.memory_space<vmem>>, vector<16x128xf32>
      tpu.vector_store %arg14[%c0_117, %c0_118], %367 {strides = array<i32>} : memref<16x128xf32, #tpu.memory_space<vmem>>, vector<16x128xf32>,
      %cst_119 = arith.constant 0.000000e+00 : f32
      %369 = vector.broadcast %cst_119 : f32 to vector<16x128xf32>
      %c0_120 = arith.constant 0 : index
      %c0_121 = arith.constant 0 : index
      %370 = vector.load %arg15[%c0_120, %c0_121] : memref<16x128xf32, #tpu.memory_space<vmem>>, vector<16x128xf32>
      tpu.vector_store %arg15[%c0_120, %c0_121], %369 {strides = array<i32>} : memref<16x128xf32, #tpu.memory_space<vmem>>, vector<16x128xf32>,
    } else {
    }
    %c0 = arith.constant 0 : index
    %c0_1 = arith.constant 0 : index
    %3 = vector.load %arg1[%c0, %c0_1] : memref<64x16xbf16, #tpu.memory_space<vmem>>, vector<64x16xbf16>
    %c0_2 = arith.constant 0 : index
    %c0_3 = arith.constant 0 : index
    %4 = vector.load %arg4[%c0_2, %c0_3] : memref<16x512xbf16, #tpu.memory_space<vmem>>, vector<16x512xbf16>
    %cst = arith.constant dense<0.000000e+00> : vector<64x512xf32>
    %5 = tpu.matmul %3, %4, %cst {dimension_numbers = #tpu.dot_dimension_numbers<[1], [0], [0], [1], [0, 0, 1, 1], [], []>} : vector<64x16xbf16>, vector<16x512xbf16>, vector<64x512xf32> -> vector<64x512xf32>
    %c0_4 = arith.constant 0 : index
    %c0_5 = arith.constant 0 : index
    %6 = vector.load %arg6[%c0_4, %c0_5] : memref<1x512xf32, #tpu.memory_space<vmem>>, vector<1x512xf32>
    %7 = vector.broadcast %6 : vector<1x512xf32> to vector<64x512xf32>
    %8 = arith.addf %5, %7 : vector<64x512xf32>
    %c0_6 = arith.constant 0 : index
    %c0_7 = arith.constant 0 : index
    %9 = vector.load %arg16[%c0_6, %c0_7] : memref<64x512xf32, #tpu.memory_space<vmem>>, vector<64x512xf32>
    tpu.vector_store %arg16[%c0_6, %c0_7], %8 {strides = array<i32>} : memref<64x512xf32, #tpu.memory_space<vmem>>, vector<64x512xf32>,
    %c0_8 = arith.constant 0 : index
    %c0_9 = arith.constant 0 : index
    %10 = vector.load %arg2[%c0_8, %c0_9] : memref<64x16xbf16, #tpu.memory_space<vmem>>, vector<64x16xbf16>
    %c0_10 = arith.constant 0 : index
    %c0_11 = arith.constant 0 : index
    %11 = vector.load %arg7[%c0_10, %c0_11] : memref<16x512xbf16, #tpu.memory_space<vmem>>, vector<16x512xbf16>
    %cst_12 = arith.constant dense<0.000000e+00> : vector<64x512xf32>
    %12 = tpu.matmul %10, %11, %cst_12 {dimension_numbers = #tpu.dot_dimension_numbers<[1], [0], [0], [1], [0, 0, 1, 1], [], []>} : vector<64x16xbf16>, vector<16x512xbf16>, vector<64x512xf32> -> vector<64x512xf32>
    %c0_13 = arith.constant 0 : index
    %c0_14 = arith.constant 0 : index
    %13 = vector.load %arg9[%c0_13, %c0_14] : memref<1x512xf32, #tpu.memory_space<vmem>>, vector<1x512xf32>
    %14 = vector.broadcast %13 : vector<1x512xf32> to vector<64x512xf32>
    %15 = arith.addf %12, %14 : vector<64x512xf32>
    %c0_15 = arith.constant 0 : index
    %c0_16 = arith.constant 0 : index
    %16 = vector.load %arg17[%c0_15, %c0_16] : memref<64x512xf32, #tpu.memory_space<vmem>>, vector<64x512xf32>
    tpu.vector_store %arg17[%c0_15, %c0_16], %15 {strides = array<i32>} : memref<64x512xf32, #tpu.memory_space<vmem>>, vector<64x512xf32>,
    %c0_17 = arith.constant 0 : index
    %c0_18 = arith.constant 0 : index
    %17 = vector.load %arg5[%c0_17, %c0_18] : memref<128x512xbf16, #tpu.memory_space<vmem>>, vector<128x512xbf16>
    %c0_19 = arith.constant 0 : index
    %c0_20 = arith.constant 0 : index
    %18 = vector.load %arg8[%c0_19, %c0_20] : memref<128x512xbf16, #tpu.memory_space<vmem>>, vector<128x512xbf16>
    %c0_21 = arith.constant 0 : index
    %c0_22 = arith.constant 0 : index
    %19 = vector.load %arg3[%c0_21, %c0_22] : memref<16x1xi32, #tpu.memory_space<vmem>>, vector<16x1xi32>
    %c4_i32 = arith.constant 4 : i32
    %20 = arith.muli %arg0, %c4_i32 : i32
    %c1_i32 = arith.constant 1 : i32
    %21 = arith.subi %c1_i32, %arg0 : i32
    %c4_i32_23 = arith.constant 4 : i32
    %22 = arith.muli %21, %c4_i32_23 : i32
    %c0_24 = arith.constant 0 : index
    %c0_25 = arith.constant 0 : index
    %23 = vector.load %arg12[%c0_24, %c0_25] : memref<16x128xf32, #tpu.memory_space<vmem>>, vector<16x128xf32>
    %c0_26 = arith.constant 0 : index
    %c0_27 = arith.constant 0 : index
    %24 = vector.load %arg13[%c0_26, %c0_27] : memref<16x128xf32, #tpu.memory_space<vmem>>, vector<16x128xf32>
    %c0_28 = arith.constant 0 : index
    %c0_29 = arith.constant 0 : index
    %25 = vector.load %arg14[%c0_28, %c0_29] : memref<16x128xf32, #tpu.memory_space<vmem>>, vector<16x128xf32>
    %c0_30 = arith.constant 0 : index
    %c0_31 = arith.constant 0 : index
    %26 = vector.load %arg15[%c0_30, %c0_31] : memref<16x128xf32, #tpu.memory_space<vmem>>, vector<16x128xf32>
    %c0_i32_32 = arith.constant 0 : i32
    %c16_i32 = arith.constant 16 : i32
    %27 = arith.muli %c0_i32_32, %c16_i32 : i32
    %28 = tpu.assume_multiple %27, 16 : i32
    %29 = arith.index_cast %28 : i32 to index
    %c0_33 = arith.constant 0 : index
    %30 = vector.load %arg16[%29, %c0_33] : memref<64x512xf32, #tpu.memory_space<vmem>>, vector<16x512xf32>
    %31 = arith.addi %20, %c0_i32_32 : i32
    %32 = arith.truncf %23 : vector<16x128xf32> to vector<16x128xbf16>
    %cst_34 = arith.constant dense<0.000000e+00> : vector<16x512xf32>
    %33 = tpu.matmul %32, %17, %cst_34 {dimension_numbers = #tpu.dot_dimension_numbers<[1], [0], [0], [1], [0, 0, 1, 1], [], []>} : vector<16x128xbf16>, vector<128x512xbf16>, vector<16x512xf32> -> vector<16x512xf32>
    %34 = arith.addf %30, %33 : vector<16x512xf32>
    %35 = vector.extract_strided_slice %34 {offsets = [0, 0], sizes = [16, 384], strides = [1, 1]} : vector<16x512xf32> to vector<16x384xf32>
    %cst_35 = arith.constant 5.000000e-01 : f32
    %36 = vector.broadcast %cst_35 : f32 to vector<16x384xf32>
    %37 = arith.mulf %36, %35 : vector<16x384xf32>
    %38 = math.tanh %37 : vector<16x384xf32>
    %cst_36 = arith.constant 5.000000e-01 : f32
    %39 = vector.broadcast %cst_36 : f32 to vector<16x384xf32>
    %40 = arith.mulf %39, %38 : vector<16x384xf32>
    %cst_37 = arith.constant 5.000000e-01 : f32
    %41 = vector.broadcast %cst_37 : f32 to vector<16x384xf32>
    %42 = arith.addf %40, %41 : vector<16x384xf32>
    %43 = vector.extract_strided_slice %42 {offsets = [0, 0], sizes = [16, 128], strides = [1, 1]} : vector<16x384xf32> to vector<16x128xf32>
    %44 = vector.extract_strided_slice %42 {offsets = [0, 128], sizes = [16, 128], strides = [1, 1]} : vector<16x384xf32> to vector<16x128xf32>
    %45 = vector.extract_strided_slice %42 {offsets = [0, 256], sizes = [16, 128], strides = [1, 1]} : vector<16x384xf32> to vector<16x128xf32>
    %46 = vector.extract_strided_slice %34 {offsets = [0, 384], sizes = [16, 128], strides = [1, 1]} : vector<16x512xf32> to vector<16x128xf32>
    %47 = math.tanh %46 : vector<16x128xf32>
    %48 = arith.mulf %44, %24 : vector<16x128xf32>
    %49 = arith.mulf %43, %47 : vector<16x128xf32>
    %50 = arith.addf %48, %49 : vector<16x128xf32>
    %51 = math.tanh %50 : vector<16x128xf32>
    %52 = arith.mulf %45, %51 : vector<16x128xf32>
    %53 = vector.broadcast %31 : i32 to vector<16x1xi32>
    %54 = arith.cmpi slt, %53, %19 : vector<16x1xi32>
    %55 = vector.shape_cast %54 : vector<16x1xi1> to vector<16x1xi1>
    %56 = vector.broadcast %55 : vector<16x1xi1> to vector<16x128xi1>
    %57 = arith.select %56, %50, %24 : vector<16x128xi1>, vector<16x128xf32>
    %58 = vector.shape_cast %54 : vector<16x1xi1> to vector<16x1xi1>
    %59 = vector.broadcast %58 : vector<16x1xi1> to vector<16x128xi1>
    %60 = arith.select %59, %52, %23 : vector<16x128xi1>, vector<16x128xf32>
    %cst_38 = arith.constant 0.000000e+00 : f32
    %61 = vector.shape_cast %54 : vector<16x1xi1> to vector<16x1xi1>
    %62 = vector.broadcast %61 : vector<16x1xi1> to vector<16x128xi1>
    %63 = vector.broadcast %cst_38 : f32 to vector<16x128xf32>
    %64 = arith.select %62, %52, %63 : vector<16x128xi1>, vector<16x128xf32>
    %65 = arith.truncf %64 : vector<16x128xf32> to vector<16x128xbf16>
    %66 = arith.index_cast %28 : i32 to index
    %c0_39 = arith.constant 0 : index
    %67 = vector.load %arg10[%66, %c0_39] : memref<64x128xbf16, #tpu.memory_space<vmem>>, vector<16x128xbf16>
    tpu.vector_store %arg10[%66, %c0_39], %65 {strides = array<i32>} : memref<64x128xbf16, #tpu.memory_space<vmem>>, vector<16x128xbf16>,
    %c3_i32 = arith.constant 3 : i32
    %68 = arith.subi %c3_i32, %c0_i32_32 : i32
    %c16_i32_40 = arith.constant 16 : i32
    %69 = arith.muli %68, %c16_i32_40 : i32
    %70 = tpu.assume_multiple %69, 16 : i32
    %71 = arith.index_cast %70 : i32 to index
    %c0_41 = arith.constant 0 : index
    %72 = vector.load %arg17[%71, %c0_41] : memref<64x512xf32, #tpu.memory_space<vmem>>, vector<16x512xf32>
    %73 = arith.addi %22, %68 : i32
    %74 = arith.truncf %25 : vector<16x128xf32> to vector<16x128xbf16>
    %cst_42 = arith.constant dense<0.000000e+00> : vector<16x512xf32>
    %75 = tpu.matmul %74, %18, %cst_42 {dimension_numbers = #tpu.dot_dimension_numbers<[1], [0], [0], [1], [0, 0, 1, 1], [], []>} : vector<16x128xbf16>, vector<128x512xbf16>, vector<16x512xf32> -> vector<16x512xf32>
    %76 = arith.addf %72, %75 : vector<16x512xf32>
    %77 = vector.extract_strided_slice %76 {offsets = [0, 0], sizes = [16, 384], strides = [1, 1]} : vector<16x512xf32> to vector<16x384xf32>
    %cst_43 = arith.constant 5.000000e-01 : f32
    %78 = vector.broadcast %cst_43 : f32 to vector<16x384xf32>
    %79 = arith.mulf %78, %77 : vector<16x384xf32>
    %80 = math.tanh %79 : vector<16x384xf32>
    %cst_44 = arith.constant 5.000000e-01 : f32
    %81 = vector.broadcast %cst_44 : f32 to vector<16x384xf32>
    %82 = arith.mulf %81, %80 : vector<16x384xf32>
    %cst_45 = arith.constant 5.000000e-01 : f32
    %83 = vector.broadcast %cst_45 : f32 to vector<16x384xf32>
    %84 = arith.addf %82, %83 : vector<16x384xf32>
    %85 = vector.extract_strided_slice %84 {offsets = [0, 0], sizes = [16, 128], strides = [1, 1]} : vector<16x384xf32> to vector<16x128xf32>
    %86 = vector.extract_strided_slice %84 {offsets = [0, 128], sizes = [16, 128], strides = [1, 1]} : vector<16x384xf32> to vector<16x128xf32>
    %87 = vector.extract_strided_slice %84 {offsets = [0, 256], sizes = [16, 128], strides = [1, 1]} : vector<16x384xf32> to vector<16x128xf32>
    %88 = vector.extract_strided_slice %76 {offsets = [0, 384], sizes = [16, 128], strides = [1, 1]} : vector<16x512xf32> to vector<16x128xf32>
    %89 = math.tanh %88 : vector<16x128xf32>
    %90 = arith.mulf %86, %26 : vector<16x128xf32>
    %91 = arith.mulf %85, %89 : vector<16x128xf32>
    %92 = arith.addf %90, %91 : vector<16x128xf32>
    %93 = math.tanh %92 : vector<16x128xf32>
    %94 = arith.mulf %87, %93 : vector<16x128xf32>
    %95 = vector.broadcast %73 : i32 to vector<16x1xi32>
    %96 = arith.cmpi slt, %95, %19 : vector<16x1xi32>
    %97 = vector.shape_cast %96 : vector<16x1xi1> to vector<16x1xi1>
    %98 = vector.broadcast %97 : vector<16x1xi1> to vector<16x128xi1>
    %99 = arith.select %98, %92, %26 : vector<16x128xi1>, vector<16x128xf32>
    %100 = vector.shape_cast %96 : vector<16x1xi1> to vector<16x1xi1>
    %101 = vector.broadcast %100 : vector<16x1xi1> to vector<16x128xi1>
    %102 = arith.select %101, %94, %25 : vector<16x128xi1>, vector<16x128xf32>
    %cst_46 = arith.constant 0.000000e+00 : f32
    %103 = vector.shape_cast %96 : vector<16x1xi1> to vector<16x1xi1>
    %104 = vector.broadcast %103 : vector<16x1xi1> to vector<16x128xi1>
    %105 = vector.broadcast %cst_46 : f32 to vector<16x128xf32>
    %106 = arith.select %104, %94, %105 : vector<16x128xi1>, vector<16x128xf32>
    %107 = arith.truncf %106 : vector<16x128xf32> to vector<16x128xbf16>
    %108 = arith.index_cast %70 : i32 to index
    %c0_47 = arith.constant 0 : index
    %109 = vector.load %arg11[%108, %c0_47] : memref<64x128xbf16, #tpu.memory_space<vmem>>, vector<16x128xbf16>
    tpu.vector_store %arg11[%108, %c0_47], %107 {strides = array<i32>} : memref<64x128xbf16, #tpu.memory_space<vmem>>, vector<16x128xbf16>,
    %c1_i32_48 = arith.constant 1 : i32
    %c16_i32_49 = arith.constant 16 : i32
    %110 = arith.muli %c1_i32_48, %c16_i32_49 : i32
    %111 = tpu.assume_multiple %110, 16 : i32
    %112 = arith.index_cast %111 : i32 to index
    %c0_50 = arith.constant 0 : index
    %113 = vector.load %arg16[%112, %c0_50] : memref<64x512xf32, #tpu.memory_space<vmem>>, vector<16x512xf32>
    %114 = arith.addi %20, %c1_i32_48 : i32
    %115 = arith.truncf %60 : vector<16x128xf32> to vector<16x128xbf16>
    %cst_51 = arith.constant dense<0.000000e+00> : vector<16x512xf32>
    %116 = tpu.matmul %115, %17, %cst_51 {dimension_numbers = #tpu.dot_dimension_numbers<[1], [0], [0], [1], [0, 0, 1, 1], [], []>} : vector<16x128xbf16>, vector<128x512xbf16>, vector<16x512xf32> -> vector<16x512xf32>
    %117 = arith.addf %113, %116 : vector<16x512xf32>
    %118 = vector.extract_strided_slice %117 {offsets = [0, 0], sizes = [16, 384], strides = [1, 1]} : vector<16x512xf32> to vector<16x384xf32>
    %cst_52 = arith.constant 5.000000e-01 : f32
    %119 = vector.broadcast %cst_52 : f32 to vector<16x384xf32>
    %120 = arith.mulf %119, %118 : vector<16x384xf32>
    %121 = math.tanh %120 : vector<16x384xf32>
    %cst_53 = arith.constant 5.000000e-01 : f32
    %122 = vector.broadcast %cst_53 : f32 to vector<16x384xf32>
    %123 = arith.mulf %122, %121 : vector<16x384xf32>
    %cst_54 = arith.constant 5.000000e-01 : f32
    %124 = vector.broadcast %cst_54 : f32 to vector<16x384xf32>
    %125 = arith.addf %123, %124 : vector<16x384xf32>
    %126 = vector.extract_strided_slice %125 {offsets = [0, 0], sizes = [16, 128], strides = [1, 1]} : vector<16x384xf32> to vector<16x128xf32>
    %127 = vector.extract_strided_slice %125 {offsets = [0, 128], sizes = [16, 128], strides = [1, 1]} : vector<16x384xf32> to vector<16x128xf32>
    %128 = vector.extract_strided_slice %125 {offsets = [0, 256], sizes = [16, 128], strides = [1, 1]} : vector<16x384xf32> to vector<16x128xf32>
    %129 = vector.extract_strided_slice %117 {offsets = [0, 384], sizes = [16, 128], strides = [1, 1]} : vector<16x512xf32> to vector<16x128xf32>
    %130 = math.tanh %129 : vector<16x128xf32>
    %131 = arith.mulf %127, %57 : vector<16x128xf32>
    %132 = arith.mulf %126, %130 : vector<16x128xf32>
    %133 = arith.addf %131, %132 : vector<16x128xf32>
    %134 = math.tanh %133 : vector<16x128xf32>
    %135 = arith.mulf %128, %134 : vector<16x128xf32>
    %136 = vector.broadcast %114 : i32 to vector<16x1xi32>
    %137 = arith.cmpi slt, %136, %19 : vector<16x1xi32>
    %138 = vector.shape_cast %137 : vector<16x1xi1> to vector<16x1xi1>
    %139 = vector.broadcast %138 : vector<16x1xi1> to vector<16x128xi1>
    %140 = arith.select %139, %133, %57 : vector<16x128xi1>, vector<16x128xf32>
    %141 = vector.shape_cast %137 : vector<16x1xi1> to vector<16x1xi1>
    %142 = vector.broadcast %141 : vector<16x1xi1> to vector<16x128xi1>
    %143 = arith.select %142, %135, %60 : vector<16x128xi1>, vector<16x128xf32>
    %cst_55 = arith.constant 0.000000e+00 : f32
    %144 = vector.shape_cast %137 : vector<16x1xi1> to vector<16x1xi1>
    %145 = vector.broadcast %144 : vector<16x1xi1> to vector<16x128xi1>
    %146 = vector.broadcast %cst_55 : f32 to vector<16x128xf32>
    %147 = arith.select %145, %135, %146 : vector<16x128xi1>, vector<16x128xf32>
    %148 = arith.truncf %147 : vector<16x128xf32> to vector<16x128xbf16>
    %149 = arith.index_cast %111 : i32 to index
    %c0_56 = arith.constant 0 : index
    %150 = vector.load %arg10[%149, %c0_56] : memref<64x128xbf16, #tpu.memory_space<vmem>>, vector<16x128xbf16>
    tpu.vector_store %arg10[%149, %c0_56], %148 {strides = array<i32>} : memref<64x128xbf16, #tpu.memory_space<vmem>>, vector<16x128xbf16>,
    %c3_i32_57 = arith.constant 3 : i32
    %151 = arith.subi %c3_i32_57, %c1_i32_48 : i32
    %c16_i32_58 = arith.constant 16 : i32
    %152 = arith.muli %151, %c16_i32_58 : i32
    %153 = tpu.assume_multiple %152, 16 : i32
    %154 = arith.index_cast %153 : i32 to index
    %c0_59 = arith.constant 0 : index
    %155 = vector.load %arg17[%154, %c0_59] : memref<64x512xf32, #tpu.memory_space<vmem>>, vector<16x512xf32>
    %156 = arith.addi %22, %151 : i32
    %157 = arith.truncf %102 : vector<16x128xf32> to vector<16x128xbf16>
    %cst_60 = arith.constant dense<0.000000e+00> : vector<16x512xf32>
    %158 = tpu.matmul %157, %18, %cst_60 {dimension_numbers = #tpu.dot_dimension_numbers<[1], [0], [0], [1], [0, 0, 1, 1], [], []>} : vector<16x128xbf16>, vector<128x512xbf16>, vector<16x512xf32> -> vector<16x512xf32>
    %159 = arith.addf %155, %158 : vector<16x512xf32>
    %160 = vector.extract_strided_slice %159 {offsets = [0, 0], sizes = [16, 384], strides = [1, 1]} : vector<16x512xf32> to vector<16x384xf32>
    %cst_61 = arith.constant 5.000000e-01 : f32
    %161 = vector.broadcast %cst_61 : f32 to vector<16x384xf32>
    %162 = arith.mulf %161, %160 : vector<16x384xf32>
    %163 = math.tanh %162 : vector<16x384xf32>
    %cst_62 = arith.constant 5.000000e-01 : f32
    %164 = vector.broadcast %cst_62 : f32 to vector<16x384xf32>
    %165 = arith.mulf %164, %163 : vector<16x384xf32>
    %cst_63 = arith.constant 5.000000e-01 : f32
    %166 = vector.broadcast %cst_63 : f32 to vector<16x384xf32>
    %167 = arith.addf %165, %166 : vector<16x384xf32>
    %168 = vector.extract_strided_slice %167 {offsets = [0, 0], sizes = [16, 128], strides = [1, 1]} : vector<16x384xf32> to vector<16x128xf32>
    %169 = vector.extract_strided_slice %167 {offsets = [0, 128], sizes = [16, 128], strides = [1, 1]} : vector<16x384xf32> to vector<16x128xf32>
    %170 = vector.extract_strided_slice %167 {offsets = [0, 256], sizes = [16, 128], strides = [1, 1]} : vector<16x384xf32> to vector<16x128xf32>
    %171 = vector.extract_strided_slice %159 {offsets = [0, 384], sizes = [16, 128], strides = [1, 1]} : vector<16x512xf32> to vector<16x128xf32>
    %172 = math.tanh %171 : vector<16x128xf32>
    %173 = arith.mulf %169, %99 : vector<16x128xf32>
    %174 = arith.mulf %168, %172 : vector<16x128xf32>
    %175 = arith.addf %173, %174 : vector<16x128xf32>
    %176 = math.tanh %175 : vector<16x128xf32>
    %177 = arith.mulf %170, %176 : vector<16x128xf32>
    %178 = vector.broadcast %156 : i32 to vector<16x1xi32>
    %179 = arith.cmpi slt, %178, %19 : vector<16x1xi32>
    %180 = vector.shape_cast %179 : vector<16x1xi1> to vector<16x1xi1>
    %181 = vector.broadcast %180 : vector<16x1xi1> to vector<16x128xi1>
    %182 = arith.select %181, %175, %99 : vector<16x128xi1>, vector<16x128xf32>
    %183 = vector.shape_cast %179 : vector<16x1xi1> to vector<16x1xi1>
    %184 = vector.broadcast %183 : vector<16x1xi1> to vector<16x128xi1>
    %185 = arith.select %184, %177, %102 : vector<16x128xi1>, vector<16x128xf32>
    %cst_64 = arith.constant 0.000000e+00 : f32
    %186 = vector.shape_cast %179 : vector<16x1xi1> to vector<16x1xi1>
    %187 = vector.broadcast %186 : vector<16x1xi1> to vector<16x128xi1>
    %188 = vector.broadcast %cst_64 : f32 to vector<16x128xf32>
    %189 = arith.select %187, %177, %188 : vector<16x128xi1>, vector<16x128xf32>
    %190 = arith.truncf %189 : vector<16x128xf32> to vector<16x128xbf16>
    %191 = arith.index_cast %153 : i32 to index
    %c0_65 = arith.constant 0 : index
    %192 = vector.load %arg11[%191, %c0_65] : memref<64x128xbf16, #tpu.memory_space<vmem>>, vector<16x128xbf16>
    tpu.vector_store %arg11[%191, %c0_65], %190 {strides = array<i32>} : memref<64x128xbf16, #tpu.memory_space<vmem>>, vector<16x128xbf16>,
    %c2_i32 = arith.constant 2 : i32
    %c16_i32_66 = arith.constant 16 : i32
    %193 = arith.muli %c2_i32, %c16_i32_66 : i32
    %194 = tpu.assume_multiple %193, 16 : i32
    %195 = arith.index_cast %194 : i32 to index
    %c0_67 = arith.constant 0 : index
    %196 = vector.load %arg16[%195, %c0_67] : memref<64x512xf32, #tpu.memory_space<vmem>>, vector<16x512xf32>
    %197 = arith.addi %20, %c2_i32 : i32
    %198 = arith.truncf %143 : vector<16x128xf32> to vector<16x128xbf16>
    %cst_68 = arith.constant dense<0.000000e+00> : vector<16x512xf32>
    %199 = tpu.matmul %198, %17, %cst_68 {dimension_numbers = #tpu.dot_dimension_numbers<[1], [0], [0], [1], [0, 0, 1, 1], [], []>} : vector<16x128xbf16>, vector<128x512xbf16>, vector<16x512xf32> -> vector<16x512xf32>
    %200 = arith.addf %196, %199 : vector<16x512xf32>
    %201 = vector.extract_strided_slice %200 {offsets = [0, 0], sizes = [16, 384], strides = [1, 1]} : vector<16x512xf32> to vector<16x384xf32>
    %cst_69 = arith.constant 5.000000e-01 : f32
    %202 = vector.broadcast %cst_69 : f32 to vector<16x384xf32>
    %203 = arith.mulf %202, %201 : vector<16x384xf32>
    %204 = math.tanh %203 : vector<16x384xf32>
    %cst_70 = arith.constant 5.000000e-01 : f32
    %205 = vector.broadcast %cst_70 : f32 to vector<16x384xf32>
    %206 = arith.mulf %205, %204 : vector<16x384xf32>
    %cst_71 = arith.constant 5.000000e-01 : f32
    %207 = vector.broadcast %cst_71 : f32 to vector<16x384xf32>
    %208 = arith.addf %206, %207 : vector<16x384xf32>
    %209 = vector.extract_strided_slice %208 {offsets = [0, 0], sizes = [16, 128], strides = [1, 1]} : vector<16x384xf32> to vector<16x128xf32>
    %210 = vector.extract_strided_slice %208 {offsets = [0, 128], sizes = [16, 128], strides = [1, 1]} : vector<16x384xf32> to vector<16x128xf32>
    %211 = vector.extract_strided_slice %208 {offsets = [0, 256], sizes = [16, 128], strides = [1, 1]} : vector<16x384xf32> to vector<16x128xf32>
    %212 = vector.extract_strided_slice %200 {offsets = [0, 384], sizes = [16, 128], strides = [1, 1]} : vector<16x512xf32> to vector<16x128xf32>
    %213 = math.tanh %212 : vector<16x128xf32>
    %214 = arith.mulf %210, %140 : vector<16x128xf32>
    %215 = arith.mulf %209, %213 : vector<16x128xf32>
    %216 = arith.addf %214, %215 : vector<16x128xf32>
    %217 = math.tanh %216 : vector<16x128xf32>
    %218 = arith.mulf %211, %217 : vector<16x128xf32>
    %219 = vector.broadcast %197 : i32 to vector<16x1xi32>
    %220 = arith.cmpi slt, %219, %19 : vector<16x1xi32>
    %221 = vector.shape_cast %220 : vector<16x1xi1> to vector<16x1xi1>
    %222 = vector.broadcast %221 : vector<16x1xi1> to vector<16x128xi1>
    %223 = arith.select %222, %216, %140 : vector<16x128xi1>, vector<16x128xf32>
    %224 = vector.shape_cast %220 : vector<16x1xi1> to vector<16x1xi1>
    %225 = vector.broadcast %224 : vector<16x1xi1> to vector<16x128xi1>
    %226 = arith.select %225, %218, %143 : vector<16x128xi1>, vector<16x128xf32>
    %cst_72 = arith.constant 0.000000e+00 : f32
    %227 = vector.shape_cast %220 : vector<16x1xi1> to vector<16x1xi1>
    %228 = vector.broadcast %227 : vector<16x1xi1> to vector<16x128xi1>
    %229 = vector.broadcast %cst_72 : f32 to vector<16x128xf32>
    %230 = arith.select %228, %218, %229 : vector<16x128xi1>, vector<16x128xf32>
    %231 = arith.truncf %230 : vector<16x128xf32> to vector<16x128xbf16>
    %232 = arith.index_cast %194 : i32 to index
    %c0_73 = arith.constant 0 : index
    %233 = vector.load %arg10[%232, %c0_73] : memref<64x128xbf16, #tpu.memory_space<vmem>>, vector<16x128xbf16>
    tpu.vector_store %arg10[%232, %c0_73], %231 {strides = array<i32>} : memref<64x128xbf16, #tpu.memory_space<vmem>>, vector<16x128xbf16>,
    %c3_i32_74 = arith.constant 3 : i32
    %234 = arith.subi %c3_i32_74, %c2_i32 : i32
    %c16_i32_75 = arith.constant 16 : i32
    %235 = arith.muli %234, %c16_i32_75 : i32
    %236 = tpu.assume_multiple %235, 16 : i32
    %237 = arith.index_cast %236 : i32 to index
    %c0_76 = arith.constant 0 : index
    %238 = vector.load %arg17[%237, %c0_76] : memref<64x512xf32, #tpu.memory_space<vmem>>, vector<16x512xf32>
    %239 = arith.addi %22, %234 : i32
    %240 = arith.truncf %185 : vector<16x128xf32> to vector<16x128xbf16>
    %cst_77 = arith.constant dense<0.000000e+00> : vector<16x512xf32>
    %241 = tpu.matmul %240, %18, %cst_77 {dimension_numbers = #tpu.dot_dimension_numbers<[1], [0], [0], [1], [0, 0, 1, 1], [], []>} : vector<16x128xbf16>, vector<128x512xbf16>, vector<16x512xf32> -> vector<16x512xf32>
    %242 = arith.addf %238, %241 : vector<16x512xf32>
    %243 = vector.extract_strided_slice %242 {offsets = [0, 0], sizes = [16, 384], strides = [1, 1]} : vector<16x512xf32> to vector<16x384xf32>
    %cst_78 = arith.constant 5.000000e-01 : f32
    %244 = vector.broadcast %cst_78 : f32 to vector<16x384xf32>
    %245 = arith.mulf %244, %243 : vector<16x384xf32>
    %246 = math.tanh %245 : vector<16x384xf32>
    %cst_79 = arith.constant 5.000000e-01 : f32
    %247 = vector.broadcast %cst_79 : f32 to vector<16x384xf32>
    %248 = arith.mulf %247, %246 : vector<16x384xf32>
    %cst_80 = arith.constant 5.000000e-01 : f32
    %249 = vector.broadcast %cst_80 : f32 to vector<16x384xf32>
    %250 = arith.addf %248, %249 : vector<16x384xf32>
    %251 = vector.extract_strided_slice %250 {offsets = [0, 0], sizes = [16, 128], strides = [1, 1]} : vector<16x384xf32> to vector<16x128xf32>
    %252 = vector.extract_strided_slice %250 {offsets = [0, 128], sizes = [16, 128], strides = [1, 1]} : vector<16x384xf32> to vector<16x128xf32>
    %253 = vector.extract_strided_slice %250 {offsets = [0, 256], sizes = [16, 128], strides = [1, 1]} : vector<16x384xf32> to vector<16x128xf32>
    %254 = vector.extract_strided_slice %242 {offsets = [0, 384], sizes = [16, 128], strides = [1, 1]} : vector<16x512xf32> to vector<16x128xf32>
    %255 = math.tanh %254 : vector<16x128xf32>
    %256 = arith.mulf %252, %182 : vector<16x128xf32>
    %257 = arith.mulf %251, %255 : vector<16x128xf32>
    %258 = arith.addf %256, %257 : vector<16x128xf32>
    %259 = math.tanh %258 : vector<16x128xf32>
    %260 = arith.mulf %253, %259 : vector<16x128xf32>
    %261 = vector.broadcast %239 : i32 to vector<16x1xi32>
    %262 = arith.cmpi slt, %261, %19 : vector<16x1xi32>
    %263 = vector.shape_cast %262 : vector<16x1xi1> to vector<16x1xi1>
    %264 = vector.broadcast %263 : vector<16x1xi1> to vector<16x128xi1>
    %265 = arith.select %264, %258, %182 : vector<16x128xi1>, vector<16x128xf32>
    %266 = vector.shape_cast %262 : vector<16x1xi1> to vector<16x1xi1>
    %267 = vector.broadcast %266 : vector<16x1xi1> to vector<16x128xi1>
    %268 = arith.select %267, %260, %185 : vector<16x128xi1>, vector<16x128xf32>
    %cst_81 = arith.constant 0.000000e+00 : f32
    %269 = vector.shape_cast %262 : vector<16x1xi1> to vector<16x1xi1>
    %270 = vector.broadcast %269 : vector<16x1xi1> to vector<16x128xi1>
    %271 = vector.broadcast %cst_81 : f32 to vector<16x128xf32>
    %272 = arith.select %270, %260, %271 : vector<16x128xi1>, vector<16x128xf32>
    %273 = arith.truncf %272 : vector<16x128xf32> to vector<16x128xbf16>
    %274 = arith.index_cast %236 : i32 to index
    %c0_82 = arith.constant 0 : index
    %275 = vector.load %arg11[%274, %c0_82] : memref<64x128xbf16, #tpu.memory_space<vmem>>, vector<16x128xbf16>
    tpu.vector_store %arg11[%274, %c0_82], %273 {strides = array<i32>} : memref<64x128xbf16, #tpu.memory_space<vmem>>, vector<16x128xbf16>,
    %c3_i32_83 = arith.constant 3 : i32
    %c16_i32_84 = arith.constant 16 : i32
    %276 = arith.muli %c3_i32_83, %c16_i32_84 : i32
    %277 = tpu.assume_multiple %276, 16 : i32
    %278 = arith.index_cast %277 : i32 to index
    %c0_85 = arith.constant 0 : index
    %279 = vector.load %arg16[%278, %c0_85] : memref<64x512xf32, #tpu.memory_space<vmem>>, vector<16x512xf32>
    %280 = arith.addi %20, %c3_i32_83 : i32
    %281 = arith.truncf %226 : vector<16x128xf32> to vector<16x128xbf16>
    %cst_86 = arith.constant dense<0.000000e+00> : vector<16x512xf32>
    %282 = tpu.matmul %281, %17, %cst_86 {dimension_numbers = #tpu.dot_dimension_numbers<[1], [0], [0], [1], [0, 0, 1, 1], [], []>} : vector<16x128xbf16>, vector<128x512xbf16>, vector<16x512xf32> -> vector<16x512xf32>
    %283 = arith.addf %279, %282 : vector<16x512xf32>
    %284 = vector.extract_strided_slice %283 {offsets = [0, 0], sizes = [16, 384], strides = [1, 1]} : vector<16x512xf32> to vector<16x384xf32>
    %cst_87 = arith.constant 5.000000e-01 : f32
    %285 = vector.broadcast %cst_87 : f32 to vector<16x384xf32>
    %286 = arith.mulf %285, %284 : vector<16x384xf32>
    %287 = math.tanh %286 : vector<16x384xf32>
    %cst_88 = arith.constant 5.000000e-01 : f32
    %288 = vector.broadcast %cst_88 : f32 to vector<16x384xf32>
    %289 = arith.mulf %288, %287 : vector<16x384xf32>
    %cst_89 = arith.constant 5.000000e-01 : f32
    %290 = vector.broadcast %cst_89 : f32 to vector<16x384xf32>
    %291 = arith.addf %289, %290 : vector<16x384xf32>
    %292 = vector.extract_strided_slice %291 {offsets = [0, 0], sizes = [16, 128], strides = [1, 1]} : vector<16x384xf32> to vector<16x128xf32>
    %293 = vector.extract_strided_slice %291 {offsets = [0, 128], sizes = [16, 128], strides = [1, 1]} : vector<16x384xf32> to vector<16x128xf32>
    %294 = vector.extract_strided_slice %291 {offsets = [0, 256], sizes = [16, 128], strides = [1, 1]} : vector<16x384xf32> to vector<16x128xf32>
    %295 = vector.extract_strided_slice %283 {offsets = [0, 384], sizes = [16, 128], strides = [1, 1]} : vector<16x512xf32> to vector<16x128xf32>
    %296 = math.tanh %295 : vector<16x128xf32>
    %297 = arith.mulf %293, %223 : vector<16x128xf32>
    %298 = arith.mulf %292, %296 : vector<16x128xf32>
    %299 = arith.addf %297, %298 : vector<16x128xf32>
    %300 = math.tanh %299 : vector<16x128xf32>
    %301 = arith.mulf %294, %300 : vector<16x128xf32>
    %302 = vector.broadcast %280 : i32 to vector<16x1xi32>
    %303 = arith.cmpi slt, %302, %19 : vector<16x1xi32>
    %304 = vector.shape_cast %303 : vector<16x1xi1> to vector<16x1xi1>
    %305 = vector.broadcast %304 : vector<16x1xi1> to vector<16x128xi1>
    %306 = arith.select %305, %299, %223 : vector<16x128xi1>, vector<16x128xf32>
    %307 = vector.shape_cast %303 : vector<16x1xi1> to vector<16x1xi1>
    %308 = vector.broadcast %307 : vector<16x1xi1> to vector<16x128xi1>
    %309 = arith.select %308, %301, %226 : vector<16x128xi1>, vector<16x128xf32>
    %cst_90 = arith.constant 0.000000e+00 : f32
    %310 = vector.shape_cast %303 : vector<16x1xi1> to vector<16x1xi1>
    %311 = vector.broadcast %310 : vector<16x1xi1> to vector<16x128xi1>
    %312 = vector.broadcast %cst_90 : f32 to vector<16x128xf32>
    %313 = arith.select %311, %301, %312 : vector<16x128xi1>, vector<16x128xf32>
    %314 = arith.truncf %313 : vector<16x128xf32> to vector<16x128xbf16>
    %315 = arith.index_cast %277 : i32 to index
    %c0_91 = arith.constant 0 : index
    %316 = vector.load %arg10[%315, %c0_91] : memref<64x128xbf16, #tpu.memory_space<vmem>>, vector<16x128xbf16>
    tpu.vector_store %arg10[%315, %c0_91], %314 {strides = array<i32>} : memref<64x128xbf16, #tpu.memory_space<vmem>>, vector<16x128xbf16>,
    %c3_i32_92 = arith.constant 3 : i32
    %317 = arith.subi %c3_i32_92, %c3_i32_83 : i32
    %c16_i32_93 = arith.constant 16 : i32
    %318 = arith.muli %317, %c16_i32_93 : i32
    %319 = tpu.assume_multiple %318, 16 : i32
    %320 = arith.index_cast %319 : i32 to index
    %c0_94 = arith.constant 0 : index
    %321 = vector.load %arg17[%320, %c0_94] : memref<64x512xf32, #tpu.memory_space<vmem>>, vector<16x512xf32>
    %322 = arith.addi %22, %317 : i32
    %323 = arith.truncf %268 : vector<16x128xf32> to vector<16x128xbf16>
    %cst_95 = arith.constant dense<0.000000e+00> : vector<16x512xf32>
    %324 = tpu.matmul %323, %18, %cst_95 {dimension_numbers = #tpu.dot_dimension_numbers<[1], [0], [0], [1], [0, 0, 1, 1], [], []>} : vector<16x128xbf16>, vector<128x512xbf16>, vector<16x512xf32> -> vector<16x512xf32>
    %325 = arith.addf %321, %324 : vector<16x512xf32>
    %326 = vector.extract_strided_slice %325 {offsets = [0, 0], sizes = [16, 384], strides = [1, 1]} : vector<16x512xf32> to vector<16x384xf32>
    %cst_96 = arith.constant 5.000000e-01 : f32
    %327 = vector.broadcast %cst_96 : f32 to vector<16x384xf32>
    %328 = arith.mulf %327, %326 : vector<16x384xf32>
    %329 = math.tanh %328 : vector<16x384xf32>
    %cst_97 = arith.constant 5.000000e-01 : f32
    %330 = vector.broadcast %cst_97 : f32 to vector<16x384xf32>
    %331 = arith.mulf %330, %329 : vector<16x384xf32>
    %cst_98 = arith.constant 5.000000e-01 : f32
    %332 = vector.broadcast %cst_98 : f32 to vector<16x384xf32>
    %333 = arith.addf %331, %332 : vector<16x384xf32>
    %334 = vector.extract_strided_slice %333 {offsets = [0, 0], sizes = [16, 128], strides = [1, 1]} : vector<16x384xf32> to vector<16x128xf32>
    %335 = vector.extract_strided_slice %333 {offsets = [0, 128], sizes = [16, 128], strides = [1, 1]} : vector<16x384xf32> to vector<16x128xf32>
    %336 = vector.extract_strided_slice %333 {offsets = [0, 256], sizes = [16, 128], strides = [1, 1]} : vector<16x384xf32> to vector<16x128xf32>
    %337 = vector.extract_strided_slice %325 {offsets = [0, 384], sizes = [16, 128], strides = [1, 1]} : vector<16x512xf32> to vector<16x128xf32>
    %338 = math.tanh %337 : vector<16x128xf32>
    %339 = arith.mulf %335, %265 : vector<16x128xf32>
    %340 = arith.mulf %334, %338 : vector<16x128xf32>
    %341 = arith.addf %339, %340 : vector<16x128xf32>
    %342 = math.tanh %341 : vector<16x128xf32>
    %343 = arith.mulf %336, %342 : vector<16x128xf32>
    %344 = vector.broadcast %322 : i32 to vector<16x1xi32>
    %345 = arith.cmpi slt, %344, %19 : vector<16x1xi32>
    %346 = vector.shape_cast %345 : vector<16x1xi1> to vector<16x1xi1>
    %347 = vector.broadcast %346 : vector<16x1xi1> to vector<16x128xi1>
    %348 = arith.select %347, %341, %265 : vector<16x128xi1>, vector<16x128xf32>
    %349 = vector.shape_cast %345 : vector<16x1xi1> to vector<16x1xi1>
    %350 = vector.broadcast %349 : vector<16x1xi1> to vector<16x128xi1>
    %351 = arith.select %350, %343, %268 : vector<16x128xi1>, vector<16x128xf32>
    %cst_99 = arith.constant 0.000000e+00 : f32
    %352 = vector.shape_cast %345 : vector<16x1xi1> to vector<16x1xi1>
    %353 = vector.broadcast %352 : vector<16x1xi1> to vector<16x128xi1>
    %354 = vector.broadcast %cst_99 : f32 to vector<16x128xf32>
    %355 = arith.select %353, %343, %354 : vector<16x128xi1>, vector<16x128xf32>
    %356 = arith.truncf %355 : vector<16x128xf32> to vector<16x128xbf16>
    %357 = arith.index_cast %319 : i32 to index
    %c0_100 = arith.constant 0 : index
    %358 = vector.load %arg11[%357, %c0_100] : memref<64x128xbf16, #tpu.memory_space<vmem>>, vector<16x128xbf16>
    tpu.vector_store %arg11[%357, %c0_100], %356 {strides = array<i32>} : memref<64x128xbf16, #tpu.memory_space<vmem>>, vector<16x128xbf16>,
    %c4_i32_101 = arith.constant 4 : i32
    %c0_102 = arith.constant 0 : index
    %c0_103 = arith.constant 0 : index
    %359 = vector.load %arg12[%c0_102, %c0_103] : memref<16x128xf32, #tpu.memory_space<vmem>>, vector<16x128xf32>
    tpu.vector_store %arg12[%c0_102, %c0_103], %309 {strides = array<i32>} : memref<16x128xf32, #tpu.memory_space<vmem>>, vector<16x128xf32>,
    %c0_104 = arith.constant 0 : index
    %c0_105 = arith.constant 0 : index
    %360 = vector.load %arg13[%c0_104, %c0_105] : memref<16x128xf32, #tpu.memory_space<vmem>>, vector<16x128xf32>
    tpu.vector_store %arg13[%c0_104, %c0_105], %306 {strides = array<i32>} : memref<16x128xf32, #tpu.memory_space<vmem>>, vector<16x128xf32>,
    %c0_106 = arith.constant 0 : index
    %c0_107 = arith.constant 0 : index
    %361 = vector.load %arg14[%c0_106, %c0_107] : memref<16x128xf32, #tpu.memory_space<vmem>>, vector<16x128xf32>
    tpu.vector_store %arg14[%c0_106, %c0_107], %351 {strides = array<i32>} : memref<16x128xf32, #tpu.memory_space<vmem>>, vector<16x128xf32>,
    %c0_108 = arith.constant 0 : index
    %c0_109 = arith.constant 0 : index
    %362 = vector.load %arg15[%c0_108, %c0_109] : memref<16x128xf32, #tpu.memory_space<vmem>>, vector<16x128xf32>
    tpu.vector_store %arg15[%c0_108, %c0_109], %348 {strides = array<i32>} : memref<16x128xf32, #tpu.memory_space<vmem>>, vector<16x128xf32>,
    return
  }
  func.func @transform_0(%arg0: i32) -> (i32, i32) {
    %c0_i32 = arith.constant 0 : i32
    %c0_i32_0 = arith.constant 0 : i32
    return %arg0, %c0_i32 : i32, i32
  }
  func.func @transform_1(%arg0: i32) -> (i32, i32) {
    %c1_i32 = arith.constant 1 : i32
    %0 = arith.subi %c1_i32, %arg0 : i32
    %c0_i32 = arith.constant 0 : i32
    %c0_i32_0 = arith.constant 0 : i32
    return %0, %c0_i32 : i32, i32
  }
  func.func @transform_2(%arg0: i32) -> (i32, i32) {
    %c0_i32 = arith.constant 0 : i32
    %c0_i32_0 = arith.constant 0 : i32
    %c0_i32_1 = arith.constant 0 : i32
    return %c0_i32, %c0_i32_0 : i32, i32
  }
  func.func @transform_3(%arg0: i32) -> (i32, i32) {
    %c0_i32 = arith.constant 0 : i32
    %c0_i32_0 = arith.constant 0 : i32
    %c0_i32_1 = arith.constant 0 : i32
    return %c0_i32, %c0_i32_0 : i32, i32
  }
  func.func @transform_4(%arg0: i32) -> (i32, i32) {
    %c0_i32 = arith.constant 0 : i32
    %c0_i32_0 = arith.constant 0 : i32
    %c0_i32_1 = arith.constant 0 : i32
    return %c0_i32, %c0_i32_0 : i32, i32
  }
  func.func @transform_5(%arg0: i32) -> (i32, i32) {
    %c0_i32 = arith.constant 0 : i32
    %c0_i32_0 = arith.constant 0 : i32
    %c0_i32_1 = arith.constant 0 : i32
    return %c0_i32, %c0_i32_0 : i32, i32
  }
  func.func @transform_6(%arg0: i32) -> (i32, i32) {
    %c0_i32 = arith.constant 0 : i32
    %c0_i32_0 = arith.constant 0 : i32
    %c0_i32_1 = arith.constant 0 : i32
    return %c0_i32, %c0_i32_0 : i32, i32
  }
  func.func @transform_7(%arg0: i32) -> (i32, i32) {
    %c0_i32 = arith.constant 0 : i32
    %c0_i32_0 = arith.constant 0 : i32
    %c0_i32_1 = arith.constant 0 : i32
    return %c0_i32, %c0_i32_0 : i32, i32
  }
  func.func @transform_8(%arg0: i32) -> (i32, i32) {
    %c0_i32 = arith.constant 0 : i32
    %c0_i32_0 = arith.constant 0 : i32
    %c0_i32_1 = arith.constant 0 : i32
    return %c0_i32, %c0_i32_0 : i32, i32
  }
  func.func @transform_9(%arg0: i32) -> (i32, i32) {
    %c0_i32 = arith.constant 0 : i32
    %c0_i32_0 = arith.constant 0 : i32
    return %arg0, %c0_i32 : i32, i32
  }
  func.func @transform_10(%arg0: i32) -> (i32, i32) {
    %c1_i32 = arith.constant 1 : i32
    %0 = arith.subi %c1_i32, %arg0 : i32
    %c0_i32 = arith.constant 0 : i32
    %c0_i32_0 = arith.constant 0 : i32
    return %0, %c0_i32 : i32, i32
  }
  func.func @transform_11(%arg0: i32) -> (i32, i32) {
    %c0_i32 = arith.constant 0 : i32
    %c0_i32_0 = arith.constant 0 : i32
    %c0_i32_1 = arith.constant 0 : i32
    return %c0_i32, %c0_i32_0 : i32, i32
  }
  func.func @transform_12(%arg0: i32) -> (i32, i32) {
    %c0_i32 = arith.constant 0 : i32
    %c0_i32_0 = arith.constant 0 : i32
    %c0_i32_1 = arith.constant 0 : i32
    return %c0_i32, %c0_i32_0 : i32, i32
  }
  func.func @transform_13(%arg0: i32) -> (i32, i32) {
    %c0_i32 = arith.constant 0 : i32
    %c0_i32_0 = arith.constant 0 : i32
    %c0_i32_1 = arith.constant 0 : i32
    return %c0_i32, %c0_i32_0 : i32, i32
  }
  func.func @transform_14(%arg0: i32) -> (i32, i32) {
    %c0_i32 = arith.constant 0 : i32
    %c0_i32_0 = arith.constant 0 : i32
    %c0_i32_1 = arith.constant 0 : i32
    return %c0_i32, %c0_i32_0 : i32, i32
  }
}

</mosaic_0001>

<bundles_post_ra>
// kernel: tpu_custom_call.1
= control target key start
LH: loop header
LB: loop body
LE: loop exit
PB: predicated region body
PF: predicated region fallthrough
CT: control target
= control target key end

     0   :  { %s5644_s0 = inlined_call_operand.vmem [shape: bf16[128,16], index: 0, kind: input, shape index: {}]   ;;  %s5645_s1 = inlined_call_operand.vmem [shape: bf16[128,16], index: 1, kind: input, shape index: {}]   ;;  %s5646_s2 = inlined_call_operand.vmem [shape: s32[16,1], index: 2, kind: input, shape index: {}]   ;;  %s5647_s3 = inlined_call_operand.vmem [shape: bf16[16,512], index: 3, kind: input, shape index: {}]   ;;  %s5648_s4 = inlined_call_operand.hbm [shape: bf16[128,512], index: 4, kind: input, shape index: {}]   ;;  %s5649_s5 = inlined_call_operand.vmem [shape: f32[1,512], index: 5, kind: input, shape index: {}]   ;;  %s5650_s6 = inlined_call_operand.vmem [shape: bf16[16,512], index: 6, kind: input, shape index: {}]   ;;  %s5651_s7 = inlined_call_operand.hbm [shape: bf16[128,512], index: 7, kind: input, shape index: {}]   ;;  %s5652_s8 = inlined_call_operand.vmem [shape: f32[1,512], index: 8, kind: input, shape index: {}]   ;;  %s5653_s9 = inlined_call_operand.hbm [shape: bf16[128,128], index: 9, kind: output, shape index: {0}]   ;;  %s5654_s10 = inlined_call_operand.hbm [shape: bf16[128,128], index: 10, kind: output, shape index: {1}]   ;;  %s5655_s11 = inlined_call_operand.hbm [shape: f32[16,128], index: 11, kind: output, shape index: {2}]   ;;  %s5656_s12 = inlined_call_operand.hbm [shape: f32[16,128], index: 12, kind: output, shape index: {3}]   ;;  %s5657_s13 = inlined_call_operand.hbm [shape: f32[16,128], index: 13, kind: output, shape index: {4}]   ;;  %s5658_s14 = inlined_call_operand.hbm [shape: f32[16,128], index: 14, kind: output, shape index: {5}]  }
   0x1   :  { %5709 = sst [smem:[#allocation94_spill]] %s5648_s4 }
   0x2   :  { %5710 = sst [smem:[#allocation95_spill]] %s5651_s7 }
   0x3   :  { %5711 = sst [smem:[#allocation96_spill]] %s5655_s11 }
   0x4   :  { %20 = vsyncpa [#allocation5], 0 }
   0x5   :  { %21 = vsyncpa [#allocation8], 0 }
   0x6   :  { %22 = vsyncpa [#allocation6], 0 }
   0x7   :  { %24 = vsyncpa [#allocation6 + $0x1], 0 }
   0x8   :  { %25 = vsyncpa [#allocation11], 0 }
   0x9   :  { %27 = vsyncpa [#allocation11 + $0x1], 0 }
   0xa   :  { %28 = vsyncpa [#allocation14], 0 }
   0xb   :  { %29 = vsyncpa [#allocation17], 0  ;;  %s4183_s29 = smov 0   ;;  %s4185_s30 = smov 0  }
   0xc   :  { %s4187_s15 = smov 0   ;;  %s4189_s16 = smov 0  }
   0xd   :  { %s4191_s17 = smov 0   ;;  %s4193_s18 = smov 0  }
   0xe   :  { %s4195_s19 = smov 0  }
   0xf LB: > { %5712 = sst [smem:[#allocation25_spill]] %s4070_s30  ;;  %s4219_s20 = sadd.s32 4294967295, %s4090_s19   ;;  %s4090_s19 = sphi %s4195_s19, %s5919_s19   ;;  %s4086_s18 = sphi %s4193_s18, %s5924_s18   ;;  %s4082_s17 = sphi %s4191_s17, %s5926_s17   ;;  %s4078_s16 = sphi %s4189_s16, %s5925_s16   ;;  %s4074_s15 = sphi %s4187_s15, %s5922_s15   ;;  %s4070_s30 = sphi %s4185_s30, %s5921_s30   ;;  %s4066_s29 = sphi %s4183_s29, %s5920_s29  }
  0x10   : > { %5713 = sst [smem:[#allocation26_spill]] %s4074_s15  ;;  %s5659_s21 = sadd.s32 4294967294, %s4090_s19  }
  0x11   : > { %5714 = sst [smem:[#allocation27_spill]] %s4078_s16  ;;  %s4223_s22 = sadd.s32 1, %s4090_s19  }
  0x12   : > { %5715 = sst [smem:[#allocation28_spill]] %s4086_s18  ;;  %s243_s23 = sadd.s32 1, %s4086_s18 }
  0x13   : > { %5716 = sst [smem:[#allocation29_spill]] %s4090_s19  ;;  %s240_s24 = ssub.s32 %s4090_s19, %s4223_s22 }
  0x14   : > { %5717 = sst [smem:[#allocation30_spill]] %s4223_s22  ;;  %p253_p0 = scmp.ne.s32.totalorder %s4086_s18, %s4082_s17 }
  0x15   : > { %p241_p1 = scmp.eq.s32.totalorder %s240_s24, 0  ;;  %p5662_p2 = scmp.eq.s32.totalorder %s4219_s20, 1 }
  0x16   : > { %p259_p3 = scmp.ne.s32.totalorder %s4082_s17, %s4078_s16  ;;  %p4235_p4 = scmp.eq.s32.totalorder %s5659_s21, 1 }
  0x17   : > { %s4240_s26 = scalar_select %p241_p1, %s4086_s18, %s243_s23  }
  0x18   : > { %p4244_p5 = por %p5662_p2, %p253_p0  ;;  %p4250_p6 = por %p4235_p4, %p259_p3 }
  0x19   : > { %5719 = sst [smem:[#allocation31_spill]] %s4240_s26  ;;  %s266_s24 = ssub.s32 1, %s4090_s19 }
  0x1a   : > { %s5721_s28 = scalar_select %p4250_p6, 1, 0 }
  0x1b   : > { %s267_s21 = ssub.s32 1, %s4223_s22  ;;  %s271_s11 = sadd.s32 1, %s4074_s15 }
  0x1c   : > { %5722 = sst [smem:[#allocation32_spill]] %s5721_s28  ;;  %s268_s16 = ssub.s32 %s266_s24, %s267_s21 }
  0x1d   : > { %p269_p7 = scmp.eq.s32.totalorder %s268_s16, 0  ;;  %p281_p8 = scmp.ne.s32.totalorder %s4074_s15, %s4070_s30 }
  0x1e   : > { %p287_p9 = scmp.ne.s32.totalorder %s4070_s30, %s4066_s29  ;;  %p3121_p10 = scmp.ge.s32.totalorder %s4090_s19, 1 }
  0x1f   : > { %s4263_s23 = scalar_select %p269_p7, %s4074_s15, %s271_s11  }
  0x20   : > { %p4267_p11 = por %p281_p8, %p5662_p2  ;;  %p4273_p12 = por %p287_p9, %p4235_p4 }
  0x21   : > { %5723 = sst [smem:[#allocation33_spill]] %s4263_s23  ;;  %p379_p13 = scmp.lt.s32.totalorder %s4090_s19, 3 }
  0x22   : > { %s5724_s26 = scalar_select %p4267_p11, 1, 0 }
  0x23   : > { %s5725_s18 = scalar_select %p4273_p12, 1, 0 }
  0x24   : > { %p5667_p1 = scmp.eq.s32.totalorder %s4219_s20, 0  ;;  %p4280_p3 = pnand %p3121_p10, %p379_p13 }
  0x25   : > { %5726 = sst [smem:[#allocation34_spill]] %s5725_s18  ;;  %s4092_s11 = smov [#allocation4]  }
  0x26   : > { %s397_s29 = sshll.u32 %s4092_s11, 4  ;;  %p3369_p7 = pneg %p4280_p3  ;;  %s398_s29 = int_to_ptr.vmem [resolvable:$true] %s397_s29 }
  0x27   : > { %s4093_s25 = smov [#allocation7]   ;;  %s3819_s23 = scalar_lea.vmem %s398_s29, 4096 }
  0x28   : > { %p4288_p8 = pnand %p5667_p1, %p3369_p7  ;;  %s416_s24 = sshll.u32 %s4093_s25, 4  ;;  %s417_s24 = int_to_ptr.vmem [resolvable:$true] %s416_s24 }
  0x29   : > { %p3820_p9 = scmp.ne.s32.totalorder %s398_s29, %s3819_s23  ;;  %p3827_p2 = scmp.lt.s32.totalorder %s398_s29, %s398_s29 }
  0x2a   : > { %p3810_p4 = pneg %p4288_p8  ;;  %p3828_p0 = scmp.lt.s32.totalorder %s3819_s23, %s3819_s23 }
  0x2c   : > { %p3822_p10 = pnand %p3820_p9, %p3810_p4  ;;  %p3829_p12 = por %p3828_p0, %p3827_p2 }
  0x2e   : > { %p3823_p13 = pneg %p3822_p10 }
  0x30   : > { %p3830_p7 = pnand %p3829_p12, %p3823_p13 }
  0x32   : > { %3833 = shalt.err (!%p3830_p7)
}
  0x33   : > { %s4094_s11 = smov 256   ;;  %s4095_s15 = smov 16  }
  0x34   : > { %s5729_s4 = sld [smem:[#allocation94_spill]]  ;;  %s3845_s18 = scalar_lea.vmem %s417_s24, 4096 }
  0x35   : > { %p3846_p1 = scmp.ne.s32.totalorder %s417_s24, %s3845_s18  ;;  %p3853_p6 = scmp.lt.s32.totalorder %s417_s24, %s417_s24 }
  0x36   : > { %p3854_p11 = scmp.lt.s32.totalorder %s3845_s18, %s3845_s18 }
  0x37   : > { %p3848_p9 = pnand %p3846_p1, %p3810_p4 }
  0x38   : > { %p3855_p2 = por %p3854_p11, %p3853_p6 }
  0x39   : > { %p3849_p10 = pneg %p3848_p9 }
  0x3a   : > { %3372 = dma.hbm_to_vmem [thread:$0]  (!%p4288_p8), %s5729_s4, 4096, %s398_s29, [#allocation5], %s4094_s11, %s4094_s11, %s4095_s15  }
  0x3b   : > { %p3856_p12 = pnand %p3855_p2, %p3849_p10 }
  0x3d   : > { %3859 = shalt.err (!%p3856_p12)
}
  0x3e   : > { %s5730_s7 = sld [smem:[#allocation95_spill]] }
  0x40   : > { %455 = sbr.rel (%p4280_p3) target bundleno = 1235 (0x4d3), region = 56 }
  0x44   : > { %3375 = dma.hbm_to_vmem [thread:$0]  (!%p4288_p8), %s5730_s7, 4096, %s417_s24, [#allocation8], %s4094_s11, %s4094_s11, %s4095_s15  }
  0x45   : > { %p5731_p0 = scmp.eq.s32.totalorder %s4219_s20, 0 }
  0x47   : > { %4037 = dma.done.wait (%p5731_p0), [#allocation5], 4096   ;;  %p5732_p1 = pmov %p5731_p0 }
  0x48   : > { %p5733_p4 = pmov %p5731_p0 }
  0x49   : > { %4039 = vsyncadd (%p5732_p1), [#allocation5], 4294963200 }
  0x4a   : > { %4041 = dma.done.wait (%p5733_p4), [#allocation8], 4096   ;;  %p5734_p6 = pmov %p5731_p0 }
  0x4b   : > { %s5671_s15 = sand.u32 1, %s4082_s17   ;;  %s505_s18 = sand.u32 1, %s4070_s30  }
  0x4c   : > { %4043 = vsyncadd (%p5734_p6), [#allocation8], 4294963200  ;;  %s3128_s22 = sshll.u32 %s5671_s15, 5  ;;  %s3129_s28 = sshll.u32 %s505_s18, 5 }
  0x4d   : > { %s3130_s16 = sshll.u32 %s4219_s20, 3  ;;  %s4326_s29 = ssub.s32 1, %s4219_s20 }
  0x4e   : > { %p517_p11 = scmp.lt.s32.totalorder %s3130_s16, 15  ;;  %s3132_s21 = sshll.u32 %s4326_s29, 3 }
  0x4f   : > { %p524_p3 = scmp.lt.s32.totalorder %s3132_s21, 15  ;;  %s4339_s15 = scalar_lea.vmem [#allocation9], %s3128_s22 }
  0x50   : > { %s5928_s16 = smov (!%p517_p11, %s3130_s16), 15  ;;  %s4341_s19 = scalar_lea.vmem [#allocation10], %s3129_s28 }
  0x51   : > { %s5930_s21 = smov (!%p524_p3, %s3132_s21), 15  ;;  %s3131_s24 = sshll.u32 %s5928_s16, 2 }
  0x52   : > { %s4332_s23 = scalar_lea.vmem %s5644_s0, %s3131_s24  ;;  %s3133_s4 = sshll.u32 %s5930_s21, 2 }
  0x53   : > { %s4337_s18 = scalar_lea.vmem %s5645_s1, %s3133_s4  ;;  %p5735_p8 = scmp.ne.s32.totalorder %s4219_s20, 0 }
  0x55   : > { %537 = sbr.rel (%p5735_p8) target bundleno = 95 (0x5f), region = 68 }
  0x5a   : > { %v4096_v0 = vmov 0.0  }
  0x5b   : > { %538 = vst [vmem:[#allocation12] sm:$0xff] %v4096_v0  ;;  %539 = vst [vmem:[#allocation12 + $0x8] sm:$0xff] %v4096_v0 }
  0x5c   : > { %540 = vst [vmem:[#allocation13] sm:$0xff] %v4096_v0  ;;  %541 = vst [vmem:[#allocation13 + $0x8] sm:$0xff] %v4096_v0 }
  0x5d   : > { %542 = vst [vmem:[#allocation15] sm:$0xff] %v4096_v0  ;;  %543 = vst [vmem:[#allocation15 + $0x8] sm:$0xff] %v4096_v0 }
  0x5e   : > { %544 = vst [vmem:[#allocation16] sm:$0xff] %v4096_v0  ;;  %545 = vst [vmem:[#allocation16 + $0x8] sm:$0xff] %v4096_v0 }
  0x5f PF: > { %v3468_v1 = vld [vmem:[%s5647_s3 + $0x4] ss:$16 sps:$4 sm:$0xff]   ;;  %v3470_v2 = vld [vmem:[%s5647_s3 + $0xc] ss:$16 sps:$4 sm:$0xff]   ;;  %v5674_v3 = vmov 0   ;;  %vm620_vm0 = vcmask 130048  }
  0x60   : > { %665 = vmatprep.mubr.bf16.mxu0 %v5674_v3  ;;  %738 = vmatprep.mubr.bf16.mxu1 %v5674_v3  ;;  %v3472_v4 = vld [vmem:[%s5647_s3] ss:$16 sps:$4 sm:$0xff]   ;;  %v3473_v5 = vld [vmem:[%s5647_s3 + $0x8] ss:$16 sps:$4 sm:$0xff]   ;;  %v3477_v8 = vld [vmem:[%s5650_s6 + $0x4] ss:$16 sps:$4 sm:$0xff]  }
  0x61   : > { %647 = vmatprep.subr.bf16.mxu0 %v3468_v1  ;;  %3466 = vset.pattern.permute.xlu0 %v5674_v3  ;;  %v3474_v6 = vld [vmem:[%s4332_s23] sm:$0xff]   ;;  %v3478_v9 = vld [vmem:[%s5650_s6 + $0x8] ss:$16 sps:$4 sm:$0xff]   ;;  %v3480_v10 = vld [vmem:[%s5650_s6 + $0xc] ss:$16 sps:$4 sm:$0xff]   ;;  %s4473_s21 = sshll.u32 %s4326_s29, 2 }
  0x62   : > { %720 = vmatprep.subr.bf16.mxu1 %v3470_v2  ;;  %3467 = vset.pattern.permute.xlu1 %v5674_v3  ;;  %v3475_v7 = vld [vmem:[%s5650_s6] ss:$16 sps:$4 sm:$0xff]   ;;  %v3481_v11 = vld [vmem:[%s4332_s23 + $0x8] sm:$0xff]   ;;  %v4379_v12 = vld [vmem:[#allocation4 + $0xe4] ss:$16 sps:$4 sm:$0xff]   ;;  %s1494_s24 = sadd.s32 3, %s4473_s21 }
  0x63   : > { %648 = vmatpush1.bf16.msra.mxu0 %v3472_v4  ;;  %721 = vmatpush1.bf16.msra.mxu1 %v3473_v5  ;;  %v4381_v13 = vld [vmem:[#allocation4 + $0xec] ss:$16 sps:$4 sm:$0xff]   ;;  %v3482_v14 = vld [vmem:[%s4332_s23 + $0x10] sm:$0xff]   ;;  %v3488_v16 = vld [vmem:[%s4337_s18] sm:$0xff]   ;;  %v1786_v48 = vstv %s1494_s24  ;;  %s2000_s30 = sadd.s32 2, %s4473_s21  ;;  %s2344_s28 = sadd.s32 1, %s4473_s21 }
  0x64   : > { %911 = vmatprep.subr.bf16.mxu0 %v3477_v8  ;;  %984 = vmatprep.subr.bf16.mxu1 %v3480_v10  ;;  %v3483_v15 = vld [vmem:[%s4332_s23 + $0x18] sm:$0xff]   ;;  %v4400_v17 = vld [vmem:[#allocation4 + $0xe0] ss:$16 sps:$4 sm:$0xff]   ;;  %v4404_v19 = vld [vmem:[#allocation4 + $0xc4] ss:$16 sps:$4 sm:$0xff]   ;;  %s4461_s23 = sshll.u32 %s4219_s20, 2  ;;  %v2132_v4 = vstv %s2000_s30 }
  0x65   : > { %v4402_v18 = vld [vmem:[#allocation4 + $0xe8] ss:$16 sps:$4 sm:$0xff]   ;;  %v4406_v20 = vld [vmem:[#allocation4 + $0xcc] ss:$16 sps:$4 sm:$0xff]   ;;  %v4410_v21 = vld [vmem:[#allocation4 + $0xc0] ss:$16 sps:$4 sm:$0xff]   ;;  %v1454_v39 = vstv %s4461_s23 }
  0x66   : > { %3143 = vmatmul.mubr.msk.bf16.vlgmr.msra.gmra.mxu0 %vm620_vm0, %v3474_v6  ;;  %3147 = vmatmul.mubr.msk.bf16.vlgmr.msra.gmra.mxu1 %vm620_vm0, %v3474_v6  ;;  %v4414_v22 = vld [vmem:[#allocation4 + $0xc8] ss:$16 sps:$4 sm:$0xff]   ;;  %v4416_v23 = vld [vmem:[#allocation4 + $0xa4] ss:$16 sps:$4 sm:$0xff]   ;;  %v4420_v24 = vld [vmem:[#allocation4 + $0xac] ss:$16 sps:$4 sm:$0xff]  }
  0x67   : > { %912 = vmatpush1.bf16.msra.mxu0 %v3475_v7  ;;  %675 = vmatprep.mubr.bf16.mxu0 %v5674_v3  ;;  %v3501_v25 = vld [vmem:[%s4337_s18 + $0x8] sm:$0xff]   ;;  %v4425_v26 = vld [vmem:[#allocation4 + $0xa0] ss:$16 sps:$4 sm:$0xff]   ;;  %v4433_v28 = vld [vmem:[#allocation4 + $0x84] ss:$16 sps:$4 sm:$0xff]   ;;  %s2172_s22 = sadd.s32 2, %s4461_s23 }
  0x68   : > { %748 = vmatprep.mubr.bf16.mxu1 %v5674_v3  ;;  %985 = vmatpush1.bf16.msra.mxu1 %v3478_v9  ;;  %v4429_v27 = vld [vmem:[#allocation4 + $0xa8] ss:$16 sps:$4 sm:$0xff]   ;;  %v4435_v29 = vld [vmem:[#allocation4 + $0x8c] ss:$16 sps:$4 sm:$0xff]   ;;  %v4439_v30 = vld [vmem:[#allocation4 + $0x80] ss:$16 sps:$4 sm:$0xff]  }
  0x69   : > { %1324 = vmatprep.subr.bf16.mxu0 %v4379_v12  ;;  %1367 = vmatprep.subr.bf16.mxu1 %v4381_v13  ;;  %v4443_v31 = vld [vmem:[#allocation4 + $0x88] ss:$16 sps:$4 sm:$0xff]   ;;  %v4445_v32 = vld [vmem:[#allocation4 + $0x64] ss:$16 sps:$4 sm:$0xff]   ;;  %v4449_v33 = vld [vmem:[#allocation4 + $0x6c] ss:$16 sps:$4 sm:$0xff]  }
  0x6a   : > { %v3514_v34 = vld [vmem:[%s4337_s18 + $0x10] sm:$0xff]   ;;  %v4458_v36 = vld [vmem:[#allocation4 + $0x68] ss:$16 sps:$4 sm:$0xff]   ;;  %v4467_v38 = vld [vmem:[#allocation4 + $0x4c] ss:$16 sps:$4 sm:$0xff]   ;;  %s2516_s16 = sadd.s32 3, %s4461_s23 }
  0x6b   : > { %v4454_v35 = vld [vmem:[#allocation4 + $0x60] ss:$16 sps:$4 sm:$0xff]   ;;  %v4465_v37 = vld [vmem:[#allocation4 + $0x44] ss:$16 sps:$4 sm:$0xff]   ;;  %v4479_v41 = vld [vmem:[#allocation4 + $0x48] ss:$16 sps:$4 sm:$0xff]  }
  0x6c   : > { %v4477_v40 = vld [vmem:[#allocation4 + $0x40] ss:$16 sps:$4 sm:$0xff]   ;;  %v4484_v42 = vld [vmem:[#allocation4 + $0x24] ss:$16 sps:$4 sm:$0xff]   ;;  %v4486_v43 = vld [vmem:[#allocation4 + $0x2c] ss:$16 sps:$4 sm:$0xff]  }
  0x6d   : > { %v4491_v44 = vld [vmem:[%s5646_s2] sm:$0xff]  ;;  %v4499_v45 = vld [vmem:[%s5646_s2 + $0x8] sm:$0xff]  ;;  %v3527_v46 = vld [vmem:[%s4337_s18 + $0x18] sm:$0xff]   ;;  %s1827_s18 = sadd.s32 1, %s4461_s23  ;;  %s4098_s25 = smov [#allocation13]  }
  0x6e   : > { %3144 = vmatmul.mubr.msk.bf16.gmra.mxu0 %vm620_vm0, %v3481_v11  ;;  %3148 = vmatmul.mubr.msk.bf16.gmra.mxu1 %vm620_vm0, %v3481_v11  ;;  %vm1455_vm1 = vcmp.lt.s32.totalorder %v1454_v39, %v4491_v44  ;;  %v4505_v49 = vld [vmem:[#allocation4 + $0x20] ss:$16 sps:$4 sm:$0xff]   ;;  %v4507_v50 = vld [vmem:[#allocation4 + $0x28] ss:$16 sps:$4 sm:$0xff]   ;;  %v4511_v51 = vld [vmem:[#allocation4 + $0x4] ss:$16 sps:$4 sm:$0xff]   ;;  %vm1456_vm2 = vcmp.lt.s32.totalorder %v1454_v39, %v4499_v45  ;;  %vm1787_vm3 = vcmp.lt.s32.totalorder %v1786_v48, %v4491_v44  ;;  %v1959_v61 = vstv %s1827_s18 }
  0x6f   : > { %685 = vmatprep.mubr.bf16.mxu0 %v5674_v3  ;;  %758 = vmatprep.mubr.bf16.mxu1 %v5674_v3  ;;  %v1457_v47 = vsel %vm1455_vm1, 1, %v5674_v3  ;;  %v4513_v52 = vld [vmem:[#allocation4 + $0xc] ss:$16 sps:$4 sm:$0xff]   ;;  %v4519_v53 = vld [vmem:[#allocation4] ss:$16 sps:$4 sm:$0xff]   ;;  %v1458_v57 = vsel %vm1456_vm2, 1, %v5674_v3  ;;  %vm1960_vm4 = vcmp.lt.s32.totalorder %v1959_v61, %v4491_v44  ;;  %vm1788_vm5 = vcmp.lt.s32.totalorder %v1786_v48, %v4499_v45 }
  0x70   : > { %1460 = vperm.xlu0 %3466, %v1457_v47   ;;  %v4524_v54 = vld [vmem:[#allocation4 + $0x8] ss:$16 sps:$4 sm:$0xff]   ;;  %v4526_v55 = vld [vmem:[#allocation12] sm:$0xff]  ;;  %v1789_v58 = vsel %vm1787_vm3, 1, %v5674_v3  ;;  %v4536_v60 = vld [vmem:[#allocation7 + $0xec] ss:$16 sps:$4 sm:$0xff]   ;;  %vm2133_vm6 = vcmp.lt.s32.totalorder %v2132_v4, %v4491_v44  ;;  %vm1961_vm7 = vcmp.lt.s32.totalorder %v1959_v61, %v4499_v45  ;;  %v2304_v11 = vstv %s2172_s22 }
  0x71   : > { %v4528_v56 = vld [vmem:[#allocation12 + $0x8] sm:$0xff]  ;;  %v4534_v59 = vld [vmem:[#allocation7 + $0xe4] ss:$16 sps:$4 sm:$0xff]   ;;  %1792 = vperm.xlu1 %3467, %v1789_v58   ;;  %v4545_v63 = vld [vmem:[#allocation7 + $0xe0] ss:$16 sps:$4 sm:$0xff]   ;;  %v1962_v7 = vsel %vm1960_vm4, 1, %v5674_v3  ;;  %vm2305_vm8 = vcmp.lt.s32.totalorder %v2304_v11, %v4491_v44  ;;  %vm2134_vm9 = vcmp.lt.s32.totalorder %v2132_v4, %v4499_v45  ;;  %vm2306_vm11 = vcmp.lt.s32.totalorder %v2304_v11, %v4499_v45 }
  0x72   : > { %v1163_v62 = vpack.c.bf16 %v4528_v56, %v4526_v55  ;;  %v4547_v0 = vld [vmem:[#allocation7 + $0xe8] ss:$16 sps:$4 sm:$0xff]   ;;  %v4551_v1 = vld [vmem:[#allocation7 + $0xc4] ss:$16 sps:$4 sm:$0xff]   ;;  %v4553_v2 = vld [vmem:[#allocation7 + $0xcc] ss:$16 sps:$4 sm:$0xff]   ;;  %v2819_v4 = vstv %s4473_s21 }
  0x73   : > { %v4560_v5 = vld [vmem:[#allocation7 + $0xc0] ss:$16 sps:$4 sm:$0xff]   ;;  %v4562_v6 = vld [vmem:[#allocation7 + $0xc8] ss:$16 sps:$4 sm:$0xff]   ;;  %v1790_v8 = vsel %vm1788_vm5, 1, %v5674_v3  ;;  %v2136_v58 = vsel %vm2134_vm9, 1, %v5674_v3  ;;  %vm2820_vm12 = vcmp.lt.s32.totalorder %v2819_v4, %v4491_v44  ;;  %vm2821_vm15 = vcmp.lt.s32.totalorder %v2819_v4, %v4499_v45 }
  0x74   : > { %1463 = vperm.xlu0 %3466, %v1458_v57   ;;  %v4568_v9 = vld [vmem:[#allocation7 + $0xa4] ss:$16 sps:$4 sm:$0xff]   ;;  %v4570_v10 = vld [vmem:[#allocation7 + $0xac] ss:$16 sps:$4 sm:$0xff]   ;;  %v4595_v47 = vld [vmem:[#allocation7 + $0x80] ss:$16 sps:$4 sm:$0xff]  }
  0x75   : > { %1795 = vperm.xlu1 %3467, %v1790_v8   ;;  %v4589_v39 = vld [vmem:[#allocation7 + $0x8c] ss:$16 sps:$4 sm:$0xff]   ;;  %5736 = vst [vmem:[#allocation35_spill] sm:$0xff] %v4595_v47  ;;  %v4597_v48 = vld [vmem:[#allocation7 + $0x88] ss:$16 sps:$4 sm:$0xff]   ;;  %v2307_v57 = vsel %vm2305_vm8, 1, %v5674_v3 }
  0x76   : > { %3145 = vmatmul.mubr.msk.bf16.gmra.mxu0 %vm620_vm0, %v3482_v14  ;;  %3149 = vmatmul.mubr.msk.bf16.gmra.mxu1 %vm620_vm0, %v3482_v14  ;;  %v4579_v14 = vld [vmem:[#allocation7 + $0xa0] ss:$16 sps:$4 sm:$0xff]   ;;  %5737 = vst [vmem:[#allocation36_spill] sm:$0xff] %v4597_v48  ;;  %v4603_v61 = vld [vmem:[#allocation7 + $0x64] ss:$16 sps:$4 sm:$0xff]   ;;  %s2918_s7 = sshll.u32 %s4098_s25, 4  ;;  %s2919_s7 = int_to_ptr.vmem [resolvable:$true] %s2918_s7 }
  0x77   : > { %695 = vmatprep.mubr.bf16.mxu0 %v5674_v3  ;;  %768 = vmatprep.mubr.bf16.mxu1 %v5674_v3  ;;  %5738 = vst [vmem:[#allocation37_spill] sm:$0xff] %v4603_v61  ;;  %v4615_v8 = vld [vmem:[#allocation7 + $0x68] ss:$16 sps:$4 sm:$0xff]   ;;  %v4621_v11 = vld [vmem:[#allocation7 + $0x44] ss:$16 sps:$4 sm:$0xff]   ;;  %s3860_s4 = scalar_lea.vmem %s2919_s7, 256  ;;  %p3867_p2 = scmp.lt.s32.totalorder %s2919_s7, %s2919_s7 }
  0x78   : > { %1965 = vperm.xlu0 %3466, %v1962_v7   ;;  %v4613_v7 = vld [vmem:[#allocation7 + $0x60] ss:$16 sps:$4 sm:$0xff]   ;;  %5740 = vst [vmem:[#allocation39_spill] sm:$0xff] %v4615_v8  ;;  %5741 = vst [vmem:[#allocation40_spill] sm:$0xff] %v4621_v11  ;;  %v4662_v4 = vld [vmem:[#allocation7 + $0x8] ss:$16 sps:$4 sm:$0xff]   ;;  %p3861_p13 = scmp.ne.s32.totalorder %s2919_s7, %s3860_s4  ;;  %p3868_p12 = scmp.lt.s32.totalorder %s3860_s4, %s3860_s4 }
  0x79   : > { %5747 = vst [vmem:[#allocation45_spill] sm:$0xff] %v4662_v4  ;;  %p5887_p7 = scmp.eq.s32.totalorder %s4219_s20, 1 }
  0x7a   : > { %p3869_p0 = por %p3868_p12, %p3867_p2 }
  0x7b   : > { %p3862_p9 = pnand %p3861_p13, %p5887_p7 }
  0x7d   : > { %p3863_p10 = pneg %p3862_p9 }
  0x7e   : > { %3146 = vmatmul.mubr.msk.bf16.gmra.mxu0 %vm620_vm0, %v3483_v15  ;;  %3150 = vmatmul.mubr.msk.bf16.gmra.mxu1 %vm620_vm0, %v3483_v15  ;;  %v4581_v15 = vld [vmem:[#allocation7 + $0xa8] ss:$16 sps:$4 sm:$0xff]  }
  0x7f   : > { %929 = vmatprep.mubr.bf16.mxu0 %v5674_v3  ;;  %1002 = vmatprep.mubr.bf16.mxu1 %v5674_v3  ;;  %p3870_p1 = pnand %p3869_p0, %p3863_p10 }
  0x86   : > { %3159 = vmatmul.mubr.msk.bf16.vlgmr.msra.gmra.mxu0 %vm620_vm0, %v3488_v16  ;;  %3163 = vmatmul.mubr.msk.bf16.vlgmr.msra.gmra.mxu1 %vm620_vm0, %v3488_v16  ;;  %v2135_v16 = vsel %vm2133_vm6, 1, %v5674_v3 }
  0x87   : > { %1325 = vmatpush1.bf16.msra.mxu0 %v4400_v17  ;;  %1368 = vmatpush1.bf16.msra.mxu1 %v4402_v18 }
  0x88   : > { %1326 = vmatprep.subr.bf16.mxu0 %v4404_v19  ;;  %1369 = vmatprep.subr.bf16.mxu1 %v4406_v20 }
  0x89   : > { %939 = vmatprep.mubr.bf16.mxu0 %v5674_v3  ;;  %1012 = vmatprep.mubr.bf16.mxu1 %v5674_v3 }
  0x8a   : > { %2138 = vperm.xlu0 %3466, %v2135_v16  }
  0x8b   : > { %1327 = vmatpush1.bf16.msra.mxu0 %v4410_v21  ;;  %1370 = vmatpush1.bf16.msra.mxu1 %v4414_v22 }
  0x8c   : > { %1328 = vmatprep.subr.bf16.mxu0 %v4416_v23  ;;  %1371 = vmatprep.subr.bf16.mxu1 %v4420_v24 }
  0x8e   : > { %3160 = vmatmul.mubr.msk.bf16.gmra.mxu0 %vm620_vm0, %v3501_v25  ;;  %3164 = vmatmul.mubr.msk.bf16.gmra.mxu1 %vm620_vm0, %v3501_v25  ;;  %v1963_v25 = vsel %vm1961_vm7, 1, %v5674_v3 }
  0x8f   : > { %1329 = vmatpush1.bf16.msra.mxu0 %v4425_v26  ;;  %1372 = vmatpush1.bf16.msra.mxu1 %v4429_v27 }
  0x90   : > { %1330 = vmatprep.subr.bf16.mxu0 %v4433_v28  ;;  %1373 = vmatprep.subr.bf16.mxu1 %v4435_v29 }
  0x91   : > { %949 = vmatprep.mubr.bf16.mxu0 %v5674_v3  ;;  %1022 = vmatprep.mubr.bf16.mxu1 %v5674_v3 }
  0x92   : > { %1968 = vperm.xlu1 %3467, %v1963_v25   ;;  %2310 = vperm.xlu0 %3466, %v2307_v57   ;;  %v2308_v25 = vsel %vm2306_vm11, 1, %v5674_v3  ;;  %v4623_v57 = vld [vmem:[#allocation7 + $0x4c] ss:$16 sps:$4 sm:$0xff]  }
  0x93   : > { %1331 = vmatpush1.bf16.msra.mxu0 %v4439_v30  ;;  %1374 = vmatpush1.bf16.msra.mxu1 %v4443_v31  ;;  %5742 = vst [vmem:[#allocation41_spill] sm:$0xff] %v4623_v57 }
  0x94   : > { %1332 = vmatprep.subr.bf16.mxu0 %v4445_v32  ;;  %1375 = vmatprep.subr.bf16.mxu1 %v4449_v33 }
  0x96   : > { %3161 = vmatmul.mubr.msk.bf16.gmra.mxu0 %vm620_vm0, %v3514_v34  ;;  %3165 = vmatmul.mubr.msk.bf16.gmra.mxu1 %vm620_vm0, %v3514_v34  ;;  %v4587_v34 = vld [vmem:[#allocation7 + $0x84] ss:$16 sps:$4 sm:$0xff]  }
  0x97   : > { %1333 = vmatpush1.bf16.msra.mxu0 %v4454_v35  ;;  %1376 = vmatpush1.bf16.msra.mxu1 %v4458_v36 }
  0x98   : > { %1334 = vmatprep.subr.bf16.mxu0 %v4465_v37  ;;  %1377 = vmatprep.subr.bf16.mxu1 %v4467_v38 }
  0x99   : > { %959 = vmatprep.mubr.bf16.mxu0 %v5674_v3  ;;  %1032 = vmatprep.mubr.bf16.mxu1 %v5674_v3 }
  0x9a   : > { %2141 = vperm.xlu1 %3467, %v2136_v58   ;;  %v2648_v58 = vstv %s2516_s16 }
  0x9b   : > { %1335 = vmatpush1.bf16.msra.mxu0 %v4477_v40  ;;  %1378 = vmatpush1.bf16.msra.mxu1 %v4479_v41  ;;  %vm2649_vm14 = vcmp.lt.s32.totalorder %v2648_v58, %v4491_v44 }
  0x9c   : > { %1336 = vmatprep.subr.bf16.mxu0 %v4484_v42  ;;  %1379 = vmatprep.subr.bf16.mxu1 %v4486_v43 }
  0x9e   : > { %3162 = vmatmul.mubr.msk.bf16.gmra.mxu0 %vm620_vm0, %v3527_v46  ;;  %3166 = vmatmul.mubr.msk.bf16.gmra.mxu1 %vm620_vm0, %v3527_v46  ;;  %v2476_v46 = vstv %s2344_s28  ;;  %vm2650_vm0 = vcmp.lt.s32.totalorder %v2648_v58, %v4499_v45 }
  0x9f   : > { %1337 = vmatpush1.bf16.msra.mxu0 %v4505_v49  ;;  %1380 = vmatpush1.bf16.msra.mxu1 %v4507_v50  ;;  %vm2477_vm10 = vcmp.lt.s32.totalorder %v2476_v46, %v4491_v44  ;;  %vm2478_vm13 = vcmp.lt.s32.totalorder %v2476_v46, %v4499_v45  ;;  %v4637_v46 = vld [vmem:[#allocation7 + $0x24] ss:$16 sps:$4 sm:$0xff]  }
  0xa0   : > { %1338 = vmatprep.subr.bf16.mxu0 %v4511_v51  ;;  %1381 = vmatprep.subr.bf16.mxu1 %v4513_v52  ;;  %v2479_v16 = vsel %vm2477_vm10, 1, %v5674_v3  ;;  %5745 = vst [vmem:[#allocation43_spill] sm:$0xff] %v4637_v46  ;;  %v4653_v44 = vld [vmem:[#allocation7 + $0x4] ss:$16 sps:$4 sm:$0xff]  }
  0xa1   : > { %1356 = vmatprep.mubr.bf16.mxu0 %v5674_v3  ;;  %1399 = vmatprep.mubr.bf16.mxu1 %v5674_v3 }
  0xa2   : > { %2482 = vperm.xlu0 %3466, %v2479_v16   ;;  %2313 = vperm.xlu1 %3467, %v2308_v25   ;;  %v4639_v16 = vld [vmem:[#allocation7 + $0x2c] ss:$16 sps:$4 sm:$0xff]   ;;  %v4645_v25 = vld [vmem:[#allocation7 + $0x20] ss:$16 sps:$4 sm:$0xff]  }
  0xa3   : > { %1339 = vmatpush1.bf16.msra.mxu0 %v4519_v53  ;;  %1382 = vmatpush1.bf16.msra.mxu1 %v4524_v54  ;;  %5746 = vst [vmem:[#allocation44_spill] sm:$0xff] %v4639_v16 }
  0xa4   : > { %1656 = vmatprep.subr.bf16.mxu0 %v4534_v59  ;;  %1699 = vmatprep.subr.bf16.mxu1 %v4536_v60 }
  0xa6   : > { %1357 = vmatmul.mubr.bf16.vlgmr.msra.gmra.mxu0 %v1163_v62  ;;  %1400 = vmatmul.mubr.bf16.vlgmr.msra.gmra.mxu1 %v1163_v62  ;;  %v4605_v62 = vld [vmem:[#allocation7 + $0x6c] ss:$16 sps:$4 sm:$0xff]  }
  0xa7   : > { %1657 = vmatpush1.bf16.msra.mxu0 %v4545_v63  ;;  %1700 = vmatpush1.bf16.msra.mxu1 %v4547_v0  ;;  %5739 = vst [vmem:[#allocation38_spill] sm:$0xff] %v4605_v62 }
  0xa8   : > { %1658 = vmatprep.subr.bf16.mxu0 %v4551_v1  ;;  %1701 = vmatprep.subr.bf16.mxu1 %v4553_v2 }
  0xa9   : > { %1688 = vmatprep.mubr.bf16.mxu0 %v5674_v3  ;;  %1731 = vmatprep.mubr.bf16.mxu1 %v5674_v3  ;;  %v4629_v3 = vld [vmem:[#allocation7 + $0x40] ss:$16 sps:$4 sm:$0xff]  }
  0xab   : > { %1659 = vmatpush1.bf16.msra.mxu0 %v4560_v5  ;;  %1702 = vmatpush1.bf16.msra.mxu1 %v4562_v6 }
  0xac   : > { %1660 = vmatprep.subr.bf16.mxu0 %v4568_v9  ;;  %1703 = vmatprep.subr.bf16.mxu1 %v4570_v10 }
  0xaf   : > { %1661 = vmatpush1.bf16.msra.mxu0 %v4579_v14  ;;  %1704 = vmatpush1.bf16.msra.mxu1 %v4581_v15 }
  0xb0   : > { %1662 = vmatprep.subr.bf16.mxu0 %v4587_v34  ;;  %1705 = vmatprep.subr.bf16.mxu1 %v4589_v39 }
  0xb3   : > { %1663 = vmatpush1.bf16.msra.mxu0 %v4595_v47  ;;  %1706 = vmatpush1.bf16.msra.mxu1 %v4597_v48 }
  0xb4   : > { %1664 = vmatprep.subr.bf16.mxu0 %v4603_v61  ;;  %1707 = vmatprep.subr.bf16.mxu1 %v4605_v62  ;;  %v4631_v61 = vld [vmem:[#allocation7 + $0x48] ss:$16 sps:$4 sm:$0xff]   ;;  %v5744_v62 = vmov 0  }
  0xb5   : > { %5743 = vst [vmem:[#allocation42_spill] sm:$0xff] %v4631_v61  ;;  %v2822_v48 = vsel %vm2820_vm12, 1, %v5744_v62  ;;  %v2480_v47 = vsel %vm2478_vm13, 1, %v5744_v62 }
  0xb6   : > { %2825 = vperm.xlu0 %3466, %v2822_v48   ;;  %2485 = vperm.xlu1 %3467, %v2480_v47   ;;  %v4655_v48 = vld [vmem:[#allocation7 + $0xc] ss:$16 sps:$4 sm:$0xff]   ;;  %v4658_v47 = vld [vmem:[#allocation7] ss:$16 sps:$4 sm:$0xff]  }
  0xb7   : > { %1665 = vmatpush1.bf16.msra.mxu0 %v4613_v7  ;;  %1708 = vmatpush1.bf16.msra.mxu1 %v4615_v8  ;;  %v4647_v8 = vld [vmem:[#allocation7 + $0x28] ss:$16 sps:$4 sm:$0xff]  }
  0xb8   : > { %1666 = vmatprep.subr.bf16.mxu0 %v4621_v11  ;;  %1709 = vmatprep.subr.bf16.mxu1 %v4623_v57  ;;  %v2651_v57 = vsel %vm2649_vm14, 1, %v5744_v62  ;;  %v2823_v11 = vsel %vm2821_vm15, 1, %v5744_v62 }
  0xba   : > { %2654 = vperm.xlu0 %3466, %v2651_v57   ;;  %2828 = vperm.xlu1 %3467, %v2823_v11  }
  0xbb   : > { %1667 = vmatpush1.bf16.msra.mxu0 %v4629_v3  ;;  %1710 = vmatpush1.bf16.msra.mxu1 %v4631_v61  ;;  %v4664_v61 = vld [vmem:[#allocation15] sm:$0xff] }
  0xbc   : > { %1668 = vmatprep.subr.bf16.mxu0 %v4637_v46  ;;  %1711 = vmatprep.subr.bf16.mxu1 %v4639_v16  ;;  %v4666_v46 = vld [vmem:[#allocation15 + $0x8] sm:$0xff]  ;;  %v2652_v16 = vsel %vm2650_vm0, 1, %v5744_v62 }
  0xbd   : > { %v1495_v45 = vpack.c.bf16 %v4666_v46, %v4664_v61 }
  0xbe   : > { %2657 = vperm.xlu1 %3467, %v2652_v16  }
  0xbf   : > { %1669 = vmatpush1.bf16.msra.mxu0 %v4645_v25  ;;  %1712 = vmatpush1.bf16.msra.mxu1 %v4647_v8 }
  0xc0   : > { %1670 = vmatprep.subr.bf16.mxu0 %v4653_v44  ;;  %1713 = vmatprep.subr.bf16.mxu1 %v4655_v48 }
  0xc3   : > { %1671 = vmatpush1.bf16.msra.mxu0 %v4658_v47  ;;  %1714 = vmatpush1.bf16.msra.mxu1 %v4662_v4 }
  0xc4   : > { %1829 = vmatprep.subr.bf16.mxu0 %v4379_v12  ;;  %1872 = vmatprep.subr.bf16.mxu1 %v4381_v13  ;;  %v560_v12 = vlaneseq }
  0xc6   : > { %1689 = vmatmul.mubr.bf16.vlgmr.msra.gmra.mxu0 %v1495_v45  ;;  %1732 = vmatmul.mubr.bf16.vlgmr.msra.gmra.mxu1 %v1495_v45  ;;  %v4711_v13 = vshrl.u32 %v560_v12, 7 }
  0xc7   : > { %1830 = vmatpush1.bf16.msra.mxu0 %v4400_v17  ;;  %1873 = vmatpush1.bf16.msra.mxu1 %v4402_v18 }
  0xc8   : > { %1831 = vmatprep.subr.bf16.mxu0 %v4404_v19  ;;  %1874 = vmatprep.subr.bf16.mxu1 %v4406_v20 }
  0xc9   : > { %1861 = vmatprep.mubr.bf16.mxu0 %v5744_v62  ;;  %1904 = vmatprep.mubr.bf16.mxu1 %v5744_v62 }
  0xcb   : > { %1832 = vmatpush1.bf16.msra.mxu0 %v4410_v21  ;;  %1875 = vmatpush1.bf16.msra.mxu1 %v4414_v22  ;;  %v562_v21 = vsub.s32 0, %v4711_v13  ;;  %v570_v22 = vsub.s32 2, %v4711_v13 }
  0xcc   : > { %1833 = vmatprep.subr.bf16.mxu0 %v4416_v23  ;;  %1876 = vmatprep.subr.bf16.mxu1 %v4420_v24  ;;  %v558_v23 = vld [vmem:[%s5649_s5] sm:$0xf] }
  0xcf   : > { %1834 = vmatpush1.bf16.msra.mxu0 %v4425_v26  ;;  %1877 = vmatpush1.bf16.msra.mxu1 %v4429_v27  ;;  %v566_v27 = vsub.s32 1, %v4711_v13 }
  0xd0   : > { %1835 = vmatprep.subr.bf16.mxu0 %v4433_v28  ;;  %1878 = vmatprep.subr.bf16.mxu1 %v4435_v29  ;;  %v574_v28 = vsub.s32 3, %v4711_v13 }
  0xd3   : > { %1836 = vmatpush1.bf16.msra.mxu0 %v4439_v30  ;;  %1879 = vmatpush1.bf16.msra.mxu1 %v4443_v31  ;;  %v4736_v31 = vrot.slane %v558_v23, %v562_v21 }
  0xd4   : > { %1837 = vmatprep.subr.bf16.mxu0 %v4445_v32  ;;  %1880 = vmatprep.subr.bf16.mxu1 %v4449_v33  ;;  %v4738_v32 = vrot.slane %v558_v23, %v570_v22 }
  0xd7   : > { %1838 = vmatpush1.bf16.msra.mxu0 %v4454_v35  ;;  %1881 = vmatpush1.bf16.msra.mxu1 %v4458_v36  ;;  %v4740_v36 = vrot.slane %v558_v23, %v566_v27 }
  0xd8   : > { %1839 = vmatprep.subr.bf16.mxu0 %v4465_v37  ;;  %1882 = vmatprep.subr.bf16.mxu1 %v4467_v38  ;;  %v4742_v37 = vrot.slane %v558_v23, %v574_v28 }
  0xdb   : > { %1840 = vmatpush1.bf16.msra.mxu0 %v4477_v40  ;;  %1883 = vmatpush1.bf16.msra.mxu1 %v4479_v41 }
  0xdc   : > { %1841 = vmatprep.subr.bf16.mxu0 %v4484_v42  ;;  %1884 = vmatprep.subr.bf16.mxu1 %v4486_v43 }
  0xdf   : > { %1842 = vmatpush1.bf16.msra.mxu0 %v4505_v49  ;;  %1885 = vmatpush1.bf16.msra.mxu1 %v4507_v50 }
  0xe0   : > { %1843 = vmatprep.subr.bf16.mxu0 %v4511_v51  ;;  %1886 = vmatprep.subr.bf16.mxu1 %v4513_v52 }
  0xe3   : > { %1844 = vmatpush1.bf16.msra.mxu0 %v4519_v53  ;;  %1887 = vmatpush1.bf16.msra.mxu1 %v4524_v54 }
  0xe4   : > { %2002 = vmatprep.subr.bf16.mxu0 %v4534_v59  ;;  %2045 = vmatprep.subr.bf16.mxu1 %v4536_v60 }
 0x126   : > { %v4713_v17 = vpop.f32.mrf.mxu0  ;;  %v4715_v18 = vpop.f32.mrf.mxu1 }
 0x128   : > { %v4717_v19 = vpop.f32.mrf.mxu0  ;;  %v4719_v20 = vpop.f32.mrf.mxu1 }
 0x12a   : > { %v4726_v24 = vpop.f32.mrf.mxu0  ;;  %v4728_v26 = vpop.f32.mrf.mxu1 }
 0x12c   : > { %v4732_v29 = vpop.f32.mrf.mxu0  ;;  %v4734_v30 = vpop.f32.mrf.mxu1 }
 0x12e   : > { %v677_v33 = vpop.f32.mrf.mxu0  ;;  %v750_v35 = vpop.f32.mrf.mxu1 }
 0x12f   : > { %v4745_v38 = vadd.f32 %v677_v33, %v4736_v31  ;;  %v4748_v40 = vadd.f32 %v750_v35, %v4738_v32 }
 0x130   : > { %v679_v41 = vpop.f32.mrf.mxu0  ;;  %v752_v42 = vpop.f32.mrf.mxu1 }
 0x131   : > { %5748 = vst [vmem:[#allocation46_spill] sm:$0xff] %v4745_v38  ;;  %5749 = vst [vmem:[#allocation47_spill] sm:$0xff] %v4748_v40  ;;  %v4751_v43 = vadd.f32 %v679_v41, %v4740_v36  ;;  %v4754_v49 = vadd.f32 %v752_v42, %v4742_v37  ;;  %v672_v40 = vadd.f32 %v4726_v24, %v4736_v31 }
 0x132   : > { %v681_v50 = vpop.f32.mrf.mxu0  ;;  %v754_v51 = vpop.f32.mrf.mxu1  ;;  %v747_v24 = vadd.f32 %v4734_v30, %v4742_v37 }
 0x133   : > { %5750 = vst [vmem:[#allocation48_spill] sm:$0xff] %v4751_v43  ;;  %5751 = vst [vmem:[#allocation49_spill] sm:$0xff] %v4754_v49  ;;  %v4757_v52 = vadd.f32 %v681_v50, %v4736_v31  ;;  %v4760_v53 = vadd.f32 %v754_v51, %v4738_v32 }
 0x134   : > { %v683_v54 = vpop.f32.mrf.mxu0  ;;  %v756_v59 = vpop.f32.mrf.mxu1 }
 0x135   : > { %5752 = vst [vmem:[#allocation50_spill] sm:$0xff] %v4757_v52  ;;  %5753 = vst [vmem:[#allocation51_spill] sm:$0xff] %v4760_v53  ;;  %v4763_v60 = vadd.f32 %v683_v54, %v4740_v36  ;;  %v4766_v11 = vadd.f32 %v756_v59, %v4742_v37 }
 0x136   : > { %v687_v57 = vpop.f32.mrf.mxu0  ;;  %v760_v58 = vpop.f32.mrf.mxu1 }
 0x137   : > { %5754 = vst [vmem:[#allocation52_spill] sm:$0xff] %v4763_v60  ;;  %5755 = vst [vmem:[#allocation53_spill] sm:$0xff] %v4766_v11  ;;  %v4769_v16 = vadd.f32 %v687_v57, %v4736_v31  ;;  %v4772_v45 = vadd.f32 %v760_v58, %v4738_v32 }
 0x138   : > { %v689_v12 = vpop.f32.mrf.mxu0  ;;  %v762_v13 = vpop.f32.mrf.mxu1 }
 0x139   : > { %5756 = vst [vmem:[#allocation54_spill] sm:$0xff] %v4769_v16  ;;  %5757 = vst [vmem:[#allocation55_spill] sm:$0xff] %v4772_v45  ;;  %v4775_v23 = vadd.f32 %v689_v12, %v4740_v36  ;;  %v4778_v33 = vadd.f32 %v762_v13, %v4742_v37 }
 0x13a   : > { %v691_v35 = vpop.f32.mrf.mxu0  ;;  %v764_v41 = vpop.f32.mrf.mxu1 }
 0x13b   : > { %5758 = vst [vmem:[#allocation56_spill] sm:$0xff] %v4775_v23  ;;  %5759 = vst [vmem:[#allocation57_spill] sm:$0xff] %v4778_v33  ;;  %v4781_v42 = vadd.f32 %v691_v35, %v4736_v31  ;;  %v4784_v50 = vadd.f32 %v764_v41, %v4738_v32  ;;  %v823_v41 = vld [vmem:[%s5652_s8] sm:$0xf] }
 0x13c   : > { %v693_v51 = vpop.f32.mrf.mxu0  ;;  %v766_v54 = vpop.f32.mrf.mxu1 }
 0x13d   : > { %5760 = vst [vmem:[#allocation58_spill] sm:$0xff] %v4781_v42  ;;  %5761 = vst [vmem:[#allocation59_spill] sm:$0xff] %v4784_v50  ;;  %v4787_v59 = vadd.f32 %v693_v51, %v4740_v36  ;;  %v4790_v57 = vadd.f32 %v766_v54, %v4742_v37 }
 0x13e   : > { %v697_v58 = vpop.f32.mrf.mxu0  ;;  %v770_v12 = vpop.f32.mrf.mxu1 }
 0x13f   : > { %5762 = vst [vmem:[#allocation60_spill] sm:$0xff] %v4787_v59  ;;  %5763 = vst [vmem:[#allocation61_spill] sm:$0xff] %v4790_v57  ;;  %v4793_v13 = vadd.f32 %v697_v58, %v4736_v31  ;;  %v4796_v45 = vadd.f32 %v770_v12, %v4738_v32 }
 0x140   : > { %v699_v35 = vpop.f32.mrf.mxu0  ;;  %v772_v42 = vpop.f32.mrf.mxu1 }
 0x141   : > { %5764 = vst [vmem:[#allocation62_spill] sm:$0xff] %v4793_v13  ;;  %5765 = vst [vmem:[#allocation63_spill] sm:$0xff] %v4796_v45  ;;  %v4802_v51 = vadd.f32 %v699_v35, %v4740_v36  ;;  %v4805_v54 = vadd.f32 %v772_v42, %v4742_v37  ;;  %v4813_v45 = vrot.slane %v823_v41, %v562_v21 }
 0x142   : > { %v701_v50 = vpop.f32.mrf.mxu0  ;;  %v774_v57 = vpop.f32.mrf.mxu1  ;;  %v4815_v13 = vrot.slane %v823_v41, %v570_v22 }
 0x143   : > { %5766 = vst [vmem:[#allocation64_spill] sm:$0xff] %v4802_v51  ;;  %5767 = vst [vmem:[#allocation65_spill] sm:$0xff] %v4805_v54  ;;  %v4808_v58 = vadd.f32 %v701_v50, %v4736_v31  ;;  %v4811_v12 = vadd.f32 %v774_v57, %v4738_v32  ;;  %v4823_v54 = vrot.slane %v823_v41, %v566_v27 }
 0x144   : > { %v703_v59 = vpop.f32.mrf.mxu0  ;;  %v776_v33 = vpop.f32.mrf.mxu1  ;;  %v4825_v51 = vrot.slane %v823_v41, %v574_v28 }
 0x145   : > { %5768 = vst [vmem:[#allocation66_spill] sm:$0xff] %v4808_v58  ;;  %5769 = vst [vmem:[#allocation67_spill] sm:$0xff] %v4811_v12  ;;  %v4818_v35 = vadd.f32 %v703_v59, %v4740_v36  ;;  %v4821_v42 = vadd.f32 %v776_v33, %v4742_v37 }
 0x146   : > { %v931_v50 = vpop.f32.mrf.mxu0  ;;  %v1004_v58 = vpop.f32.mrf.mxu1 }
 0x147   : > { %5770 = vst [vmem:[#allocation68_spill] sm:$0xff] %v4818_v35  ;;  %5771 = vst [vmem:[#allocation69_spill] sm:$0xff] %v4821_v42  ;;  %v4828_v57 = vadd.f32 %v931_v50, %v4813_v45  ;;  %v4831_v21 = vadd.f32 %v1004_v58, %v4815_v13 }
 0x148   : > { %v933_v22 = vpop.f32.mrf.mxu0  ;;  %v1006_v12 = vpop.f32.mrf.mxu1 }
 0x149   : > { %5772 = vst [vmem:[#allocation70_spill] sm:$0xff] %v4828_v57  ;;  %5773 = vst [vmem:[#allocation71_spill] sm:$0xff] %v4831_v21  ;;  %v4834_v59 = vadd.f32 %v933_v22, %v4823_v54  ;;  %v4837_v33 = vadd.f32 %v1006_v12, %v4825_v51 }
 0x14a   : > { %v935_v27 = vpop.f32.mrf.mxu0  ;;  %v1008_v42 = vpop.f32.mrf.mxu1 }
 0x14b   : > { %5774 = vst [vmem:[#allocation72_spill] sm:$0xff] %v4834_v59  ;;  %5775 = vst [vmem:[#allocation73_spill] sm:$0xff] %v4837_v33  ;;  %v4840_v28 = vadd.f32 %v935_v27, %v4813_v45  ;;  %v4843_v41 = vadd.f32 %v1008_v42, %v4815_v13 }
 0x14c   : > { %v937_v50 = vpop.f32.mrf.mxu0  ;;  %v1010_v57 = vpop.f32.mrf.mxu1 }
 0x14d   : > { %5776 = vst [vmem:[#allocation74_spill] sm:$0xff] %v4840_v28  ;;  %5777 = vst [vmem:[#allocation75_spill] sm:$0xff] %v4843_v41  ;;  %v4846_v58 = vadd.f32 %v937_v50, %v4823_v54  ;;  %v4849_v21 = vadd.f32 %v1010_v57, %v4825_v51 }
 0x14e   : > { %v941_v22 = vpop.f32.mrf.mxu0  ;;  %v1014_v59 = vpop.f32.mrf.mxu1 }
 0x14f   : > { %5778 = vst [vmem:[#allocation76_spill] sm:$0xff] %v4846_v58  ;;  %5779 = vst [vmem:[#allocation77_spill] sm:$0xff] %v4849_v21  ;;  %v4852_v12 = vadd.f32 %v941_v22, %v4813_v45  ;;  %v4855_v33 = vadd.f32 %v1014_v59, %v4815_v13 }
 0x150   : > { %v943_v27 = vpop.f32.mrf.mxu0  ;;  %v1016_v28 = vpop.f32.mrf.mxu1 }
 0x151   : > { %5780 = vst [vmem:[#allocation78_spill] sm:$0xff] %v4852_v12  ;;  %5781 = vst [vmem:[#allocation79_spill] sm:$0xff] %v4855_v33  ;;  %v4858_v42 = vadd.f32 %v943_v27, %v4823_v54  ;;  %v4861_v41 = vadd.f32 %v1016_v28, %v4825_v51 }
 0x152   : > { %v945_v50 = vpop.f32.mrf.mxu0  ;;  %v1018_v58 = vpop.f32.mrf.mxu1 }
 0x153   : > { %5782 = vst [vmem:[#allocation80_spill] sm:$0xff] %v4858_v42  ;;  %5783 = vst [vmem:[#allocation81_spill] sm:$0xff] %v4861_v41  ;;  %v4864_v57 = vadd.f32 %v945_v50, %v4813_v45  ;;  %v4867_v21 = vadd.f32 %v1018_v58, %v4815_v13 }
 0x154   : > { %v947_v22 = vpop.f32.mrf.mxu0  ;;  %v1020_v35 = vpop.f32.mrf.mxu1 }
 0x155   : > { %5784 = vst [vmem:[#allocation82_spill] sm:$0xff] %v4864_v57  ;;  %5785 = vst [vmem:[#allocation83_spill] sm:$0xff] %v4867_v21  ;;  %v4870_v59 = vadd.f32 %v947_v22, %v4823_v54  ;;  %v4873_v33 = vadd.f32 %v1020_v35, %v4825_v51 }
 0x156   : > { %v951_v27 = vpop.f32.mrf.mxu0  ;;  %v1024_v42 = vpop.f32.mrf.mxu1 }
 0x157   : > { %5786 = vst [vmem:[#allocation84_spill] sm:$0xff] %v4870_v59  ;;  %5787 = vst [vmem:[#allocation85_spill] sm:$0xff] %v4873_v33  ;;  %v4876_v28 = vadd.f32 %v951_v27, %v4813_v45  ;;  %v4879_v41 = vadd.f32 %v1024_v42, %v4815_v13 }
 0x158   : > { %v953_v50 = vpop.f32.mrf.mxu0  ;;  %v1026_v57 = vpop.f32.mrf.mxu1 }
 0x159   : > { %5788 = vst [vmem:[#allocation86_spill] sm:$0xff] %v4876_v28  ;;  %5789 = vst [vmem:[#allocation87_spill] sm:$0xff] %v4879_v41  ;;  %v4882_v58 = vadd.f32 %v953_v50, %v4823_v54  ;;  %v4885_v21 = vadd.f32 %v1026_v57, %v4825_v51 }
 0x15a   : > { %v955_v22 = vpop.f32.mrf.mxu0  ;;  %v1028_v59 = vpop.f32.mrf.mxu1 }
 0x15b   : > { %5790 = vst [vmem:[#allocation88_spill] sm:$0xff] %v4882_v58  ;;  %5791 = vst [vmem:[#allocation89_spill] sm:$0xff] %v4885_v21  ;;  %v4888_v35 = vadd.f32 %v955_v22, %v4813_v45  ;;  %v4891_v33 = vadd.f32 %v1028_v59, %v4815_v13  ;;  %v743_v58 = vadd.f32 %v4719_v20, %v4742_v37 }
 0x15c   : > { %v957_v27 = vpop.f32.mrf.mxu0  ;;  %v1030_v12 = vpop.f32.mrf.mxu1 }
 0x15d   : > { %5792 = vst [vmem:[#allocation90_spill] sm:$0xff] %v4888_v35  ;;  %5793 = vst [vmem:[#allocation91_spill] sm:$0xff] %v4891_v33  ;;  %v4894_v42 = vadd.f32 %v957_v27, %v4823_v54  ;;  %v4897_v23 = vadd.f32 %v1030_v12, %v4825_v51  ;;  %v668_v12 = vadd.f32 %v4713_v17, %v4736_v31 }
 0x15e   : > { %v4899_v50 = vpop.f32.mrf.mxu0  ;;  %v4901_v57 = vpop.f32.mrf.mxu1  ;;  %v674_v17 = vadd.f32 %v4732_v29, %v4740_v36 }
 0x15f   : > { %5794 = vst [vmem:[#allocation92_spill] sm:$0xff] %v4894_v42  ;;  %5795 = vst [vmem:[#allocation93_spill] sm:$0xff] %v4897_v23  ;;  %v670_v42 = vadd.f32 %v4717_v19, %v4740_v36  ;;  %v745_v36 = vadd.f32 %v4728_v26, %v4738_v32 }
 0x160   : > { %v4903_v16 = vpop.f32.mrf.mxu0  ;;  %v4905_v41 = vpop.f32.mrf.mxu1 }
 0x162   : > { %v4907_v22 = vpop.f32.mrf.mxu0  ;;  %v4909_v59 = vpop.f32.mrf.mxu1 }
 0x164   : > { %v4911_v33 = vpop.f32.mrf.mxu0  ;;  %v4913_v35 = vpop.f32.mrf.mxu1 }
 0x166   : > { %v1358_v27 = vpop.f32.mrf.mxu0  ;;  %v1401_v23 = vpop.f32.mrf.mxu1 }
 0x167   : > { %v1410_v21 = vadd.f32 %v1358_v27, %v668_v12 }
 0x168   : > { %v1360_v28 = vpop.f32.mrf.mxu0  ;;  %v1403_v53 = vpop.f32.mrf.mxu1 }
 0x169   : > { %v1418_v11 = vmul.f32 0.5, %v1410_v21  ;;  %v1411_v60 = vadd.f32 %v1360_v28, %v670_v42  ;;  %v1413_v52 = vadd.f32 %v1403_v53, %v743_v58  ;;  %v741_v53 = vadd.f32 %v4715_v18, %v4738_v32  ;;  %v1146_v42 = vld [vmem:[#allocation13] sm:$0xff] }
 0x16a   : > { %v1362_v49 = vpop.f32.mrf.mxu0  ;;  %v1405_v43 = vpop.f32.mrf.mxu1 }
 0x16b   : > { %3584 = vtanh.f32 %v1418_v11  ;;  %v1419_v38 = vmul.f32 0.5, %v1411_v60  ;;  %v1414_v19 = vadd.f32 %v1362_v49, %v672_v40  ;;  %v1412_v29 = vadd.f32 %v1401_v23, %v741_v53 }
 0x16c   : > { %v1364_v12 = vpop.f32.mrf.mxu0  ;;  %v1407_v4 = vpop.f32.mrf.mxu1  ;;  %v1416_v40 = vadd.f32 %v1405_v43, %v745_v36  ;;  %v962_v36 = vadd.f32 %v4899_v50, %v4813_v45  ;;  %v1037_v50 = vadd.f32 %v4905_v41, %v4825_v51 }
 0x16d   : > { %3586 = vtanh.f32 %v1419_v38  ;;  %v1421_v27 = vmul.f32 0.5, %v1414_v19  ;;  %v1415_v20 = vadd.f32 %v1364_v12, %v674_v17  ;;  %v1417_v21 = vadd.f32 %v1407_v4, %v747_v24  ;;  %v4931_v4 = vpop.permute.xlu0 %1460  ;;  %v1147_v12 = vld [vmem:[#allocation13 + $0x8] sm:$0xff] }
 0x16e   : > { %3588 = vtanh.f32 %v1413_v52  ;;  %v1420_v38 = vmul.f32 0.5, %v1412_v29  ;;  %v1423_v37 = vmul.f32 0.5, %v1416_v40  ;;  %vm1465_vm1 = vcmp.eq.s32.totalorder %v4931_v4, 1 }
 0x16f   : > { %3590 = vtanh.f32 %v1421_v27  ;;  %v1422_v31 = vmul.f32 0.5, %v1415_v20 }
 0x171   : > { %3592 = vtanh.f32 %v1422_v31  ;;  %v1464_v53 = vpop.permute.xlu0 %1463 }
 0x172   : > { %3594 = vtanh.f32 %v1417_v21  ;;  %vm1466_vm2 = vcmp.eq.s32.totalorder %v1464_v53, 1  ;;  %v1150_v53 = vld [vmem:[#allocation16] sm:$0xff] }
 0x173   : > { %3596 = vtanh.f32 %v1420_v38 }
 0x174   : > { %3598 = vtanh.f32 %v1423_v37 }
 0x178   : > { %v3585_v49 = vpop.eup %3584 }
 0x179   : > { %v1430_v52 = vmul.f32 0.5, %v3585_v49 }
 0x17a   : > { %v3587_v60 = vpop.eup %3586 }
 0x17b   : > { %v3589_v11 = vpop.eup %3588  ;;  %v1436_v28 = vadd.f32 0.5, %v1430_v52  ;;  %v1431_v30 = vmul.f32 0.5, %v3587_v60  ;;  %v964_v52 = vadd.f32 %v4903_v16, %v4823_v54 }
 0x17c   : > { %v3591_v58 = vpop.eup %3590 }
 0x17d   : > { %v1437_v18 = vadd.f32 0.5, %v1431_v30  ;;  %v1433_v17 = vmul.f32 0.5, %v3591_v58  ;;  %v1446_v23 = vmul.f32 %v3589_v11, %v1436_v28  ;;  %v966_v58 = vadd.f32 %v4907_v22, %v4813_v45 }
 0x17e   : > { %v3593_v19 = vpop.eup %3592  ;;  %v1041_v22 = vadd.f32 %v4913_v35, %v4825_v51 }
 0x17f   : > { %v1439_v26 = vadd.f32 0.5, %v1433_v17  ;;  %v1434_v32 = vmul.f32 0.5, %v3593_v19  ;;  %v1444_v43 = vmul.f32 %v1437_v18, %v1146_v42  ;;  %v3595_v24 = vpop.eup %3594  ;;  %v968_v17 = vadd.f32 %v4911_v33, %v4823_v54 }
 0x180   : > { %v3597_v28 = vpop.eup %3596 }
 0x181   : > { %v1440_v27 = vadd.f32 0.5, %v1434_v32  ;;  %v1448_v20 = vadd.f32 %v1446_v23, %v1444_v43  ;;  %v1447_v29 = vmul.f32 %v3595_v24, %v1439_v26  ;;  %v1432_v19 = vmul.f32 0.5, %v3597_v28  ;;  %v3599_v43 = vpop.eup %3598 }
 0x183   : > { %3600 = vtanh.f32 %v1448_v20  ;;  %v4936_v31 = vsel %vm1465_vm1, %v1448_v20, %v1146_v42  ;;  %v1445_v21 = vmul.f32 %v1440_v27, %v1147_v12  ;;  %v1438_v41 = vadd.f32 0.5, %v1432_v19 }
 0x185   : > { %v1449_v38 = vadd.f32 %v1447_v29, %v1445_v21  ;;  %v1435_v21 = vmul.f32 0.5, %v3599_v43 }
 0x186   : > { %v1690_v40 = vpop.f32.mrf.mxu0  ;;  %v1733_v49 = vpop.f32.mrf.mxu1 }
 0x187   : > { %3602 = vtanh.f32 %v1449_v38  ;;  %v4943_v60 = vsel %vm1466_vm2, %v1449_v38, %v1147_v12  ;;  %v1742_v11 = vadd.f32 %v1690_v40, %v962_v36  ;;  %v1035_v38 = vadd.f32 %v4901_v57, %v4815_v13 }
 0x188   : > { %v1692_v30 = vpop.f32.mrf.mxu0  ;;  %v1735_v37 = vpop.f32.mrf.mxu1  ;;  %v1441_v40 = vadd.f32 0.5, %v1435_v21  ;;  %v5798_v21 = vld [vmem:[#allocation37_spill] sm:$0xff] }
 0x189   : > { %v1750_v42 = vmul.f32 0.5, %v1742_v11  ;;  %v1743_v18 = vadd.f32 %v1692_v30, %v964_v52  ;;  %v1745_v12 = vadd.f32 %v1735_v37, %v1037_v50  ;;  %v1039_v11 = vadd.f32 %v4909_v59, %v4815_v13 }
 0x18a   : > { %v1694_v16 = vpop.f32.mrf.mxu0  ;;  %v1737_v23 = vpop.f32.mrf.mxu1  ;;  %v1744_v35 = vadd.f32 %v1733_v49, %v1035_v38  ;;  %v5803_v38 = vld [vmem:[#allocation42_spill] sm:$0xff] }
 0x18b   : > { %3604 = vtanh.f32 %v1750_v42  ;;  %v1751_v26 = vmul.f32 0.5, %v1743_v18  ;;  %v1746_v32 = vadd.f32 %v1694_v16, %v966_v58  ;;  %v1748_v28 = vadd.f32 %v1737_v23, %v1039_v11  ;;  %v5805_v11 = vld [vmem:[#allocation44_spill] sm:$0xff] }
 0x18c   : > { %v1696_v27 = vpop.f32.mrf.mxu0  ;;  %v1739_v24 = vpop.f32.mrf.mxu1  ;;  %v1752_v18 = vmul.f32 0.5, %v1744_v35 }
 0x18d   : > { %3606 = vtanh.f32 %v1751_v26  ;;  %v1753_v20 = vmul.f32 0.5, %v1746_v32  ;;  %v1747_v45 = vadd.f32 %v1696_v27, %v968_v17  ;;  %v1749_v36 = vadd.f32 %v1739_v24, %v1041_v22  ;;  %v1793_v26 = vpop.permute.xlu1 %1792 }
 0x18e   : > { %vm1797_vm3 = vcmp.eq.s32.totalorder %v1793_v26, 1  ;;  %v5073_v26 = vld [vmem:[#allocation4 + $0x64] ss:$16 sps:$4 sm:$0xff]  }
 0x18f   : > { %3608 = vtanh.f32 %v1753_v20  ;;  %v1754_v54 = vmul.f32 0.5, %v1747_v45 }
 0x190   : > { %v3601_v33 = vpop.eup %3600  ;;  %3610 = vtanh.f32 %v1745_v12 }
 0x191   : > { %v1452_v29 = vmul.f32 %v3601_v33, %v1438_v41  ;;  %3612 = vtanh.f32 %v1754_v54  ;;  %v1796_v22 = vpop.permute.xlu1 %1795  ;;  %v5799_v54 = vld [vmem:[#allocation38_spill] sm:$0xff]  ;;  %v5802_v33 = vld [vmem:[#allocation41_spill] sm:$0xff] }
 0x192   : > { %3614 = vtanh.f32 %v1749_v36  ;;  %vm1798_vm4 = vcmp.eq.s32.totalorder %v1796_v22, 1  ;;  %v5103_v22 = vld [vmem:[#allocation4 + $0x20] ss:$16 sps:$4 sm:$0xff]  }
 0x193   : > { %v4960_v30 = vsel %vm1465_vm1, %v1452_v29, %v4526_v55  ;;  %v1471_v37 = vsel %vm1465_vm1, %v1452_v29, 0.0  ;;  %v1755_v55 = vmul.f32 0.5, %v1748_v28  ;;  %3616 = vtanh.f32 %v1752_v18  ;;  %v5043_v18 = vld [vmem:[#allocation4 + $0xc0] ss:$16 sps:$4 sm:$0xff]  }
 0x194   : > { %v3603_v52 = vpop.eup %3602 }
 0x195   : > { %v1453_v51 = vmul.f32 %v3603_v52, %v1441_v40  ;;  %3618 = vtanh.f32 %v1755_v55  ;;  %v5804_v52 = vld [vmem:[#allocation43_spill] sm:$0xff] }
 0x196   : > { %v5049_v55 = vld [vmem:[#allocation4 + $0xa4] ss:$16 sps:$4 sm:$0xff]  }
 0x197   : > { %v4966_v57 = vsel %vm1466_vm2, %v1453_v51, %v4528_v56  ;;  %v1472_v58 = vsel %vm1466_vm2, %v1453_v51, 0.0 }
 0x198   : > { %v3605_v42 = vpop.eup %3604  ;;  %v3298_v13 = vpack.c.bf16 %v1472_v58, %v1471_v37  ;;  %v1828_v59 = vpack.c.bf16 %v4966_v57, %v4960_v30 }
 0x199   : > { %v1762_v49 = vmul.f32 0.5, %v3605_v42 }
 0x19a   : > { %v3607_v50 = vpop.eup %3606  ;;  %3299 = vst [vmem:[%s4339_s15] sm:$0xff] %v3298_v13   ;;  %1862 = vmatmul.mubr.bf16.vlgmr.msra.gmra.mxu0 %v1828_v59  ;;  %1905 = vmatmul.mubr.bf16.vlgmr.msra.gmra.mxu1 %v1828_v59  ;;  %v5022_v13 = vld [vmem:[#allocation4 + $0xe4] ss:$16 sps:$4 sm:$0xff]  }
 0x19b   : > { %v1768_v4 = vadd.f32 0.5, %v1762_v49  ;;  %v1763_v17 = vmul.f32 0.5, %v3607_v50  ;;  %2003 = vmatpush1.bf16.msra.mxu0 %v4545_v63  ;;  %2046 = vmatpush1.bf16.msra.mxu1 %v4547_v0  ;;  %v5035_v59 = vld [vmem:[#allocation4 + $0xc4] ss:$16 sps:$4 sm:$0xff]   ;;  %v5038_v49 = vld [vmem:[#allocation4 + $0xcc] ss:$16 sps:$4 sm:$0xff]  }
 0x19c   : > { %v3609_v56 = vpop.eup %3608  ;;  %2004 = vmatprep.subr.bf16.mxu0 %v4551_v1  ;;  %2047 = vmatprep.subr.bf16.mxu1 %v4553_v2  ;;  %v1151_v1 = vld [vmem:[#allocation16 + $0x8] sm:$0xff] }
 0x19d   : > { %v3611_v16 = vpop.eup %3610  ;;  %v1769_v23 = vadd.f32 0.5, %v1763_v17  ;;  %v1765_v19 = vmul.f32 0.5, %v3609_v56  ;;  %2034 = vmatprep.mubr.bf16.mxu0 %v5744_v62  ;;  %2077 = vmatprep.mubr.bf16.mxu1 %v5744_v62  ;;  %v5046_v50 = vld [vmem:[#allocation4 + $0xc8] ss:$16 sps:$4 sm:$0xff]   ;;  %v5055_v17 = vld [vmem:[#allocation4 + $0xa0] ss:$16 sps:$4 sm:$0xff]  }
 0x19e   : > { %v3613_v32 = vpop.eup %3612  ;;  %v1778_v12 = vmul.f32 %v3611_v16, %v1768_v4  ;;  %v5052_v4 = vld [vmem:[#allocation4 + $0xac] ss:$16 sps:$4 sm:$0xff]   ;;  %v5058_v56 = vld [vmem:[#allocation4 + $0xa8] ss:$16 sps:$4 sm:$0xff]  }
 0x19f   : > { %v1771_v63 = vadd.f32 0.5, %v1765_v19  ;;  %v1766_v43 = vmul.f32 0.5, %v3613_v32  ;;  %v1776_v0 = vmul.f32 %v1769_v23, %v1150_v53  ;;  %2005 = vmatpush1.bf16.msra.mxu0 %v4560_v5  ;;  %2048 = vmatpush1.bf16.msra.mxu1 %v4562_v6  ;;  %v3615_v20 = vpop.eup %3614  ;;  %v5064_v16 = vld [vmem:[#allocation4 + $0x8c] ss:$16 sps:$4 sm:$0xff]   ;;  %v5067_v23 = vld [vmem:[#allocation4 + $0x80] ss:$16 sps:$4 sm:$0xff]  }
 0x1a0   : > { %2006 = vmatprep.subr.bf16.mxu0 %v4568_v9  ;;  %2049 = vmatprep.subr.bf16.mxu1 %v4570_v10  ;;  %v5796_v9 = vld [vmem:[#allocation35_spill] sm:$0xff]  ;;  %v5797_v10 = vld [vmem:[#allocation36_spill] sm:$0xff] }
 0x1a1   : > { %v1772_v2 = vadd.f32 0.5, %v1766_v43  ;;  %v1780_v27 = vadd.f32 %v1778_v12, %v1776_v0  ;;  %v1779_v41 = vmul.f32 %v3615_v20, %v1771_v63  ;;  %v5070_v19 = vld [vmem:[#allocation4 + $0x88] ss:$16 sps:$4 sm:$0xff]   ;;  %v5076_v32 = vld [vmem:[#allocation4 + $0x6c] ss:$16 sps:$4 sm:$0xff]  }
 0x1a2   : > { %v5079_v63 = vld [vmem:[#allocation4 + $0x60] ss:$16 sps:$4 sm:$0xff]   ;;  %v5082_v43 = vld [vmem:[#allocation4 + $0x68] ss:$16 sps:$4 sm:$0xff]   ;;  %v5085_v0 = vld [vmem:[#allocation4 + $0x44] ss:$16 sps:$4 sm:$0xff]  }
 0x1a3   : > { %3620 = vtanh.f32 %v1780_v27  ;;  %v4983_v45 = vsel %vm1797_vm3, %v1780_v27, %v1150_v53  ;;  %v1777_v24 = vmul.f32 %v1772_v2, %v1151_v1  ;;  %2007 = vmatpush1.bf16.msra.mxu0 %v4579_v14  ;;  %2050 = vmatpush1.bf16.msra.mxu1 %v4581_v15  ;;  %v3617_v14 = vpop.eup %3616  ;;  %v5061_v53 = vld [vmem:[#allocation4 + $0x84] ss:$16 sps:$4 sm:$0xff]   ;;  %v5088_v12 = vld [vmem:[#allocation4 + $0x4c] ss:$16 sps:$4 sm:$0xff]   ;;  %v5094_v2 = vld [vmem:[#allocation4 + $0x48] ss:$16 sps:$4 sm:$0xff]  }
 0x1a4   : > { %2008 = vmatprep.subr.bf16.mxu0 %v4587_v34  ;;  %2051 = vmatprep.subr.bf16.mxu1 %v4589_v39  ;;  %v3619_v15 = vpop.eup %3618  ;;  %v5800_v34 = vld [vmem:[#allocation39_spill] sm:$0xff]  ;;  %v5801_v39 = vld [vmem:[#allocation40_spill] sm:$0xff]  ;;  %v1764_v29 = vmul.f32 0.5, %v3617_v14 }
 0x1a5   : > { %v1781_v5 = vadd.f32 %v1779_v41, %v1777_v24  ;;  %v1767_v36 = vmul.f32 0.5, %v3619_v15  ;;  %v5097_v27 = vld [vmem:[#allocation4 + $0x24] ss:$16 sps:$4 sm:$0xff]   ;;  %v5100_v20 = vld [vmem:[#allocation4 + $0x2c] ss:$16 sps:$4 sm:$0xff]  }
 0x1a6   : > { %v1770_v51 = vadd.f32 0.5, %v1764_v29  ;;  %v5106_v24 = vld [vmem:[#allocation4 + $0x28] ss:$16 sps:$4 sm:$0xff]   ;;  %v5109_v41 = vld [vmem:[#allocation4 + $0x4] ss:$16 sps:$4 sm:$0xff]  }
 0x1a7   : > { %3622 = vtanh.f32 %v1781_v5  ;;  %v4990_v6 = vsel %vm1798_vm4, %v1781_v5, %v1151_v1  ;;  %2009 = vmatpush1.bf16.msra.mxu0 %v5796_v9  ;;  %2052 = vmatpush1.bf16.msra.mxu1 %v5797_v10  ;;  %v1773_v35 = vadd.f32 0.5, %v1767_v36  ;;  %v5091_v1 = vld [vmem:[#allocation4 + $0x40] ss:$16 sps:$4 sm:$0xff]   ;;  %v5112_v5 = vld [vmem:[#allocation4 + $0xc] ss:$16 sps:$4 sm:$0xff]  }
 0x1a8   : > { %2010 = vmatprep.subr.bf16.mxu0 %v5798_v21  ;;  %2053 = vmatprep.subr.bf16.mxu1 %v5799_v54  ;;  %v5115_v9 = vld [vmem:[#allocation4] ss:$16 sps:$4 sm:$0xff]   ;;  %v5118_v10 = vld [vmem:[#allocation4 + $0x8] ss:$16 sps:$4 sm:$0xff]   ;;  %v5121_v21 = vld [vmem:[#allocation7 + $0xe4] ss:$16 sps:$4 sm:$0xff]  }
 0x1a9   : > { %5807 = vst [vmem:[#allocation35_spill] sm:$0xff] %v5118_v10  ;;  %5808 = vst [vmem:[#allocation36_spill] sm:$0xff] %v5121_v21  ;;  %v5124_v54 = vld [vmem:[#allocation7 + $0xec] ss:$16 sps:$4 sm:$0xff]  }
 0x1aa   : > { %5809 = vst [vmem:[#allocation37_spill] sm:$0xff] %v5124_v54 }
 0x1ab   : > { %2011 = vmatpush1.bf16.msra.mxu0 %v4613_v7  ;;  %2054 = vmatpush1.bf16.msra.mxu1 %v5800_v34  ;;  %v5810_v34 = vld [vmem:[#allocation46_spill] sm:$0xff] }
 0x1ac   : > { %2012 = vmatprep.subr.bf16.mxu0 %v5801_v39  ;;  %2055 = vmatprep.subr.bf16.mxu1 %v5802_v33 }
 0x1af   : > { %2013 = vmatpush1.bf16.msra.mxu0 %v4629_v3  ;;  %2056 = vmatpush1.bf16.msra.mxu1 %v5803_v38  ;;  %v5811_v38 = vld [vmem:[#allocation48_spill] sm:$0xff] }
 0x1b0   : > { %v3621_v40 = vpop.eup %3620  ;;  %2014 = vmatprep.subr.bf16.mxu0 %v5804_v52  ;;  %2057 = vmatprep.subr.bf16.mxu1 %v5805_v11  ;;  %v5812_v52 = vld [vmem:[#allocation49_spill] sm:$0xff] }
 0x1b1   : > { %v1784_v7 = vmul.f32 %v3621_v40, %v1770_v51 }
 0x1b3   : > { %2015 = vmatpush1.bf16.msra.mxu0 %v4645_v25  ;;  %2058 = vmatpush1.bf16.msra.mxu1 %v4647_v8  ;;  %v5010_v37 = vsel %vm1797_vm3, %v1784_v7, %v4664_v61  ;;  %v1803_v58 = vsel %vm1797_vm3, %v1784_v7, 0.0  ;;  %v5806_v8 = vld [vmem:[#allocation45_spill] sm:$0xff]  ;;  %v5025_v61 = vld [vmem:[#allocation4 + $0xec] ss:$16 sps:$4 sm:$0xff]  }
 0x1b4   : > { %v3623_v28 = vpop.eup %3622  ;;  %2016 = vmatprep.subr.bf16.mxu0 %v4653_v44  ;;  %2059 = vmatprep.subr.bf16.mxu1 %v4655_v48 }
 0x1b5   : > { %v1785_v3 = vmul.f32 %v3623_v28, %v1773_v35  ;;  %v5813_v28 = vld [vmem:[#allocation50_spill] sm:$0xff] }
 0x1b7   : > { %v5015_v42 = vsel %vm1798_vm4, %v1785_v3, %v4666_v46  ;;  %v1804_v25 = vsel %vm1798_vm4, %v1785_v3, 0.0  ;;  %2017 = vmatpush1.bf16.msra.mxu0 %v4658_v47  ;;  %2060 = vmatpush1.bf16.msra.mxu1 %v5806_v8  ;;  %v5029_v46 = vld [vmem:[#allocation4 + $0xe0] ss:$16 sps:$4 sm:$0xff]   ;;  %v5032_v47 = vld [vmem:[#allocation4 + $0xe8] ss:$16 sps:$4 sm:$0xff]  }
 0x1b8   : > { %v3303_v44 = vpack.c.bf16 %v1804_v25, %v1803_v58  ;;  %v2001_v48 = vpack.c.bf16 %v5015_v42, %v5010_v37  ;;  %2174 = vmatprep.subr.bf16.mxu0 %v5022_v13  ;;  %2217 = vmatprep.subr.bf16.mxu1 %v5025_v61 }
 0x1ba   : > { %3335 = vst [vmem:[%s4341_s19 + $0x18] sm:$0xff] %v3303_v44   ;;  %2035 = vmatmul.mubr.bf16.vlgmr.msra.gmra.mxu0 %v2001_v48  ;;  %2078 = vmatmul.mubr.bf16.vlgmr.msra.gmra.mxu1 %v2001_v48  ;;  %v5814_v44 = vld [vmem:[#allocation52_spill] sm:$0xff] }
 0x1bb   : > { %2175 = vmatpush1.bf16.msra.mxu0 %v5029_v46  ;;  %2218 = vmatpush1.bf16.msra.mxu1 %v5032_v47 }
 0x1bc   : > { %2176 = vmatprep.subr.bf16.mxu0 %v5035_v59  ;;  %2219 = vmatprep.subr.bf16.mxu1 %v5038_v49 }
 0x1bd   : > { %2206 = vmatprep.mubr.bf16.mxu0 %v5744_v62  ;;  %2249 = vmatprep.mubr.bf16.mxu1 %v5744_v62 }
 0x1bf   : > { %2177 = vmatpush1.bf16.msra.mxu0 %v5043_v18  ;;  %2220 = vmatpush1.bf16.msra.mxu1 %v5046_v50 }
 0x1c0   : > { %2178 = vmatprep.subr.bf16.mxu0 %v5049_v55  ;;  %2221 = vmatprep.subr.bf16.mxu1 %v5052_v4 }
 0x1c3   : > { %2179 = vmatpush1.bf16.msra.mxu0 %v5055_v17  ;;  %2222 = vmatpush1.bf16.msra.mxu1 %v5058_v56 }
 0x1c4   : > { %2180 = vmatprep.subr.bf16.mxu0 %v5061_v53  ;;  %2223 = vmatprep.subr.bf16.mxu1 %v5064_v16 }
 0x1c7   : > { %2181 = vmatpush1.bf16.msra.mxu0 %v5067_v23  ;;  %2224 = vmatpush1.bf16.msra.mxu1 %v5070_v19 }
 0x1c8   : > { %2182 = vmatprep.subr.bf16.mxu0 %v5073_v26  ;;  %2225 = vmatprep.subr.bf16.mxu1 %v5076_v32 }
 0x1cb   : > { %2183 = vmatpush1.bf16.msra.mxu0 %v5079_v63  ;;  %2226 = vmatpush1.bf16.msra.mxu1 %v5082_v43 }
 0x1cc   : > { %2184 = vmatprep.subr.bf16.mxu0 %v5085_v0  ;;  %2227 = vmatprep.subr.bf16.mxu1 %v5088_v12 }
 0x1cf   : > { %2185 = vmatpush1.bf16.msra.mxu0 %v5091_v1  ;;  %2228 = vmatpush1.bf16.msra.mxu1 %v5094_v2 }
 0x1d0   : > { %2186 = vmatprep.subr.bf16.mxu0 %v5097_v27  ;;  %2229 = vmatprep.subr.bf16.mxu1 %v5100_v20 }
 0x1d3   : > { %2187 = vmatpush1.bf16.msra.mxu0 %v5103_v22  ;;  %2230 = vmatpush1.bf16.msra.mxu1 %v5106_v24 }
 0x1d4   : > { %2188 = vmatprep.subr.bf16.mxu0 %v5109_v41  ;;  %2231 = vmatprep.subr.bf16.mxu1 %v5112_v5 }
 0x1d7   : > { %2189 = vmatpush1.bf16.msra.mxu0 %v5115_v9  ;;  %2232 = vmatpush1.bf16.msra.mxu1 %v5118_v10  ;;  %v5827_v10 = vld [vmem:[#allocation91_spill] sm:$0xff] }
 0x1d8   : > { %2346 = vmatprep.subr.bf16.mxu0 %v5121_v21  ;;  %2389 = vmatprep.subr.bf16.mxu1 %v5124_v54 }
 0x25a   : > { %v1863_v14 = vpop.f32.mrf.mxu0  ;;  %v1906_v15 = vpop.f32.mrf.mxu1 }
 0x25b   : > { %v1915_v39 = vadd.f32 %v1863_v14, %v5810_v34  ;;  %v5815_v34 = vld [vmem:[#allocation53_spill] sm:$0xff] }
 0x25c   : > { %v1865_v33 = vpop.f32.mrf.mxu0  ;;  %v1908_v29 = vpop.f32.mrf.mxu1 }
 0x25d   : > { %v1923_v36 = vmul.f32 0.5, %v1915_v39  ;;  %v1916_v40 = vadd.f32 %v1865_v33, %v5811_v38  ;;  %v1918_v11 = vadd.f32 %v1908_v29, %v5812_v52  ;;  %v5816_v33 = vld [vmem:[#allocation47_spill] sm:$0xff] }
 0x25e   : > { %v1867_v51 = vpop.f32.mrf.mxu0  ;;  %v1910_v35 = vpop.f32.mrf.mxu1  ;;  %v1917_v29 = vadd.f32 %v1906_v15, %v5816_v33 }
 0x25f   : > { %3624 = vtanh.f32 %v1923_v36  ;;  %v1924_v7 = vmul.f32 0.5, %v1916_v40  ;;  %v1919_v3 = vadd.f32 %v1867_v51, %v5813_v28  ;;  %v5817_v36 = vld [vmem:[#allocation51_spill] sm:$0xff] }
 0x260   : > { %v1869_v58 = vpop.f32.mrf.mxu0  ;;  %v1912_v25 = vpop.f32.mrf.mxu1  ;;  %v1925_v38 = vmul.f32 0.5, %v1917_v29  ;;  %v1921_v40 = vadd.f32 %v1910_v35, %v5817_v36 }
 0x261   : > { %3626 = vtanh.f32 %v1924_v7  ;;  %v1926_v8 = vmul.f32 0.5, %v1919_v3  ;;  %v1920_v48 = vadd.f32 %v1869_v58, %v5814_v44  ;;  %v1922_v39 = vadd.f32 %v1912_v25, %v5815_v34  ;;  %v1966_v35 = vpop.permute.xlu0 %1965 }
 0x262   : > { %3628 = vtanh.f32 %v1918_v11  ;;  %v1928_v58 = vmul.f32 0.5, %v1921_v40  ;;  %vm1970_vm5 = vcmp.eq.s32.totalorder %v1966_v35, 1  ;;  %v1969_v40 = vpop.permute.xlu1 %1968  ;;  %v5169_v35 = vld [vmem:[#allocation7 + $0xe8] ss:$16 sps:$4 sm:$0xff]  }
 0x263   : > { %3630 = vtanh.f32 %v1926_v8  ;;  %v1927_v14 = vmul.f32 0.5, %v1920_v48  ;;  %vm1971_vm6 = vcmp.eq.s32.totalorder %v1969_v40, 1 }
 0x265   : > { %3632 = vtanh.f32 %v1927_v14 }
 0x266   : > { %3634 = vtanh.f32 %v1922_v39 }
 0x267   : > { %3636 = vtanh.f32 %v1925_v38 }
 0x268   : > { %3638 = vtanh.f32 %v1928_v58 }
 0x26c   : > { %v3625_v52 = vpop.eup %3624 }
 0x26d   : > { %v1935_v51 = vmul.f32 0.5, %v3625_v52 }
 0x26e   : > { %v3627_v28 = vpop.eup %3626 }
 0x26f   : > { %v3629_v7 = vpop.eup %3628  ;;  %v1941_v3 = vadd.f32 0.5, %v1935_v51  ;;  %v1936_v54 = vmul.f32 0.5, %v3627_v28 }
 0x270   : > { %v3631_v11 = vpop.eup %3630 }
 0x271   : > { %v1942_v8 = vadd.f32 0.5, %v1936_v54  ;;  %v1951_v44 = vmul.f32 %v3629_v7, %v1941_v3  ;;  %v1938_v48 = vmul.f32 0.5, %v3631_v11  ;;  %v5819_v3 = vld [vmem:[#allocation86_spill] sm:$0xff] }
 0x272   : > { %v3633_v25 = vpop.eup %3632 }
 0x273   : > { %v1949_v14 = vmul.f32 %v1942_v8, %v4936_v31  ;;  %v1944_v15 = vadd.f32 0.5, %v1938_v48  ;;  %v1939_v34 = vmul.f32 0.5, %v3633_v25  ;;  %v3635_v39 = vpop.eup %3634  ;;  %v5821_v25 = vld [vmem:[#allocation88_spill] sm:$0xff] }
 0x274   : > { %v3637_v7 = vpop.eup %3636 }
 0x275   : > { %v1953_v33 = vadd.f32 %v1951_v44, %v1949_v14  ;;  %v1945_v29 = vadd.f32 0.5, %v1939_v34  ;;  %v1952_v36 = vmul.f32 %v3635_v39, %v1944_v15  ;;  %v5822_v15 = vld [vmem:[#allocation89_spill] sm:$0xff] }
 0x277   : > { %3640 = vtanh.f32 %v1953_v33  ;;  %v1950_v38 = vmul.f32 %v1945_v29, %v4943_v60  ;;  %v5139_v54 = vsel %vm1970_vm5, %v1953_v33, %v4936_v31  ;;  %v1937_v31 = vmul.f32 0.5, %v3637_v7 }
 0x278   : > { %5818 = vst [vmem:[#allocation38_spill] sm:$0xff] %v5139_v54  ;;  %v3639_v54 = vpop.eup %3638 }
 0x279   : > { %v1954_v52 = vadd.f32 %v1952_v36, %v1950_v38  ;;  %v5823_v36 = vld [vmem:[#allocation90_spill] sm:$0xff]  ;;  %v1943_v21 = vadd.f32 0.5, %v1937_v31 }
 0x27a   : > { %v2036_v51 = vpop.f32.mrf.mxu0  ;;  %v2079_v28 = vpop.f32.mrf.mxu1 }
 0x27b   : > { %3642 = vtanh.f32 %v1954_v52  ;;  %v2088_v58 = vadd.f32 %v2036_v51, %v5819_v3  ;;  %v5144_v11 = vsel %vm1971_vm6, %v1954_v52, %v4943_v60  ;;  %v5824_v52 = vld [vmem:[#allocation92_spill] sm:$0xff] }
 0x27c   : > { %5820 = vst [vmem:[#allocation39_spill] sm:$0xff] %v5144_v11  ;;  %v2038_v8 = vpop.f32.mrf.mxu0  ;;  %v2081_v44 = vpop.f32.mrf.mxu1 }
 0x27d   : > { %v2096_v48 = vmul.f32 0.5, %v2088_v58  ;;  %v2089_v14 = vadd.f32 %v2038_v8, %v5821_v25  ;;  %v2091_v34 = vadd.f32 %v2081_v44, %v5822_v15  ;;  %v1940_v58 = vmul.f32 0.5, %v3639_v54  ;;  %v5825_v8 = vld [vmem:[#allocation93_spill] sm:$0xff] }
 0x27e   : > { %v2040_v39 = vpop.f32.mrf.mxu0  ;;  %v2083_v33 = vpop.f32.mrf.mxu1 }
 0x27f   : > { %3644 = vtanh.f32 %v2096_v48  ;;  %v2097_v29 = vmul.f32 0.5, %v2089_v14  ;;  %v2092_v38 = vadd.f32 %v2040_v39, %v5823_v36  ;;  %v5826_v14 = vld [vmem:[#allocation87_spill] sm:$0xff]  ;;  %v1946_v39 = vadd.f32 0.5, %v1940_v58 }
 0x280   : > { %v2042_v51 = vpop.f32.mrf.mxu0  ;;  %v2085_v3 = vpop.f32.mrf.mxu1  ;;  %v2090_v15 = vadd.f32 %v2079_v28, %v5826_v14  ;;  %v5166_v58 = vld [vmem:[#allocation7 + $0xe0] ss:$16 sps:$4 sm:$0xff]  }
 0x281   : > { %3646 = vtanh.f32 %v2097_v29  ;;  %v2099_v60 = vmul.f32 0.5, %v2092_v38  ;;  %v2093_v11 = vadd.f32 %v2042_v51, %v5824_v52  ;;  %v2095_v44 = vadd.f32 %v2085_v3, %v5825_v8  ;;  %v5175_v8 = vld [vmem:[#allocation7 + $0xcc] ss:$16 sps:$4 sm:$0xff]  }
 0x282   : > { %3648 = vtanh.f32 %v2091_v34  ;;  %v2098_v38 = vmul.f32 0.5, %v2090_v15  ;;  %v2094_v51 = vadd.f32 %v2083_v33, %v5827_v10 }
 0x283   : > { %3650 = vtanh.f32 %v2099_v60  ;;  %v2100_v7 = vmul.f32 0.5, %v2093_v11 }
 0x284   : > { %v3641_v25 = vpop.eup %3640 }
 0x285   : > { %3652 = vtanh.f32 %v2100_v7  ;;  %v1957_v48 = vmul.f32 %v3641_v25, %v1943_v21  ;;  %v5172_v7 = vld [vmem:[#allocation7 + $0xc4] ss:$16 sps:$4 sm:$0xff]  }
 0x286   : > { %3654 = vtanh.f32 %v2095_v44 }
 0x287   : > { %v5155_v54 = vsel %vm1970_vm5, %v1957_v48, %v4960_v30  ;;  %v1976_v21 = vsel %vm1970_vm5, %v1957_v48, 0.0  ;;  %3656 = vtanh.f32 %v2098_v38  ;;  %v5184_v38 = vld [vmem:[#allocation7 + $0xc8] ss:$16 sps:$4 sm:$0xff]  }
 0x288   : > { %v3643_v36 = vpop.eup %3642 }
 0x289   : > { %v1958_v29 = vmul.f32 %v3643_v36, %v1946_v39 }
 0x28b   : > { %v5159_v11 = vsel %vm1971_vm6, %v1958_v29, %v4966_v57  ;;  %v1977_v28 = vsel %vm1971_vm6, %v1958_v29, 0.0  ;;  %v2101_v57 = vmul.f32 0.5, %v2094_v51  ;;  %v5181_v29 = vld [vmem:[#allocation7 + $0xc0] ss:$16 sps:$4 sm:$0xff]  }
 0x28c   : > { %v3645_v31 = vpop.eup %3644  ;;  %v3308_v34 = vpack.c.bf16 %v1977_v28, %v1976_v21  ;;  %v2173_v3 = vpack.c.bf16 %v5159_v11, %v5155_v54  ;;  %v5187_v21 = vld [vmem:[#allocation7 + $0xa4] ss:$16 sps:$4 sm:$0xff]   ;;  %v5190_v28 = vld [vmem:[#allocation7 + $0xac] ss:$16 sps:$4 sm:$0xff]  }
 0x28d   : > { %v2108_v60 = vmul.f32 0.5, %v3645_v31  ;;  %3658 = vtanh.f32 %v2101_v57  ;;  %v5193_v31 = vpop.permute.xlu0 %2138  ;;  %v5208_v57 = vld [vmem:[#allocation7 + $0x84] ss:$16 sps:$4 sm:$0xff]  }
 0x28e   : > { %v3647_v52 = vpop.eup %3646  ;;  %3336 = vst [vmem:[%s4339_s15 + $0x8] sm:$0xff] %v3308_v34   ;;  %2207 = vmatmul.mubr.bf16.vlgmr.msra.gmra.mxu0 %v2173_v3  ;;  %2250 = vmatmul.mubr.bf16.vlgmr.msra.gmra.mxu1 %v2173_v3  ;;  %vm2143_vm7 = vcmp.eq.s32.totalorder %v5193_v31, 1 }
 0x28f   : > { %v3649_v30 = vpop.eup %3648  ;;  %v2114_v10 = vadd.f32 0.5, %v2108_v60  ;;  %v2109_v33 = vmul.f32 0.5, %v3647_v52  ;;  %2347 = vmatpush1.bf16.msra.mxu0 %v5166_v58  ;;  %2390 = vmatpush1.bf16.msra.mxu1 %v5169_v35 }
 0x290   : > { %v3651_v40 = vpop.eup %3650  ;;  %2348 = vmatprep.subr.bf16.mxu0 %v5172_v7  ;;  %2391 = vmatprep.subr.bf16.mxu1 %v5175_v8 }
 0x291   : > { %v2115_v44 = vadd.f32 0.5, %v2109_v33  ;;  %v2124_v25 = vmul.f32 %v3649_v30, %v2114_v10  ;;  %v2111_v48 = vmul.f32 0.5, %v3651_v40  ;;  %2378 = vmatprep.mubr.bf16.mxu0 %v5744_v62  ;;  %2421 = vmatprep.mubr.bf16.mxu1 %v5744_v62  ;;  %v5197_v30 = vld [vmem:[#allocation7 + $0xa0] ss:$16 sps:$4 sm:$0xff]   ;;  %v5200_v10 = vld [vmem:[#allocation7 + $0xa8] ss:$16 sps:$4 sm:$0xff]  }
 0x292   : > { %v3653_v14 = vpop.eup %3652  ;;  %v5211_v40 = vld [vmem:[#allocation7 + $0x8c] ss:$16 sps:$4 sm:$0xff]  }
 0x293   : > { %v2122_v15 = vmul.f32 %v2115_v44, %v4983_v45  ;;  %v2117_v39 = vadd.f32 0.5, %v2111_v48  ;;  %v2112_v36 = vmul.f32 0.5, %v3653_v14  ;;  %2349 = vmatpush1.bf16.msra.mxu0 %v5181_v29  ;;  %2392 = vmatpush1.bf16.msra.mxu1 %v5184_v38  ;;  %v3655_v51 = vpop.eup %3654  ;;  %v2142_v44 = vpop.permute.xlu1 %2141  ;;  %v5214_v48 = vld [vmem:[#allocation7 + $0x80] ss:$16 sps:$4 sm:$0xff]   ;;  %v5217_v14 = vld [vmem:[#allocation7 + $0x88] ss:$16 sps:$4 sm:$0xff]  }
 0x294   : > { %2350 = vmatprep.subr.bf16.mxu0 %v5187_v21  ;;  %2393 = vmatprep.subr.bf16.mxu1 %v5190_v28  ;;  %vm2144_vm8 = vcmp.eq.s32.totalorder %v2142_v44, 1  ;;  %5828 = vst [vmem:[#allocation40_spill] sm:$0xff] %v5217_v14 }
 0x295   : > { %v2126_v34 = vadd.f32 %v2124_v25, %v2122_v15  ;;  %v2118_v3 = vadd.f32 0.5, %v2112_v36  ;;  %v2125_v60 = vmul.f32 %v3655_v51, %v2117_v39  ;;  %v3657_v15 = vpop.eup %3656  ;;  %v5224_v39 = vld [vmem:[#allocation7 + $0x64] ss:$16 sps:$4 sm:$0xff]   ;;  %v5227_v36 = vld [vmem:[#allocation7 + $0x6c] ss:$16 sps:$4 sm:$0xff]  }
 0x296   : > { %5829 = vst [vmem:[#allocation41_spill] sm:$0xff] %v5224_v39  ;;  %5830 = vst [vmem:[#allocation42_spill] sm:$0xff] %v5227_v36  ;;  %v2110_v51 = vmul.f32 0.5, %v3657_v15  ;;  %v5242_v15 = vld [vmem:[#allocation7 + $0x40] ss:$16 sps:$4 sm:$0xff]  }
 0x297   : > { %3660 = vtanh.f32 %v2126_v34  ;;  %v2123_v52 = vmul.f32 %v2118_v3, %v4990_v6  ;;  %2351 = vmatpush1.bf16.msra.mxu0 %v5197_v30  ;;  %2394 = vmatpush1.bf16.msra.mxu1 %v5200_v10  ;;  %v5206_v33 = vsel %vm2143_vm7, %v2126_v34, %v4983_v45  ;;  %v5230_v34 = vld [vmem:[#allocation7 + $0x60] ss:$16 sps:$4 sm:$0xff]   ;;  %v5233_v3 = vld [vmem:[#allocation7 + $0x68] ss:$16 sps:$4 sm:$0xff]   ;;  %5835 = vst [vmem:[#allocation48_spill] sm:$0xff] %v5242_v15 }
 0x298   : > { %2352 = vmatprep.subr.bf16.mxu0 %v5208_v57  ;;  %2395 = vmatprep.subr.bf16.mxu1 %v5211_v40  ;;  %5831 = vst [vmem:[#allocation43_spill] sm:$0xff] %v5230_v34  ;;  %5832 = vst [vmem:[#allocation44_spill] sm:$0xff] %v5233_v3 }
 0x299   : > { %v2127_v25 = vadd.f32 %v2125_v60, %v2123_v52  ;;  %v5236_v60 = vld [vmem:[#allocation7 + $0x44] ss:$16 sps:$4 sm:$0xff]   ;;  %v5239_v52 = vld [vmem:[#allocation7 + $0x4c] ss:$16 sps:$4 sm:$0xff]  }
 0x29a   : > { %5833 = vst [vmem:[#allocation45_spill] sm:$0xff] %v5236_v60  ;;  %5834 = vst [vmem:[#allocation46_spill] sm:$0xff] %v5239_v52 }
 0x29b   : > { %3662 = vtanh.f32 %v2127_v25  ;;  %2353 = vmatpush1.bf16.msra.mxu0 %v5214_v48  ;;  %2396 = vmatpush1.bf16.msra.mxu1 %v5217_v14  ;;  %v5222_v45 = vsel %vm2144_vm8, %v2127_v25, %v4990_v6  ;;  %v3659_v6 = vpop.eup %3658  ;;  %v2116_v25 = vadd.f32 0.5, %v2110_v51  ;;  %v5260_v14 = vld [vmem:[#allocation7 + $0x4] ss:$16 sps:$4 sm:$0xff]  }
 0x29c   : > { %2354 = vmatprep.subr.bf16.mxu0 %v5224_v39  ;;  %2397 = vmatprep.subr.bf16.mxu1 %v5227_v36  ;;  %v2113_v36 = vmul.f32 0.5, %v3659_v6  ;;  %v5248_v39 = vld [vmem:[#allocation7 + $0x24] ss:$16 sps:$4 sm:$0xff]   ;;  %v5254_v6 = vld [vmem:[#allocation7 + $0x20] ss:$16 sps:$4 sm:$0xff]   ;;  %5839 = vst [vmem:[#allocation53_spill] sm:$0xff] %v5260_v14 }
 0x29d   : > { %5837 = vst [vmem:[#allocation50_spill] sm:$0xff] %v5248_v39 }
 0x29e   : > { %v2119_v51 = vadd.f32 0.5, %v2113_v36  ;;  %v5266_v36 = vld [vmem:[#allocation7] ss:$16 sps:$4 sm:$0xff]  }
 0x29f   : > { %2355 = vmatpush1.bf16.msra.mxu0 %v5230_v34  ;;  %2398 = vmatpush1.bf16.msra.mxu1 %v5233_v3  ;;  %v5245_v34 = vld [vmem:[#allocation7 + $0x48] ss:$16 sps:$4 sm:$0xff]   ;;  %5841 = vst [vmem:[#allocation51_spill] sm:$0xff] %v5266_v36 }
 0x2a0   : > { %2356 = vmatprep.subr.bf16.mxu0 %v5236_v60  ;;  %2399 = vmatprep.subr.bf16.mxu1 %v5239_v52  ;;  %5836 = vst [vmem:[#allocation49_spill] sm:$0xff] %v5245_v34  ;;  %v5251_v60 = vld [vmem:[#allocation7 + $0x2c] ss:$16 sps:$4 sm:$0xff]  }
 0x2a3   : > { %2357 = vmatpush1.bf16.msra.mxu0 %v5242_v15  ;;  %2400 = vmatpush1.bf16.msra.mxu1 %v5245_v34  ;;  %v5257_v15 = vld [vmem:[#allocation7 + $0x28] ss:$16 sps:$4 sm:$0xff]  }
 0x2a4   : > { %v3661_v3 = vpop.eup %3660  ;;  %2358 = vmatprep.subr.bf16.mxu0 %v5248_v39  ;;  %2401 = vmatprep.subr.bf16.mxu1 %v5251_v60  ;;  %5838 = vst [vmem:[#allocation52_spill] sm:$0xff] %v5257_v15  ;;  %v5263_v39 = vld [vmem:[#allocation7 + $0xc] ss:$16 sps:$4 sm:$0xff]  }
 0x2a5   : > { %v2130_v52 = vmul.f32 %v3661_v3, %v2116_v25  ;;  %5840 = vst [vmem:[#allocation47_spill] sm:$0xff] %v5263_v39  ;;  %v5269_v25 = vld [vmem:[#allocation7 + $0x8] ss:$16 sps:$4 sm:$0xff]  }
 0x2a7   : > { %2359 = vmatpush1.bf16.msra.mxu0 %v5254_v6  ;;  %2402 = vmatpush1.bf16.msra.mxu1 %v5257_v15  ;;  %v5275_v15 = vsel %vm2143_vm7, %v2130_v52, %v5010_v37  ;;  %v5842_v37 = vld [vmem:[#allocation35_spill] sm:$0xff] }
 0x2a8   : > { %v3663_v34 = vpop.eup %3662  ;;  %2360 = vmatprep.subr.bf16.mxu0 %v5260_v14  ;;  %2403 = vmatprep.subr.bf16.mxu1 %v5263_v39 }
 0x2a9   : > { %v2131_v3 = vmul.f32 %v3663_v34, %v2119_v51  ;;  %v2149_v34 = vsel %vm2143_vm7, %v2130_v52, 0.0 }
 0x2ab   : > { %2361 = vmatpush1.bf16.msra.mxu0 %v5266_v36  ;;  %2404 = vmatpush1.bf16.msra.mxu1 %v5269_v25  ;;  %v5279_v14 = vsel %vm2144_vm8, %v2131_v3, %v5015_v42  ;;  %v2150_v51 = vsel %vm2144_vm8, %v2131_v3, 0.0  ;;  %v5843_v42 = vld [vmem:[#allocation36_spill] sm:$0xff] }
 0x2ac   : > { %v3313_v39 = vpack.c.bf16 %v2150_v51, %v2149_v34  ;;  %v2345_v36 = vpack.c.bf16 %v5279_v14, %v5275_v15  ;;  %2518 = vmatprep.subr.bf16.mxu0 %v5022_v13  ;;  %2561 = vmatprep.subr.bf16.mxu1 %v5025_v61  ;;  %v5844_v13 = vld [vmem:[#allocation37_spill] sm:$0xff] }
 0x2ae   : > { %3337 = vst [vmem:[%s4341_s19 + $0x10] sm:$0xff] %v3313_v39   ;;  %2379 = vmatmul.mubr.bf16.vlgmr.msra.gmra.mxu0 %v2345_v36  ;;  %2422 = vmatmul.mubr.bf16.vlgmr.msra.gmra.mxu1 %v2345_v36 }
 0x2af   : > { %2519 = vmatpush1.bf16.msra.mxu0 %v5029_v46  ;;  %2562 = vmatpush1.bf16.msra.mxu1 %v5032_v47  ;;  %v5845_v47 = vld [vmem:[#allocation54_spill] sm:$0xff] }
 0x2b0   : > { %2520 = vmatprep.subr.bf16.mxu0 %v5035_v59  ;;  %2563 = vmatprep.subr.bf16.mxu1 %v5038_v49 }
 0x2b1   : > { %2550 = vmatprep.mubr.bf16.mxu0 %v5744_v62  ;;  %2593 = vmatprep.mubr.bf16.mxu1 %v5744_v62 }
 0x2b3   : > { %2521 = vmatpush1.bf16.msra.mxu0 %v5043_v18  ;;  %2564 = vmatpush1.bf16.msra.mxu1 %v5046_v50 }
 0x2b4   : > { %2522 = vmatprep.subr.bf16.mxu0 %v5049_v55  ;;  %2565 = vmatprep.subr.bf16.mxu1 %v5052_v4  ;;  %v5846_v55 = vld [vmem:[#allocation56_spill] sm:$0xff] }
 0x2b7   : > { %2523 = vmatpush1.bf16.msra.mxu0 %v5055_v17  ;;  %2566 = vmatpush1.bf16.msra.mxu1 %v5058_v56  ;;  %v5847_v17 = vld [vmem:[#allocation57_spill] sm:$0xff] }
 0x2b8   : > { %2524 = vmatprep.subr.bf16.mxu0 %v5061_v53  ;;  %2567 = vmatprep.subr.bf16.mxu1 %v5064_v16 }
 0x2bb   : > { %2525 = vmatpush1.bf16.msra.mxu0 %v5067_v23  ;;  %2568 = vmatpush1.bf16.msra.mxu1 %v5070_v19  ;;  %v5848_v19 = vld [vmem:[#allocation58_spill] sm:$0xff] }
 0x2bc   : > { %2526 = vmatprep.subr.bf16.mxu0 %v5073_v26  ;;  %2569 = vmatprep.subr.bf16.mxu1 %v5076_v32 }
 0x2bf   : > { %2527 = vmatpush1.bf16.msra.mxu0 %v5079_v63  ;;  %2570 = vmatpush1.bf16.msra.mxu1 %v5082_v43 }
 0x2c0   : > { %2528 = vmatprep.subr.bf16.mxu0 %v5085_v0  ;;  %2571 = vmatprep.subr.bf16.mxu1 %v5088_v12  ;;  %v5849_v0 = vld [vmem:[#allocation60_spill] sm:$0xff] }
 0x2c3   : > { %2529 = vmatpush1.bf16.msra.mxu0 %v5091_v1  ;;  %2572 = vmatpush1.bf16.msra.mxu1 %v5094_v2  ;;  %v5850_v2 = vld [vmem:[#allocation61_spill] sm:$0xff] }
 0x2c4   : > { %2530 = vmatprep.subr.bf16.mxu0 %v5097_v27  ;;  %2573 = vmatprep.subr.bf16.mxu1 %v5100_v20  ;;  %v5851_v20 = vld [vmem:[#allocation55_spill] sm:$0xff] }
 0x2c7   : > { %2531 = vmatpush1.bf16.msra.mxu0 %v5103_v22  ;;  %2574 = vmatpush1.bf16.msra.mxu1 %v5106_v24 }
 0x2c8   : > { %2532 = vmatprep.subr.bf16.mxu0 %v5109_v41  ;;  %2575 = vmatprep.subr.bf16.mxu1 %v5112_v5  ;;  %v5852_v41 = vld [vmem:[#allocation59_spill] sm:$0xff] }
 0x2cb   : > { %2533 = vmatpush1.bf16.msra.mxu0 %v5115_v9  ;;  %2576 = vmatpush1.bf16.msra.mxu1 %v5842_v37 }
 0x2cc   : > { %2689 = vmatprep.subr.bf16.mxu0 %v5843_v42  ;;  %2732 = vmatprep.subr.bf16.mxu1 %v5844_v13 }
 0x34e   : > { %v2208_v61 = vpop.f32.mrf.mxu0  ;;  %v2251_v46 = vpop.f32.mrf.mxu1 }
 0x34f   : > { %v2260_v59 = vadd.f32 %v2208_v61, %v5845_v47  ;;  %v2262_v22 = vadd.f32 %v2251_v46, %v5851_v20  ;;  %v5853_v61 = vld [vmem:[#allocation38_spill] sm:$0xff] }
 0x350   : > { %v2210_v49 = vpop.f32.mrf.mxu0  ;;  %v2253_v18 = vpop.f32.mrf.mxu1 }
 0x351   : > { %v2268_v50 = vmul.f32 0.5, %v2260_v59  ;;  %v2261_v4 = vadd.f32 %v2210_v49, %v5846_v55  ;;  %v2263_v56 = vadd.f32 %v2253_v18, %v5847_v17  ;;  %v2270_v24 = vmul.f32 0.5, %v2262_v22  ;;  %v2311_v18 = vpop.permute.xlu0 %2310  ;;  %v5854_v17 = vld [vmem:[#allocation39_spill] sm:$0xff] }
 0x352   : > { %v2212_v53 = vpop.f32.mrf.mxu0  ;;  %v2255_v16 = vpop.f32.mrf.mxu1  ;;  %vm2315_vm9 = vcmp.eq.s32.totalorder %v2311_v18, 1 }
 0x353   : > { %3664 = vtanh.f32 %v2268_v50  ;;  %v2269_v23 = vmul.f32 0.5, %v2261_v4  ;;  %v2264_v26 = vadd.f32 %v2212_v53, %v5848_v19  ;;  %v2266_v5 = vadd.f32 %v2255_v16, %v5852_v41  ;;  %v2314_v16 = vpop.permute.xlu1 %2313 }
 0x354   : > { %v2214_v32 = vpop.f32.mrf.mxu0  ;;  %v2257_v63 = vpop.f32.mrf.mxu1  ;;  %vm2316_vm10 = vcmp.eq.s32.totalorder %v2314_v16, 1 }
 0x355   : > { %3666 = vtanh.f32 %v2269_v23  ;;  %v2271_v43 = vmul.f32 0.5, %v2264_v26  ;;  %v2265_v12 = vadd.f32 %v2214_v32, %v5849_v0  ;;  %v2267_v27 = vadd.f32 %v2257_v63, %v5850_v2  ;;  %v5855_v63 = vld [vmem:[#allocation78_spill] sm:$0xff] }
 0x356   : > { %3668 = vtanh.f32 %v2263_v56  ;;  %v2273_v36 = vmul.f32 0.5, %v2266_v5 }
 0x357   : > { %3670 = vtanh.f32 %v2271_v43  ;;  %v2272_v1 = vmul.f32 0.5, %v2265_v12 }
 0x359   : > { %3672 = vtanh.f32 %v2272_v1 }
 0x35a   : > { %3674 = vtanh.f32 %v2267_v27  ;;  %v5856_v27 = vld [vmem:[#allocation80_spill] sm:$0xff] }
 0x35b   : > { %3676 = vtanh.f32 %v2270_v24  ;;  %v5857_v24 = vld [vmem:[#allocation81_spill] sm:$0xff] }
 0x35c   : > { %3678 = vtanh.f32 %v2273_v36 }
 0x360   : > { %v3665_v9 = vpop.eup %3664 }
 0x361   : > { %v2280_v31 = vmul.f32 0.5, %v3665_v9 }
 0x362   : > { %v3667_v44 = vpop.eup %3666 }
 0x363   : > { %v3669_v39 = vpop.eup %3668  ;;  %v2286_v52 = vadd.f32 0.5, %v2280_v31  ;;  %v2281_v3 = vmul.f32 0.5, %v3667_v44  ;;  %v5858_v44 = vld [vmem:[#allocation82_spill] sm:$0xff] }
 0x364   : > { %v3671_v34 = vpop.eup %3670 }
 0x365   : > { %v2287_v51 = vadd.f32 0.5, %v2281_v3  ;;  %v2296_v37 = vmul.f32 %v3669_v39, %v2286_v52  ;;  %v2283_v42 = vmul.f32 0.5, %v3671_v34 }
 0x366   : > { %v3673_v13 = vpop.eup %3672 }
 0x367   : > { %v2294_v47 = vmul.f32 %v2287_v51, %v5853_v61  ;;  %v2289_v46 = vadd.f32 0.5, %v2283_v42  ;;  %v2284_v59 = vmul.f32 0.5, %v3673_v13  ;;  %v3675_v49 = vpop.eup %3674  ;;  %v5859_v51 = vld [vmem:[#allocation84_spill] sm:$0xff] }
 0x368   : > { %v3677_v32 = vpop.eup %3676 }
 0x369   : > { %v2298_v50 = vadd.f32 %v2296_v37, %v2294_v47  ;;  %v2290_v55 = vadd.f32 0.5, %v2284_v59  ;;  %v2297_v4 = vmul.f32 %v3675_v49, %v2289_v46  ;;  %v2282_v22 = vmul.f32 0.5, %v3677_v32  ;;  %v3679_v52 = vpop.eup %3678  ;;  %v5860_v47 = vld [vmem:[#allocation85_spill] sm:$0xff] }
 0x36a   : > { %v2285_v13 = vmul.f32 0.5, %v3679_v52 }
 0x36b   : > { %3680 = vtanh.f32 %v2298_v50  ;;  %v2295_v56 = vmul.f32 %v2290_v55, %v5854_v17  ;;  %v5335_v53 = vsel %vm2315_vm9, %v2298_v50, %v5853_v61  ;;  %v2288_v42 = vadd.f32 0.5, %v2282_v22  ;;  %v5861_v50 = vld [vmem:[#allocation79_spill] sm:$0xff] }
 0x36d   : > { %v2299_v23 = vadd.f32 %v2297_v4, %v2295_v56  ;;  %v2291_v4 = vadd.f32 0.5, %v2285_v13 }
 0x36e   : > { %v2380_v19 = vpop.f32.mrf.mxu0  ;;  %v2423_v26 = vpop.f32.mrf.mxu1 }
 0x36f   : > { %3682 = vtanh.f32 %v2299_v23  ;;  %v2432_v43 = vadd.f32 %v2380_v19, %v5855_v63  ;;  %v5340_v0 = vsel %vm2316_vm10, %v2299_v23, %v5854_v17  ;;  %v2434_v55 = vadd.f32 %v2423_v26, %v5861_v50  ;;  %v5862_v19 = vld [vmem:[#allocation83_spill] sm:$0xff]  ;;  %v5873_v50 = vld [vmem:[#allocation52_spill] sm:$0xff] }
 0x370   : > { %v2382_v12 = vpop.f32.mrf.mxu0  ;;  %v2425_v1 = vpop.f32.mrf.mxu1 }
 0x371   : > { %v2440_v2 = vmul.f32 0.5, %v2432_v43  ;;  %v2433_v20 = vadd.f32 %v2382_v12, %v5856_v27  ;;  %v2435_v41 = vadd.f32 %v2425_v1, %v5857_v24  ;;  %v2442_v23 = vmul.f32 0.5, %v2434_v55 }
 0x372   : > { %v2384_v5 = vpop.f32.mrf.mxu0  ;;  %v2427_v9 = vpop.f32.mrf.mxu1 }
 0x373   : > { %3684 = vtanh.f32 %v2440_v2  ;;  %v2441_v31 = vmul.f32 0.5, %v2433_v20  ;;  %v2436_v39 = vadd.f32 %v2384_v5, %v5858_v44  ;;  %v2438_v32 = vadd.f32 %v2427_v9, %v5862_v19 }
 0x374   : > { %v2386_v3 = vpop.f32.mrf.mxu0  ;;  %v2429_v36 = vpop.f32.mrf.mxu1 }
 0x375   : > { %3686 = vtanh.f32 %v2441_v31  ;;  %v2443_v34 = vmul.f32 0.5, %v2436_v39  ;;  %v2437_v37 = vadd.f32 %v2386_v3, %v5859_v51  ;;  %v2439_v46 = vadd.f32 %v2429_v36, %v5860_v47  ;;  %v5864_v36 = vld [vmem:[#allocation41_spill] sm:$0xff] }
 0x376   : > { %3688 = vtanh.f32 %v2435_v41 }
 0x377   : > { %3690 = vtanh.f32 %v2443_v34  ;;  %v2444_v61 = vmul.f32 0.5, %v2437_v37  ;;  %v5866_v34 = vld [vmem:[#allocation43_spill] sm:$0xff]  ;;  %v5868_v37 = vld [vmem:[#allocation45_spill] sm:$0xff] }
 0x378   : > { %v3681_v59 = vpop.eup %3680 }
 0x379   : > { %3692 = vtanh.f32 %v2444_v61  ;;  %v2302_v49 = vmul.f32 %v3681_v59, %v2288_v42  ;;  %v5870_v61 = vld [vmem:[#allocation48_spill] sm:$0xff] }
 0x37a   : > { %3694 = vtanh.f32 %v2439_v46  ;;  %v5872_v46 = vld [vmem:[#allocation50_spill] sm:$0xff] }
 0x37b   : > { %v5351_v63 = vsel %vm2315_vm9, %v2302_v49, %v5155_v54  ;;  %v2321_v12 = vsel %vm2315_vm9, %v2302_v49, 0.0  ;;  %3696 = vtanh.f32 %v2442_v23  ;;  %v5876_v23 = vld [vmem:[#allocation51_spill] sm:$0xff] }
 0x37c   : > { %v3683_v17 = vpop.eup %3682 }
 0x37d   : > { %v2303_v56 = vmul.f32 %v3683_v17, %v2291_v4  ;;  %v5874_v4 = vld [vmem:[#allocation53_spill] sm:$0xff]  ;;  %v5875_v17 = vld [vmem:[#allocation47_spill] sm:$0xff] }
 0x37f   : > { %v5355_v43 = vsel %vm2316_vm10, %v2303_v56, %v5159_v11  ;;  %v2322_v26 = vsel %vm2316_vm10, %v2303_v56, 0.0  ;;  %v2445_v11 = vmul.f32 0.5, %v2438_v32 }
 0x380   : > { %v3685_v1 = vpop.eup %3684  ;;  %v3318_v2 = vpack.c.bf16 %v2322_v26, %v2321_v12  ;;  %v2517_v27 = vpack.c.bf16 %v5355_v43, %v5351_v63 }
 0x381   : > { %v2452_v20 = vmul.f32 0.5, %v3685_v1  ;;  %3698 = vtanh.f32 %v2445_v11 }
 0x382   : > { %v3687_v22 = vpop.eup %3686  ;;  %3338 = vst [vmem:[%s4339_s15 + $0x10] sm:$0xff] %v3318_v2   ;;  %2551 = vmatmul.mubr.bf16.vlgmr.msra.gmra.mxu0 %v2517_v27  ;;  %2594 = vmatmul.mubr.bf16.vlgmr.msra.gmra.mxu1 %v2517_v27  ;;  %v5877_v2 = vld [vmem:[#allocation62_spill] sm:$0xff] }
 0x383   : > { %v3689_v54 = vpop.eup %3688  ;;  %v2458_v24 = vadd.f32 0.5, %v2452_v20  ;;  %v2453_v41 = vmul.f32 0.5, %v3687_v22  ;;  %2690 = vmatpush1.bf16.msra.mxu0 %v5166_v58  ;;  %2733 = vmatpush1.bf16.msra.mxu1 %v5169_v35 }
 0x384   : > { %v3691_v18 = vpop.eup %3690  ;;  %2691 = vmatprep.subr.bf16.mxu0 %v5172_v7  ;;  %2734 = vmatprep.subr.bf16.mxu1 %v5175_v8  ;;  %v2483_v7 = vpop.permute.xlu0 %2482 }
 0x385   : > { %v2459_v16 = vadd.f32 0.5, %v2453_v41  ;;  %v2468_v5 = vmul.f32 %v3689_v54, %v2458_v24  ;;  %v2455_v9 = vmul.f32 0.5, %v3691_v18  ;;  %2721 = vmatprep.mubr.bf16.mxu0 %v5744_v62  ;;  %2764 = vmatprep.mubr.bf16.mxu1 %v5744_v62  ;;  %vm2487_vm11 = vcmp.eq.s32.totalorder %v2483_v7, 1  ;;  %v5879_v24 = vld [vmem:[#allocation65_spill] sm:$0xff] }
 0x386   : > { %v3693_v31 = vpop.eup %3692 }
 0x387   : > { %v2466_v44 = vmul.f32 %v2459_v16, %v5206_v33  ;;  %v2461_v39 = vadd.f32 0.5, %v2455_v9  ;;  %v2456_v58 = vmul.f32 0.5, %v3693_v31  ;;  %2692 = vmatpush1.bf16.msra.mxu0 %v5181_v29  ;;  %2735 = vmatpush1.bf16.msra.mxu1 %v5184_v38  ;;  %v3695_v35 = vpop.eup %3694  ;;  %v2486_v38 = vpop.permute.xlu1 %2485 }
 0x388   : > { %2693 = vmatprep.subr.bf16.mxu0 %v5187_v21  ;;  %2736 = vmatprep.subr.bf16.mxu1 %v5190_v28  ;;  %vm2488_vm12 = vcmp.eq.s32.totalorder %v2486_v38, 1  ;;  %v5863_v28 = vld [vmem:[#allocation40_spill] sm:$0xff] }
 0x389   : > { %v2470_v8 = vadd.f32 %v2468_v5, %v2466_v44  ;;  %v2462_v52 = vadd.f32 0.5, %v2456_v58  ;;  %v2469_v3 = vmul.f32 %v3695_v35, %v2461_v39  ;;  %v5880_v5 = vld [vmem:[#allocation66_spill] sm:$0xff]  ;;  %v5881_v58 = vld [vmem:[#allocation68_spill] sm:$0xff] }
 0x38b   : > { %3700 = vtanh.f32 %v2470_v8  ;;  %v2467_v62 = vmul.f32 %v2462_v52, %v5222_v45  ;;  %2694 = vmatpush1.bf16.msra.mxu0 %v5197_v30  ;;  %2737 = vmatpush1.bf16.msra.mxu1 %v5200_v10  ;;  %v5378_v29 = vsel %vm2487_vm11, %v2470_v8, %v5206_v33  ;;  %v3697_v10 = vpop.eup %3696  ;;  %v5865_v33 = vld [vmem:[#allocation42_spill] sm:$0xff]  ;;  %v5882_v8 = vld [vmem:[#allocation69_spill] sm:$0xff] }
 0x38c   : > { %2695 = vmatprep.subr.bf16.mxu0 %v5208_v57  ;;  %2738 = vmatprep.subr.bf16.mxu1 %v5211_v40  ;;  %v2454_v57 = vmul.f32 0.5, %v3697_v10  ;;  %v5867_v40 = vld [vmem:[#allocation44_spill] sm:$0xff] }
 0x38d   : > { %v2471_v21 = vadd.f32 %v2469_v3, %v2467_v62  ;;  %v5883_v3 = vld [vmem:[#allocation63_spill] sm:$0xff] }
 0x38e   : > { %v3699_v51 = vpop.eup %3698  ;;  %v2460_v42 = vadd.f32 0.5, %v2454_v57 }
 0x38f   : > { %3702 = vtanh.f32 %v2471_v21  ;;  %2696 = vmatpush1.bf16.msra.mxu0 %v5214_v48  ;;  %2739 = vmatpush1.bf16.msra.mxu1 %v5863_v28  ;;  %v5386_v30 = vsel %vm2488_vm12, %v2471_v21, %v5222_v45  ;;  %v5869_v48 = vld [vmem:[#allocation46_spill] sm:$0xff]  ;;  %v2457_v13 = vmul.f32 0.5, %v3699_v51  ;;  %v5871_v45 = vld [vmem:[#allocation49_spill] sm:$0xff]  ;;  %v5884_v21 = vld [vmem:[#allocation67_spill] sm:$0xff] }
 0x390   : > { %2697 = vmatprep.subr.bf16.mxu0 %v5864_v36  ;;  %2740 = vmatprep.subr.bf16.mxu1 %v5865_v33  ;;  %v5425_v36 = vpop.permute.xlu0 %2825 }
 0x391   : > { %v2463_v49 = vadd.f32 0.5, %v2457_v13 }
 0x393   : > { %2698 = vmatpush1.bf16.msra.mxu0 %v5866_v34  ;;  %2741 = vmatpush1.bf16.msra.mxu1 %v5867_v40 }
 0x394   : > { %2699 = vmatprep.subr.bf16.mxu0 %v5868_v37  ;;  %2742 = vmatprep.subr.bf16.mxu1 %v5869_v48 }
 0x397   : > { %2700 = vmatpush1.bf16.msra.mxu0 %v5870_v61  ;;  %2743 = vmatpush1.bf16.msra.mxu1 %v5871_v45 }
 0x398   : > { %v3701_v47 = vpop.eup %3700  ;;  %2701 = vmatprep.subr.bf16.mxu0 %v5872_v46  ;;  %2744 = vmatprep.subr.bf16.mxu1 %v5251_v60  ;;  %v5429_v46 = vpop.permute.xlu0 %2654 }
 0x399   : > { %v2474_v59 = vmul.f32 %v3701_v47, %v2460_v42  ;;  %v5427_v42 = vpop.permute.xlu1 %2828  ;;  %vm2659_vm13 = vcmp.eq.s32.totalorder %v5429_v46, 1 }
 0x39b   : > { %2702 = vmatpush1.bf16.msra.mxu0 %v5254_v6  ;;  %2745 = vmatpush1.bf16.msra.mxu1 %v5873_v50  ;;  %v5406_v60 = vsel %vm2487_vm11, %v2474_v59, %v5275_v15  ;;  %v2493_v6 = vsel %vm2487_vm11, %v2474_v59, 0.0 }
 0x39c   : > { %v3703_v55 = vpop.eup %3702  ;;  %2703 = vmatprep.subr.bf16.mxu0 %v5874_v4  ;;  %2746 = vmatprep.subr.bf16.mxu1 %v5875_v17 }
 0x39d   : > { %v2475_v56 = vmul.f32 %v3703_v55, %v2463_v49 }
 0x39f   : > { %2704 = vmatpush1.bf16.msra.mxu0 %v5876_v23  ;;  %2747 = vmatpush1.bf16.msra.mxu1 %v5269_v25  ;;  %v5410_v19 = vsel %vm2488_vm12, %v2475_v56, %v5279_v14  ;;  %v2494_v32 = vsel %vm2488_vm12, %v2475_v56, 0.0  ;;  %v5878_v14 = vld [vmem:[#allocation64_spill] sm:$0xff]  ;;  %v5433_v23 = vpop.permute.xlu1 %2657 }
 0x3a0   : > { %v3323_v12 = vpack.c.bf16 %v2494_v32, %v2493_v6  ;;  %v2688_v26 = vpack.c.bf16 %v5410_v19, %v5406_v60  ;;  %vm2660_vm14 = vcmp.eq.s32.totalorder %v5433_v23, 1 }
 0x3a2   : > { %3339 = vst [vmem:[%s4341_s19 + $0x8] sm:$0xff] %v3323_v12   ;;  %2722 = vmatmul.mubr.bf16.vlgmr.msra.gmra.mxu0 %v2688_v26  ;;  %2765 = vmatmul.mubr.bf16.vlgmr.msra.gmra.mxu1 %v2688_v26 }
 0x442   : > { %v2552_v25 = vpop.f32.mrf.mxu0  ;;  %v2595_v1 = vpop.f32.mrf.mxu1 }
 0x443   : > { %v2604_v15 = vadd.f32 %v2552_v25, %v5877_v2  ;;  %v2606_v62 = vadd.f32 %v2595_v1, %v5883_v3  ;;  %v5885_v2 = vld [vmem:[#allocation70_spill] sm:$0xff] }
 0x444   : > { %v2554_v27 = vpop.f32.mrf.mxu0  ;;  %v2597_v20 = vpop.f32.mrf.mxu1 }
 0x445   : > { %v2612_v22 = vmul.f32 0.5, %v2604_v15  ;;  %v2605_v54 = vadd.f32 %v2554_v27, %v5878_v14  ;;  %v2607_v41 = vadd.f32 %v2597_v20, %v5879_v24  ;;  %v2614_v38 = vmul.f32 0.5, %v2606_v62  ;;  %v5886_v14 = vld [vmem:[#allocation72_spill] sm:$0xff] }
 0x446   : > { %v2556_v11 = vpop.f32.mrf.mxu0  ;;  %v2599_v18 = vpop.f32.mrf.mxu1 }
 0x447   : > { %3704 = vtanh.f32 %v2612_v22  ;;  %v2613_v16 = vmul.f32 0.5, %v2605_v54  ;;  %v2608_v9 = vadd.f32 %v2556_v11, %v5880_v5  ;;  %v2610_v28 = vadd.f32 %v2599_v18, %v5884_v21 }
 0x448   : > { %v2558_v31 = vpop.f32.mrf.mxu0  ;;  %v2601_v44 = vpop.f32.mrf.mxu1 }
 0x449   : > { %3706 = vtanh.f32 %v2613_v16  ;;  %v2615_v39 = vmul.f32 0.5, %v2608_v9  ;;  %v2609_v35 = vadd.f32 %v2558_v31, %v5881_v58  ;;  %v2611_v52 = vadd.f32 %v2601_v44, %v5882_v8 }
 0x44a   : > { %3708 = vtanh.f32 %v2607_v41  ;;  %v2617_v37 = vmul.f32 0.5, %v2610_v28 }
 0x44b   : > { %3710 = vtanh.f32 %v2615_v39  ;;  %v2616_v7 = vmul.f32 0.5, %v2609_v35 }
 0x44d   : > { %3712 = vtanh.f32 %v2616_v7 }
 0x44e   : > { %3714 = vtanh.f32 %v2611_v52 }
 0x44f   : > { %3716 = vtanh.f32 %v2614_v38 }
 0x450   : > { %3718 = vtanh.f32 %v2617_v37 }
 0x454   : > { %v3705_v10 = vpop.eup %3704 }
 0x455   : > { %v2624_v33 = vmul.f32 0.5, %v3705_v10 }
 0x456   : > { %v3707_v57 = vpop.eup %3706 }
 0x457   : > { %v3709_v34 = vpop.eup %3708  ;;  %v2630_v40 = vadd.f32 0.5, %v2624_v33  ;;  %v2625_v51 = vmul.f32 0.5, %v3707_v57 }
 0x458   : > { %v3711_v48 = vpop.eup %3710 }
 0x459   : > { %v2631_v13 = vadd.f32 0.5, %v2625_v51  ;;  %v2627_v61 = vmul.f32 0.5, %v3711_v48  ;;  %v2640_v45 = vmul.f32 %v3709_v34, %v2630_v40 }
 0x45a   : > { %v3713_v47 = vpop.eup %3712 }
 0x45b   : > { %v2638_v59 = vmul.f32 %v2631_v13, %v5335_v53  ;;  %v2633_v49 = vadd.f32 0.5, %v2627_v61  ;;  %v2628_v50 = vmul.f32 0.5, %v3713_v47  ;;  %v3715_v55 = vpop.eup %3714 }
 0x45c   : > { %v3717_v1 = vpop.eup %3716 }
 0x45d   : > { %v2634_v4 = vadd.f32 0.5, %v2628_v50  ;;  %v2641_v17 = vmul.f32 %v3715_v55, %v2633_v49  ;;  %v2642_v56 = vadd.f32 %v2640_v45, %v2638_v59 }
 0x45f   : > { %v2639_v6 = vmul.f32 %v2634_v4, %v5340_v0  ;;  %3720 = vtanh.f32 %v2642_v56  ;;  %v2661_v32 = vsel %vm2659_vm13, %v2642_v56, %v5335_v53 }
 0x460   : > { %2850 = vst [vmem:[#allocation13] sm:$0xff] %v2661_v32 }
 0x461   : > { %v2643_v12 = vadd.f32 %v2641_v17, %v2639_v6 }
 0x462   : > { %v2723_v26 = vpop.f32.mrf.mxu0  ;;  %v2766_v25 = vpop.f32.mrf.mxu1 }
 0x463   : > { %v2775_v15 = vadd.f32 %v2723_v26, %v5885_v2  ;;  %3722 = vtanh.f32 %v2643_v12  ;;  %v2662_v27 = vsel %vm2660_vm14, %v2643_v12, %v5340_v0 }
 0x464   : > { %v2725_v20 = vpop.f32.mrf.mxu0  ;;  %v2768_v53 = vpop.f32.mrf.mxu1  ;;  %2851 = vst [vmem:[#allocation13 + $0x8] sm:$0xff] %v2662_v27 }
 0x465   : > { %v2783_v22 = vmul.f32 0.5, %v2775_v15  ;;  %v2776_v54 = vadd.f32 %v2725_v20, %v5886_v14 }
 0x466   : > { %3873 = shalt.err (!%p3870_p1)
}
 0x467   : > { %s5706_s18 = smov 128   ;;  %s4100_s30 = smov 8   ;;  %v2626_v0 = vmul.f32 0.5, %v3717_v1  ;;  %v5889_v24 = vld [vmem:[#allocation73_spill] sm:$0xff]  ;;  %v2727_v11 = vpop.f32.mrf.mxu0  ;;  %v2770_v18 = vpop.f32.mrf.mxu1  ;;  %3724 = vtanh.f32 %v2783_v22  ;;  %v2784_v16 = vmul.f32 0.5, %v2776_v54  ;;  %v5890_v5 = vld [vmem:[#allocation74_spill] sm:$0xff] }
 0x468   : > { %p5888_p4 = pmov %p5887_p7  ;;  %v2778_v41 = vadd.f32 %v2768_v53, %v5889_v24  ;;  %v2779_v9 = vadd.f32 %v2727_v11, %v5890_v5  ;;  %v3719_v31 = vpop.eup %3718  ;;  %v5891_v35 = vld [vmem:[#allocation76_spill] sm:$0xff]  ;;  %v5892_v62 = vld [vmem:[#allocation77_spill] sm:$0xff]  ;;  %v5893_v10 = vld [vmem:[#allocation71_spill] sm:$0xff]  ;;  %s3293_s16 = sshll.u32 %s4219_s20, 9 }
 0x469   : > { %v2729_v44 = vpop.f32.mrf.mxu0  ;;  %v2772_v39 = vpop.f32.mrf.mxu1  ;;  %3726 = vtanh.f32 %v2784_v16  ;;  %v2632_v8 = vadd.f32 0.5, %v2626_v0  ;;  %v2629_v52 = vmul.f32 0.5, %v3719_v31  ;;  %v2777_v33 = vadd.f32 %v2766_v25, %v5893_v10  ;;  %s2875_s23 = sshll.u32 %s4339_s15, 4  ;;  %v5894_v48 = vld [vmem:[#allocation75_spill] sm:$0xff]  ;;  %s5476_s11 = scalar_lea.hbm %s5653_s9, %s3293_s16  ;;  %s5478_s23 = int_to_ptr.vmem [resolvable:$true] %s2875_s23 }
 0x46a   : > { %3354 = dma.vmem_to_hbm [thread:$0]  (%p5888_p4), %s2919_s7, 256, %s5656_s12, [#allocation14], %s5706_s18, %s5706_s18, %s4100_s30   ;;  %v2786_v58 = vmul.f32 0.5, %v2779_v9  ;;  %v2780_v7 = vadd.f32 %v2729_v44, %v5891_v35  ;;  %3728 = vtanh.f32 %v2778_v41  ;;  %v2782_v38 = vadd.f32 %v2772_v39, %v5892_v62 }
 0x46b   : > { %v2635_v57 = vadd.f32 0.5, %v2629_v52  ;;  %v2785_v37 = vmul.f32 0.5, %v2777_v33  ;;  %v2781_v13 = vadd.f32 %v2770_v18, %v5894_v48  ;;  %s5895_s25 = sand.u32 1, %s4082_s17   ;;  %s3884_s4 = scalar_lea.vmem %s5478_s23, 512 }
 0x46c   : > { %3730 = vtanh.f32 %v2786_v58  ;;  %v2787_v3 = vmul.f32 0.5, %v2780_v7  ;;  %v3721_v21 = vpop.eup %3720  ;;  %s5483_s7 = scalar_lea.sflag [#allocation6], %s5895_s25  ;;  %p3885_p6 = scmp.ne.s32.totalorder %s5478_s23, %s3884_s4 }
 0x46d   : > { %v2646_v28 = vmul.f32 %v3721_v21, %v2632_v8  ;;  %v2788_v4 = vmul.f32 0.5, %v2781_v13  ;;  %s4101_s22 = smov [#allocation9]  }
 0x46e   : > { %3732 = vtanh.f32 %v2787_v3  ;;  %p3886_p11 = pnand %p3885_p6, %p4244_p5  ;;  %s3888_s28 = sshll.u32 %s4101_s22, 4  ;;  %s3889_s28 = int_to_ptr.vmem [resolvable:$false] %s3888_s28 }
 0x46f   : > { %3734 = vtanh.f32 %v2782_v38  ;;  %v2663_v34 = vsel %vm2659_vm13, %v2646_v28, %v5351_v63  ;;  %v2665_v61 = vsel %vm2659_vm13, %v2646_v28, 0.0  ;;  %s3890_s16 = scalar_lea.vmem %s3889_s28, 1024  ;;  %p3891_p8 = scmp.lt.s32.totalorder %s5478_s23, %s3889_s28 }
 0x470   : > { %v3723_v40 = vpop.eup %3722  ;;  %2848 = vst [vmem:[#allocation12] sm:$0xff] %v2663_v34  ;;  %3736 = vtanh.f32 %v2785_v37  ;;  %p3887_p3 = pneg %p3886_p11  ;;  %p3892_p13 = scmp.lt.s32.totalorder %s3890_s16, %s3884_s4 }
 0x471   : > { %v2647_v51 = vmul.f32 %v3723_v40, %v2635_v57 }
 0x472   : > { %p3893_p7 = por %p3892_p13, %p3891_p8 }
 0x473   : > { %v2666_v45 = vsel %vm2660_vm14, %v2647_v51, 0.0  ;;  %v2664_v63 = vsel %vm2660_vm14, %v2647_v51, %v5355_v43 }
 0x474   : > { %v3725_v47 = vpop.eup %3724  ;;  %v3328_v59 = vpack.c.bf16 %v2666_v45, %v2665_v61  ;;  %2849 = vst [vmem:[#allocation12 + $0x8] sm:$0xff] %v2664_v63  ;;  %p3894_p9 = pnand %p3893_p7, %p3887_p3 }
 0x475   : > { %v2795_v46 = vmul.f32 0.5, %v3725_v47 }
 0x476   : > { %v3727_v49 = vpop.eup %3726  ;;  %3340 = vst [vmem:[%s4339_s15 + $0x18] sm:$0xff] %v3328_v59  }
 0x477   : > { %v3729_v50 = vpop.eup %3728  ;;  %v2801_v55 = vadd.f32 0.5, %v2795_v46  ;;  %v2796_v43 = vmul.f32 0.5, %v3727_v49 }
 0x478   : > { %3897 = shalt.err (!%p3894_p9)
}
 0x479   : > { %s3898_s15 = scalar_lea.hbm %s5476_s11, 512  ;;  %s3902_s25 = scalar_lea.hbm %s5653_s9, 1024 }
 0x47a   : > { %p3899_p10 = scmp.ne.s32.totalorder %s5476_s11, %s3898_s15  ;;  %p3903_p0 = scmp.lt.s32.totalorder %s5476_s11, %s5653_s9 }
 0x47b   : > { %p3904_p1 = scmp.lt.s32.totalorder %s3902_s25, %s3898_s15 }
 0x47c   : > { %p3900_p2 = pnand %p3899_p10, %p4244_p5 }
 0x47d   : > { %p3905_p4 = por %p3904_p1, %p3903_p0 }
 0x47e   : > { %p3901_p12 = pneg %p3900_p2 }
 0x480   : > { %p3906_p6 = pnand %p3905_p4, %p3901_p12 }
 0x482   : > { %3909 = shalt.err (!%p3906_p6)
}
 0x483   : > { %s5708_s4 = smov 64   ;;  %s4103_s28 = smov 4   ;;  %v3731_v17 = vpop.eup %3730  ;;  %v2802_v56 = vadd.f32 0.5, %v2796_v43  ;;  %v2811_v23 = vmul.f32 %v3729_v50, %v2801_v55  ;;  %3738 = vtanh.f32 %v2788_v4  ;;  %vm2830_vm15 = vcmp.eq.s32.totalorder %v5425_v36, 1 }
 0x484   : > { %3349 = dma.vmem_to_hbm [thread:$0]  (%p4244_p5), %s5478_s23, 512, %s5476_s11, %s5483_s7, %s5708_s4, %s5708_s4, %s4103_s28   ;;  %v2798_v6 = vmul.f32 0.5, %v3731_v17  ;;  %v3733_v32 = vpop.eup %3732  ;;  %vm2831_vm0 = vcmp.eq.s32.totalorder %v5427_v42, 1 }
 0x485   : > { %v2809_v12 = vmul.f32 %v2802_v56, %v5378_v29  ;;  %v2799_v25 = vmul.f32 0.5, %v3733_v32  ;;  %v3735_v1 = vpop.eup %3734  ;;  %s4104_s27 = smov [#allocation16]   ;;  %p5896_p11 = scmp.eq.s32.totalorder %s4219_s20, 1 }
 0x486   : > { %v2804_v26 = vadd.f32 0.5, %v2798_v6  ;;  %s2944_s18 = sshll.u32 %s4104_s27, 4  ;;  %v3737_v54 = vpop.eup %3736  ;;  %s2945_s18 = int_to_ptr.vmem [resolvable:$true] %s2944_s18 }
 0x487   : > { %v2813_v2 = vadd.f32 %v2811_v23, %v2809_v12  ;;  %v2805_v15 = vadd.f32 0.5, %v2799_v25  ;;  %s3910_s23 = scalar_lea.vmem %s2945_s18, 256  ;;  %p3917_p13 = scmp.lt.s32.totalorder %s2945_s18, %s2945_s18 }
 0x488   : > { %v2812_v27 = vmul.f32 %v3735_v1, %v2804_v26  ;;  %p3911_p5 = scmp.ne.s32.totalorder %s2945_s18, %s3910_s23  ;;  %p3918_p7 = scmp.lt.s32.totalorder %s3910_s23, %s3910_s23 }
 0x489   : > { %3740 = vtanh.f32 %v2813_v2  ;;  %v2810_v20 = vmul.f32 %v2805_v15, %v5386_v30  ;;  %v2832_v53 = vsel %vm2830_vm15, %v2813_v2, %v5378_v29 }
 0x48a   : > { %2854 = vst [vmem:[#allocation16] sm:$0xff] %v2832_v53  ;;  %p3912_p3 = pnand %p3911_p5, %p5896_p11  ;;  %p3919_p9 = por %p3918_p7, %p3917_p13 }
 0x48b   : > { %v2814_v22 = vadd.f32 %v2812_v27, %v2810_v20 }
 0x48c   : > { %p3913_p8 = pneg %p3912_p3 }
 0x48d   : > { %3742 = vtanh.f32 %v2814_v22  ;;  %v2833_v14 = vsel %vm2831_vm0, %v2814_v22, %v5386_v30 }
 0x48e   : > { %2855 = vst [vmem:[#allocation16 + $0x8] sm:$0xff] %v2833_v14  ;;  %p3920_p10 = pnand %p3919_p9, %p3913_p8 }
 0x490   : > { %3923 = shalt.err (!%p3920_p10)
}
 0x491   : > { %p5897_p2 = pmov %p5896_p11  ;;  %s5898_s11 = smov 128   ;;  %v2797_v29 = vmul.f32 0.5, %v3737_v54  ;;  %v3739_v30 = vpop.eup %3738 }
 0x492   : > { %v2800_v24 = vmul.f32 0.5, %v3739_v30  ;;  %s4105_s15 = smov [#allocation15]   ;;  %s2861_s24 = sand.u32 1, %s4219_s20  }
 0x493   : > { %3358 = dma.vmem_to_hbm [thread:$0]  (%p5897_p2), %s2945_s18, 256, %s5658_s14, [#allocation17], %s5898_s11, %s5898_s11, %s4100_s30   ;;  %v2803_v0 = vadd.f32 0.5, %v2797_v29 }
 0x494   : > { %v2806_v18 = vadd.f32 0.5, %v2800_v24  ;;  %s2931_s21 = sshll.u32 %s4105_s15, 4  ;;  %s3294_s25 = sshll.u32 %s4326_s29, 9  ;;  %s2932_s21 = int_to_ptr.vmem [resolvable:$true] %s2931_s21 }
 0x495   : > { %s2892_s22 = sshll.u32 %s4341_s19, 4  ;;  %s4106_s27 = smov [#allocation12]   ;;  %s5547_s22 = int_to_ptr.vmem [resolvable:$true] %s2892_s22 }
 0x496   : > { %v3741_v41 = vpop.eup %3740  ;;  %s2905_s18 = sshll.u32 %s4106_s27, 4  ;;  %s5542_s16 = scalar_lea.hbm %s5654_s10, %s3294_s25  ;;  %s5549_s18 = int_to_ptr.vmem [resolvable:$true] %s2905_s18 }
 0x497   : > { %v2817_v11 = vmul.f32 %v3741_v41, %v2803_v0  ;;  %s3934_s29 = scalar_lea.vmem %s2932_s21, 256  ;;  %p5899_p0 = pmov %p5897_p2 }
 0x498   : > { %p3935_p12 = scmp.ne.s32.totalorder %s2932_s21, %s3934_s29  ;;  %p3941_p6 = scmp.lt.s32.totalorder %s2932_s21, %s2932_s21 }
 0x499   : > { %v2834_v16 = vsel %vm2830_vm15, %v2817_v11, %v5406_v60  ;;  %v2836_v31 = vsel %vm2830_vm15, %v2817_v11, 0.0  ;;  %p3942_p5 = scmp.lt.s32.totalorder %s3934_s29, %s3934_s29 }
 0x49a   : > { %v3743_v5 = vpop.eup %3742  ;;  %2852 = vst [vmem:[#allocation15] sm:$0xff] %v2834_v16  ;;  %p3936_p1 = pnand %p3935_p12, %p5899_p0 }
 0x49b   : > { %v2818_v9 = vmul.f32 %v3743_v5, %v2806_v18  ;;  %p3943_p11 = por %p3942_p5, %p3941_p6 }
 0x49c   : > { %p3937_p4 = pneg %p3936_p1 }
 0x49d   : > { %v2837_v44 = vsel %vm2831_vm0, %v2818_v9, 0.0  ;;  %v2835_v60 = vsel %vm2831_vm0, %v2818_v9, %v5410_v19 }
 0x49e   : > { %v3333_v39 = vpack.c.bf16 %v2837_v44, %v2836_v31  ;;  %2853 = vst [vmem:[#allocation15 + $0x8] sm:$0xff] %v2835_v60  ;;  %p3944_p3 = pnand %p3943_p11, %p3937_p4 }
 0x4a0   : > { %3947 = shalt.err (!%p3944_p3)
}
 0x4a1   : > { %p5900_p8 = pmov %p5899_p0  ;;  %3334 = vst [vmem:[%s4341_s19] sm:$0xff] %v3333_v39   ;;  %s2862_s27 = scalar_lea.sflag [#allocation11], %s2861_s24 }
 0x4a2   : > { %s3958_s23 = scalar_lea.vmem %s5547_s22, 512  ;;  %p5901_p7 = scmp.ne.s32.totalorder %s5724_s26, 0 }
 0x4a3   : > { %3356 = dma.vmem_to_hbm [thread:$0]  (%p5900_p8), %s2932_s21, 256, %s5657_s13, [#allocation14], %s5898_s11, %s5898_s11, %s4100_s30  }
 0x4a4   : > { %p3959_p13 = scmp.ne.s32.totalorder %s5547_s22, %s3958_s23  ;;  %s4107_s7 = smov [#allocation10]  }
 0x4a5   : > { %s3962_s29 = sshll.u32 %s4107_s7, 4  ;;  %s3963_s29 = int_to_ptr.vmem [resolvable:$false] %s3962_s29 }
 0x4a6   : > { %p3960_p9 = pnand %p3959_p13, %p5901_p7  ;;  %s3964_s4 = scalar_lea.vmem %s3963_s29, 1024 }
 0x4a7   : > { %p3965_p2 = scmp.lt.s32.totalorder %s5547_s22, %s3963_s29  ;;  %p3966_p12 = scmp.lt.s32.totalorder %s3964_s4, %s3958_s23 }
 0x4a8   : > { %p3961_p10 = pneg %p3960_p9 }
 0x4a9   : > { %p3967_p0 = por %p3966_p12, %p3965_p2 }
 0x4ab   : > { %p3968_p1 = pnand %p3967_p0, %p3961_p10 }
 0x4ad   : > { %3971 = shalt.err (!%p3968_p1)
}
 0x4ae   : > { %s3972_s19 = scalar_lea.hbm %s5542_s16, 512  ;;  %s3976_s15 = scalar_lea.hbm %s5654_s10, 1024 }
 0x4af   : > { %p3973_p4 = scmp.ne.s32.totalorder %s5542_s16, %s3972_s19  ;;  %p3977_p11 = scmp.lt.s32.totalorder %s5542_s16, %s5654_s10 }
 0x4b0   : > { %p3978_p3 = scmp.lt.s32.totalorder %s3976_s15, %s3972_s19 }
 0x4b1   : > { %p3974_p6 = pnand %p3973_p4, %p5901_p7 }
 0x4b2   : > { %p3979_p8 = por %p3978_p3, %p3977_p11 }
 0x4b3   : > { %p3975_p5 = pneg %p3974_p6 }
 0x4b5   : > { %p3980_p13 = pnand %p3979_p8, %p3975_p5 }
 0x4b7   : > { %3983 = shalt.err (!%p3980_p13)
}
 0x4b8   : > { %s5902_s4 = smov 64   ;;  %s3984_s23 = scalar_lea.vmem %s5549_s18, 256 }
 0x4b9   : > { %3350 = dma.vmem_to_hbm [thread:$0]  (%p5901_p7), %s5547_s22, 512, %s5542_s16, %s2862_s27, %s5902_s4, %s5902_s4, %s4103_s28  }
 0x4ba   : > { %p3985_p9 = scmp.ne.s32.totalorder %s5549_s18, %s3984_s23  ;;  %p5903_p10 = scmp.eq.s32.totalorder %s4219_s20, 1 }
 0x4bb   : > { %p3991_p0 = scmp.lt.s32.totalorder %s5549_s18, %s5549_s18  ;;  %p3992_p1 = scmp.lt.s32.totalorder %s3984_s23, %s3984_s23 }
 0x4bc   : > { %p3986_p2 = pnand %p3985_p9, %p5903_p10 }
 0x4bd   : > { %p3993_p4 = por %p3992_p1, %p3991_p0 }
 0x4be   : > { %p3987_p12 = pneg %p3986_p2 }
 0x4c0   : > { %p3994_p6 = pnand %p3993_p4, %p3987_p12 }
 0x4c2   : > { %3997 = shalt.err (!%p3994_p6)
}
 0x4c3   : > { %p5904_p5 = pmov %p5903_p10  ;;  %s5905_s19 = sld [smem:[#allocation96_spill]] }
 0x4c5   : > { %p5906_p7 = pmov %p5904_p5 }
 0x4c9   : > { %3352 = dma.vmem_to_hbm [thread:$0]  (%p5904_p5), %s5549_s18, 256, %s5905_s19, [#allocation11], %s5898_s11, %s5898_s11, %s4100_s30  }
 0x4ca   : > { %4045 = dma.done.wait (%p5906_p7), [#allocation11], 256   ;;  %p5907_p11 = pmov %p5904_p5 }
 0x4cb   : > { %p5908_p3 = pmov %p5904_p5 }
 0x4cc   : > { %4047 = vsyncadd (%p5907_p11), [#allocation11], 4294967040 }
 0x4cd   : > { %4049 = dma.done.wait (%p5908_p3), [#allocation14], 512   ;;  %p5909_p8 = pmov %p5908_p3 }
 0x4ce   : > { %p5910_p13 = pmov %p5908_p3 }
 0x4cf   : > { %4051 = vsyncadd (%p5909_p8), [#allocation14], 4294966784 }
 0x4d0   : > { %4053 = dma.done.wait (%p5910_p13), [#allocation17], 256   ;;  %p5911_p9 = pmov %p5908_p3 }
 0x4d2   : > { %4055 = vsyncadd (%p5911_p9), [#allocation17], 4294967040 }
 0x4d3 PF: > { %s5912_s28 = sld [smem:[#allocation29_spill]] }
 0x4d4   : > { %s5913_s30 = sld [smem:[#allocation27_spill]] }
 0x4d5   : > { %s5914_s11 = sld [smem:[#allocation32_spill]] }
 0x4d9   : > { %p3395_p10 = scmp.ge.s32.totalorder %s5912_s28, 2 }
 0x4da   : > { %s2975_s22 = sand.u32 1, %s5913_s30  }
 0x4db   : > { %p5915_p2 = scmp.ne.s32.totalorder %s5914_s11, 0  ;;  %s2976_s18 = scalar_lea.sflag [#allocation6], %s2975_s22 }
 0x4dd   : > { %p3377_p12 = pnand %p3395_p10, %p5915_p2 }
 0x4df   : > { %p3378_p0 = pneg %p3377_p12 }
 0x4e1   : > { %4057 = dma.done.wait (%p3378_p0), %s2976_s18, 512  }
 0x4e2   : > { %4059 = vsyncadd (%p3378_p0), %s2976_s18, 4294966784  ;;  %s5916_s16 = sadd.s32 4294967294, %s5912_s28   ;;  %s5917_s27 = sld [smem:[#allocation34_spill]] }
 0x4e3   : > { %s2984_s21 = sand.u32 1, %s5916_s16  }
 0x4e4   : > { %s2985_s20 = scalar_lea.sflag [#allocation11], %s2984_s21 }
 0x4e8   : > { %p5918_p1 = scmp.ne.s32.totalorder %s5917_s27, 0 }
 0x4ea   : > { %p3380_p4 = pnand %p3395_p10, %p5918_p1 }
 0x4ec   : > { %p3381_p6 = pneg %p3380_p4 }
 0x4ee   : > { %4061 = dma.done.wait (%p3381_p6), %s2985_s20, 512  }
 0x4ef   : > { %4063 = vsyncadd (%p3381_p6), %s2985_s20, 4294966784  ;;  %s5919_s19 = sld [smem:[#allocation30_spill]]  ;;  %s5925_s16 = smov %s4082_s17 }
 0x4f0   : > { %s5920_s29 = sld [smem:[#allocation25_spill]] }
 0x4f1   : > { %s5921_s30 = sld [smem:[#allocation26_spill]] }
 0x4f2   : > { %s5922_s15 = sld [smem:[#allocation33_spill]] }
 0x4f3   : > { %s5923_s24 = sld [smem:[#allocation28_spill]] }
 0x4f4   : > { %s5924_s18 = sld [smem:[#allocation31_spill]] }
 0x4f5   : > { %p32_p5 = scmp.ge.s32.totalorder %s5919_s19, 4  }
 0x4f7   :  { %34 = sbr.rel (!%p32_p5) target bundleno = 15 (0xf), region = 170 }
 0x4f9   : > { %s5926_s17 = smov %s5923_s24 }
 0x4fc   :  { %2990 = vsyncpa [#allocation5], 1 }
 0x4fd   :  { %2992 = vsyncpa [#allocation5 + $0x1], 1 }
 0x4fe   :  { %2993 = vsyncpa [#allocation8], 1 }
 0x4ff   :  { %2994 = vsyncpa [#allocation6], 1 }
 0x500   :  { %2996 = vsyncpa [#allocation6 + $0x1], 1 }
 0x501   :  { %2997 = vsyncpa [#allocation11], 1 }
 0x502   :  { %2999 = vsyncpa [#allocation11 + $0x1], 1 }
 0x503   :  { %3000 = vsyncpa [#allocation14], 1 }
 0x504   :  { %3001 = vsyncpa [#allocation17], 1 }

</bundles_post_ra>
